<compile_context>
chip_gen: v7x
topology: tpu7x:2x2x1
jax: 0.10.0
libtpu: 0.0.40
codegen_flags: <defaults>
</compile_context>

<pallas_src>
import functools

import numpy as np
import jax
import jax.numpy as jnp
from jax.experimental import pallas as pl
from jax.experimental.pallas import tpu as pltpu


def _round_up(x, m):
    return ((x + m - 1) // m) * m


# ----------------------------------------------------------------------------
# Fused decoder kernel: L GRU layers + FC head, one invocation per batch tile.
#
# PyTorch GRU gate math (gate order r, z, n):
#   gi = x @ W_ih^T + (b_ih + [b_hr, b_hz, 0])   (hoisted, all steps at once)
#   gh = h @ W_hh^T                              (per step)
#   r  = sigmoid(gi_r + gh_r)
#   z  = sigmoid(gi_z + gh_z)
#   n  = tanh   (gi_n + r * (gh_n + b_hn))       (b_hn kept separate: scaled by r)
#   h' = (1 - z) * n + z * h
# ----------------------------------------------------------------------------
def decoder_kernel(x_ref, h0_ref, wi_ref, bi_ref, wh_ref, bhn_ref,
                   wfc_ref, bfc_ref, dec_ref, hlast_ref,
                   act_a, act_b, gi_scr,
                   *, seq_len, batch_tile, hidden_pad, in_pad, num_layers):
    S, TB, Hp, Kp, L = seq_len, batch_tile, hidden_pad, in_pad, num_layers
    acts = (act_a, act_b)   # ping-pong inter-layer activation buffers (VMEM only)

    for l in range(L):
        # ---- hoisted input projection: one (S*TB, K) @ (K, 3*Hp) MXU matmul ----
        if l == 0:
            x_in = x_ref[...].reshape(S * TB, Kp)     # layout-preserving reshape
            wi_l = wi_ref[l]                          # (Kp, 3*Hp)
        else:
            x_in = acts[(l - 1) % 2][...]             # (S*TB, Hp)
            wi_l = wi_ref[l, :Hp, :]                  # (Hp, 3*Hp)
        gi_scr[...] = (jnp.dot(x_in, wi_l, preferred_element_type=jnp.float32)
                       + bi_ref[l])                   # (S*TB, 3*Hp), f32

        wh_l = wh_ref[l]                              # (Hp, 3*Hp), loop-invariant RHS
        bhn_l = bhn_ref[l]                            # (1, Hp)
        h = h0_ref[l]                                 # (TB, Hp)
        y_dst = acts[l % 2]

        # ---- serial recurrence, fully unrolled (S is small) ----
        # TODO(synk): for S >~ 32 switch to lax.fori_loop reading gi_scr slices
        # to bound code size / vreg live ranges.
        for t in range(S):
            gi = gi_scr[t * TB:(t + 1) * TB, :]       # (TB, 3*Hp), aligned read
            gh = jnp.dot(h, wh_l, preferred_element_type=jnp.float32)
            r = jax.nn.sigmoid(gi[:, :Hp] + gh[:, :Hp])
            zg = jax.nn.sigmoid(gi[:, Hp:2 * Hp] + gh[:, Hp:2 * Hp])
            n = jnp.tanh(gi[:, 2 * Hp:] + r * (gh[:, 2 * Hp:] + bhn_l))
            h = (1.0 - zg) * n + zg * h
            y_dst[t * TB:(t + 1) * TB, :] = h         # lane-dense full-tile store
        hlast_ref[l] = h                              # written exactly once

    # ---- fused FC head: one (S*TB, Hp) @ (Hp, Op) matmul, lane-dense store ----
    fc_in = acts[(L - 1) % 2][...]
    dec = (jnp.dot(fc_in, wfc_ref[...], preferred_element_type=jnp.float32)
           + bfc_ref[...])
    dec_ref[...] = dec.reshape(S, TB, dec.shape[-1]).astype(dec_ref.dtype)


# ----------------------------------------------------------------------------
# Parameter construction (PyTorch-style uniform(-k, k)) + kernel repacking.
# ----------------------------------------------------------------------------
def init_params(key, latent_dim, num_layers, hidden, out_dim):
    k = 1.0 / np.sqrt(hidden)
    layers = []
    for l in range(num_layers):
        in_dim = latent_dim if l == 0 else hidden
        key, k1, k2, k3, k4 = jax.random.split(key, 5)
        W_ih = jax.random.uniform(k1, (3 * hidden, in_dim), jnp.float32, -k, k)
        W_hh = jax.random.uniform(k2, (3 * hidden, hidden), jnp.float32, -k, k)
        b_ih = jax.random.uniform(k3, (3 * hidden,), jnp.float32, -k, k)
        b_hh = jax.random.uniform(k4, (3 * hidden,), jnp.float32, -k, k)
        layers.append((W_ih, W_hh, b_ih, b_hh))
    key, k5, k6 = jax.random.split(key, 3)
    W_fc = jax.random.uniform(k5, (out_dim, hidden), jnp.float32, -k, k)
    b_fc = jax.random.uniform(k6, (out_dim,), jnp.float32, -k, k)
    return {"layers": layers, "fc_w": W_fc, "fc_b": b_fc}


def prepare_kernel_params(raw, *, latent_dim, hidden, out_dim):
    """Stack + fuse per-layer weights, 128-lane-align every gate, pad FC head."""
    H = hidden
    Hp = _round_up(H, 128)                              # per-gate lane block
    Kp = max(_round_up(latent_dim, 128), Hp)            # shared stacked input pad
    Op = _round_up(out_dim, 128)                        # lane-dense decoded store
    L = len(raw["layers"])

    wi = np.zeros((L, Kp, 3 * Hp), np.float32)
    bi = np.zeros((L, 1, 3 * Hp), np.float32)
    wh = np.zeros((L, Hp, 3 * Hp), np.float32)
    bhn = np.zeros((L, 1, Hp), np.float32)
    for l, (W_ih, W_hh, b_ih, b_hh) in enumerate(raw["layers"]):
        W_ih = np.asarray(W_ih); W_hh = np.asarray(W_hh)
        b_ih = np.asarray(b_ih); b_hh = np.asarray(b_hh)
        in_dim = W_ih.shape[1]
        for g in range(3):                              # gate blocks: r | z | n
            wi[l, :in_dim, g * Hp:g * Hp + H] = W_ih[g * H:(g + 1) * H, :].T
            wh[l, :H, g * Hp:g * Hp + H] = W_hh[g * H:(g + 1) * H, :].T
            bias = b_ih[g * H:(g + 1) * H].copy()
            if g < 2:                                   # fold b_hr, b_hz into bi
                bias = bias + b_hh[g * H:(g + 1) * H]
            bi[l, 0, g * Hp:g * Hp + H] = bias
        bhn[l, 0, :H] = b_hh[2 * H:3 * H]               # b_hn stays separate (× r)

    W_fc = np.asarray(raw["fc_w"]); b_fc = np.asarray(raw["fc_b"])
    wfc = np.zeros((Hp, Op), np.float32); wfc[:H, :out_dim] = W_fc.T
    bfc = np.zeros((1, Op), np.float32); bfc[0, :out_dim] = b_fc

    return dict(wi=jnp.asarray(wi), bi=jnp.asarray(bi),
                wh=jnp.asarray(wh), bhn=jnp.asarray(bhn),
                wfc=jnp.asarray(wfc), bfc=jnp.asarray(bfc),
                Hp=Hp, Kp=Kp, Op=Op, hidden=H, out_dim=out_dim)


# ----------------------------------------------------------------------------
# Full VAEDecoder.forward — one fused pallas_call.
# ----------------------------------------------------------------------------
def vae_decoder_forward(z, hidden, kp, *, batch_tile=None):
    S, B, latent = z.shape
    L, _, H = hidden.shape
    Hp, Kp, Op = kp["Hp"], kp["Kp"], kp["Op"]

    Bp = _round_up(B, 8)                                # sublane-aligned batch
    TB = Bp if batch_tile is None else batch_tile       # batch tile per grid step
    assert TB % 8 == 0 and Bp % TB == 0
    grid = (Bp // TB,)                                  # "parallel": v7x 2-TC split

    x = jnp.zeros((S, Bp, Kp), jnp.float32).at[:, :B, :latent].set(z)
    h0 = jnp.zeros((L, Bp, Hp), jnp.float32).at[:, :B, :H].set(hidden)

    kernel = functools.partial(decoder_kernel, seq_len=S, batch_tile=TB,
                               hidden_pad=Hp, in_pad=Kp, num_layers=L)

    dec, hlast = pl.pallas_call(
        kernel,
        out_shape=(jax.ShapeDtypeStruct((S, Bp, Op), jnp.float32),
                   jax.ShapeDtypeStruct((L, Bp, Hp), jnp.float32)),
        grid_spec=pltpu.PrefetchScalarGridSpec(
            num_scalar_prefetch=0,
            grid=grid,
            in_specs=[
                pl.BlockSpec((S, TB, Kp), lambda b: (0, b, 0)),        # z (padded)
                pl.BlockSpec((L, TB, Hp), lambda b: (0, b, 0)),        # h0
                pl.BlockSpec((L, Kp, 3 * Hp), lambda b: (0, 0, 0)),    # W_i stacked
                pl.BlockSpec((L, 1, 3 * Hp), lambda b: (0, 0, 0)),     # b_i stacked
                pl.BlockSpec((L, Hp, 3 * Hp), lambda b: (0, 0, 0)),    # W_h stacked
                pl.BlockSpec((L, 1, Hp), lambda b: (0, 0, 0)),         # b_hn stacked
                pl.BlockSpec((Hp, Op), lambda b: (0, 0)),              # FC weight
                pl.BlockSpec((1, Op), lambda b: (0, 0)),               # FC bias
            ],
            out_specs=[
                pl.BlockSpec((S, TB, Op), lambda b: (0, b, 0)),        # decoded
                pl.BlockSpec((L, TB, Hp), lambda b: (0, b, 0)),        # h_last
            ],
            scratch_shapes=[
                pltpu.VMEM((S * TB, Hp), jnp.float32),     # act ping
                pltpu.VMEM((S * TB, Hp), jnp.float32),     # act pong
                pltpu.VMEM((S * TB, 3 * Hp), jnp.float32), # hoisted gi staging
            ]),
        compiler_params=pltpu.CompilerParams(
            dimension_semantics=("parallel",)),
    )(x, h0, kp["wi"], kp["bi"], kp["wh"], kp["bhn"], kp["wfc"], kp["bfc"])

    decoded = dec[:, :B, :kp["out_dim"]]                 # drop lane/batch padding
    hidden_out = hlast[:, :B, :H]
    return decoded, hidden_out


# ----------------------------------------------------------------------------
# Pure-JAX reference (mirrors torch.nn.GRU + Linear) for correctness check.
# ----------------------------------------------------------------------------
def reference_forward(z, hidden, raw):
    x = z
    h_finals = []
    for l, (W_ih, W_hh, b_ih, b_hh) in enumerate(raw["layers"]):
        h0 = hidden[l]

        def step(h, xt, W_ih=W_ih, W_hh=W_hh, b_ih=b_ih, b_hh=b_hh):
            gi = xt @ W_ih.T + b_ih
            gh = h @ W_hh.T + b_hh
            i_r, i_z, i_n = jnp.split(gi, 3, axis=-1)
            h_r, h_z, h_n = jnp.split(gh, 3, axis=-1)
            r = jax.nn.sigmoid(i_r + h_r)
            zz = jax.nn.sigmoid(i_z + h_z)
            n = jnp.tanh(i_n + r * h_n)
            h_new = (1.0 - zz) * n + zz * h
            return h_new, h_new

        hN, ys = jax.lax.scan(step, h0, x)
        x = ys
        h_finals.append(hN)
    decoded = x @ raw["fc_w"].T + raw["fc_b"]
    return decoded, jnp.stack(h_finals, axis=0)


if __name__ == "__main__":
    # Shapes consistent with the module: z (seq, batch, latent), hidden (L, B, H)
    S, B = 8, 2
    LATENT, LAYERS, HIDDEN, OUT = 16, 2, 32, 24

    key = jax.random.PRNGKey(0)
    key, kz, kh = jax.random.split(key, 3)
    z = jax.random.normal(kz, (S, B, LATENT), dtype=jnp.float32)
    # init_hidden() would be zeros; use a random hidden to exercise the h0 path.
    hidden0 = 0.1 * jax.random.normal(kh, (LAYERS, B, HIDDEN), dtype=jnp.float32)

    raw = init_params(key, LATENT, LAYERS, HIDDEN, OUT)
    dec_ref, hid_ref = reference_forward(z, hidden0, raw)

    kp = prepare_kernel_params(raw, latent_dim=LATENT, hidden=HIDDEN, out_dim=OUT)
    decoded, hidden_out = vae_decoder_forward(z, hidden0, kp)
    decoded = jax.block_until_ready(decoded)
    hidden_out = jax.block_until_ready(hidden_out)

    np.testing.assert_allclose(np.asarray(decoded), np.asarray(dec_ref),
                               rtol=1e-5, atol=1e-5)
    np.testing.assert_allclose(np.asarray(hidden_out), np.asarray(hid_ref),
                               rtol=1e-5, atol=1e-5)

    assert decoded.shape == (S, B, OUT)
    assert hidden_out.shape == (LAYERS, B, HIDDEN)
    print("KERNEL_OK")
</pallas_src>

<mosaic_0001>
module attributes {stable_mosaic.version = 11 : i64} {
  func.func @decoder_kernel(%arg0: i32, %arg1: memref<8x8x128xf32, #tpu.memory_space<vmem>>, %arg2: memref<2x8x128xf32, #tpu.memory_space<vmem>>, %arg3: memref<2x128x384xf32, #tpu.memory_space<vmem>>, %arg4: memref<2x1x384xf32, #tpu.memory_space<vmem>>, %arg5: memref<2x128x384xf32, #tpu.memory_space<vmem>>, %arg6: memref<2x1x128xf32, #tpu.memory_space<vmem>>, %arg7: memref<128x128xf32, #tpu.memory_space<vmem>>, %arg8: memref<1x128xf32, #tpu.memory_space<vmem>>, %arg9: memref<8x8x128xf32, #tpu.memory_space<vmem>>, %arg10: memref<2x8x128xf32, #tpu.memory_space<vmem>>, %arg11: memref<64x128xf32, #tpu.memory_space<vmem>>, %arg12: memref<64x128xf32, #tpu.memory_space<vmem>>, %arg13: memref<64x384xf32, #tpu.memory_space<vmem>>) attributes {dimension_semantics = [#tpu.dimension_semantics<parallel>], iteration_bounds = array<i64: 1>, scalar_prefetch = 0 : i64, scratch_operands = 3 : i64, tpu.core_type = #tpu.core_type<tc>, window_params = [{transform_indices = @transform_0, window_bounds = array<i64: 8, 8, 128>}, {transform_indices = @transform_1, window_bounds = array<i64: 2, 8, 128>}, {pipeline_mode = #tpu.pipeline_mode<synchronous>, transform_indices = @transform_2, window_bounds = array<i64: 2, 128, 384>}, {pipeline_mode = #tpu.pipeline_mode<synchronous>, transform_indices = @transform_3, window_bounds = array<i64: 2, 1, 384>}, {pipeline_mode = #tpu.pipeline_mode<synchronous>, transform_indices = @transform_4, window_bounds = array<i64: 2, 128, 384>}, {pipeline_mode = #tpu.pipeline_mode<synchronous>, transform_indices = @transform_5, window_bounds = array<i64: 2, 1, 128>}, {pipeline_mode = #tpu.pipeline_mode<synchronous>, transform_indices = @transform_6, window_bounds = array<i64: 128, 128>}, {pipeline_mode = #tpu.pipeline_mode<synchronous>, transform_indices = @transform_7, window_bounds = array<i64: 1, 128>}, {transform_indices = @transform_8, window_bounds = array<i64: 8, 8, 128>}, {transform_indices = @transform_9, window_bounds = array<i64: 2, 8, 128>}]} {
    %c0 = arith.constant 0 : index
    %c0_0 = arith.constant 0 : index
    %c0_1 = arith.constant 0 : index
    %0 = vector.load %arg1[%c0, %c0_0, %c0_1] : memref<8x8x128xf32, #tpu.memory_space<vmem>>, vector<8x8x128xf32>
    %1 = vector.shape_cast %0 : vector<8x8x128xf32> to vector<64x128xf32>
    %c0_2 = arith.constant 0 : index
    %c0_3 = arith.constant 0 : index
    %c0_4 = arith.constant 0 : index
    %2 = vector.load %arg3[%c0_2, %c0_3, %c0_4] : memref<2x128x384xf32, #tpu.memory_space<vmem>>, vector<1x128x384xf32>
    %3 = vector.shape_cast %2 : vector<1x128x384xf32> to vector<128x384xf32>
    %cst = arith.constant dense<0.000000e+00> : vector<64x384xf32>
    %4 = tpu.matmul %1, %3, %cst {dimension_numbers = #tpu.dot_dimension_numbers<[1], [0], [0], [1], [0, 0, 1, 1], [], []>} : vector<64x128xf32>, vector<128x384xf32>, vector<64x384xf32> -> vector<64x384xf32>
    %c0_5 = arith.constant 0 : index
    %c0_6 = arith.constant 0 : index
    %c0_7 = arith.constant 0 : index
    %5 = vector.load %arg4[%c0_5, %c0_6, %c0_7] : memref<2x1x384xf32, #tpu.memory_space<vmem>>, vector<1x1x384xf32>
    %6 = vector.shape_cast %5 : vector<1x1x384xf32> to vector<1x384xf32>
    %7 = vector.broadcast %6 : vector<1x384xf32> to vector<64x384xf32>
    %8 = arith.addf %4, %7 : vector<64x384xf32>
    %c0_8 = arith.constant 0 : index
    %c0_9 = arith.constant 0 : index
    %9 = vector.load %arg13[%c0_8, %c0_9] : memref<64x384xf32, #tpu.memory_space<vmem>>, vector<64x384xf32>
    tpu.vector_store %arg13[%c0_8, %c0_9], %8 {strides = array<i32>} : memref<64x384xf32, #tpu.memory_space<vmem>>, vector<64x384xf32>,
    %c0_10 = arith.constant 0 : index
    %c0_11 = arith.constant 0 : index
    %c0_12 = arith.constant 0 : index
    %10 = vector.load %arg5[%c0_10, %c0_11, %c0_12] : memref<2x128x384xf32, #tpu.memory_space<vmem>>, vector<1x128x384xf32>
    %11 = vector.shape_cast %10 : vector<1x128x384xf32> to vector<128x384xf32>
    %c0_13 = arith.constant 0 : index
    %c0_14 = arith.constant 0 : index
    %c0_15 = arith.constant 0 : index
    %12 = vector.load %arg6[%c0_13, %c0_14, %c0_15] : memref<2x1x128xf32, #tpu.memory_space<vmem>>, vector<1x1x128xf32>
    %13 = vector.shape_cast %12 : vector<1x1x128xf32> to vector<1x128xf32>
    %c0_16 = arith.constant 0 : index
    %c0_17 = arith.constant 0 : index
    %c0_18 = arith.constant 0 : index
    %14 = vector.load %arg2[%c0_16, %c0_17, %c0_18] : memref<2x8x128xf32, #tpu.memory_space<vmem>>, vector<1x8x128xf32>
    %15 = vector.shape_cast %14 : vector<1x8x128xf32> to vector<8x128xf32>
    %c0_19 = arith.constant 0 : index
    %c0_20 = arith.constant 0 : index
    %16 = vector.load %arg13[%c0_19, %c0_20] : memref<64x384xf32, #tpu.memory_space<vmem>>, vector<8x384xf32>
    %cst_21 = arith.constant dense<0.000000e+00> : vector<8x384xf32>
    %17 = tpu.matmul %15, %11, %cst_21 {dimension_numbers = #tpu.dot_dimension_numbers<[1], [0], [0], [1], [0, 0, 1, 1], [], []>} : vector<8x128xf32>, vector<128x384xf32>, vector<8x384xf32> -> vector<8x384xf32>
    %18 = vector.extract_strided_slice %16 {offsets = [0, 0], sizes = [8, 128], strides = [1, 1]} : vector<8x384xf32> to vector<8x128xf32>
    %19 = vector.extract_strided_slice %17 {offsets = [0, 0], sizes = [8, 128], strides = [1, 1]} : vector<8x384xf32> to vector<8x128xf32>
    %20 = arith.addf %18, %19 : vector<8x128xf32>
    %21 = arith.negf %20 : vector<8x128xf32>
    %22 = math.exp %21 : vector<8x128xf32>
    %cst_22 = arith.constant 1.000000e+00 : f32
    %23 = vector.broadcast %cst_22 : f32 to vector<8x128xf32>
    %24 = arith.addf %23, %22 : vector<8x128xf32>
    %25 = arith.divf %23, %24 : vector<8x128xf32>
    %26 = vector.extract_strided_slice %16 {offsets = [0, 128], sizes = [8, 128], strides = [1, 1]} : vector<8x384xf32> to vector<8x128xf32>
    %27 = vector.extract_strided_slice %17 {offsets = [0, 128], sizes = [8, 128], strides = [1, 1]} : vector<8x384xf32> to vector<8x128xf32>
    %28 = arith.addf %26, %27 : vector<8x128xf32>
    %29 = arith.negf %28 : vector<8x128xf32>
    %30 = math.exp %29 : vector<8x128xf32>
    %cst_23 = arith.constant 1.000000e+00 : f32
    %31 = vector.broadcast %cst_23 : f32 to vector<8x128xf32>
    %32 = arith.addf %31, %30 : vector<8x128xf32>
    %33 = arith.divf %31, %32 : vector<8x128xf32>
    %34 = vector.extract_strided_slice %16 {offsets = [0, 256], sizes = [8, 128], strides = [1, 1]} : vector<8x384xf32> to vector<8x128xf32>
    %35 = vector.extract_strided_slice %17 {offsets = [0, 256], sizes = [8, 128], strides = [1, 1]} : vector<8x384xf32> to vector<8x128xf32>
    %36 = vector.broadcast %13 : vector<1x128xf32> to vector<8x128xf32>
    %37 = arith.addf %35, %36 : vector<8x128xf32>
    %38 = arith.mulf %25, %37 : vector<8x128xf32>
    %39 = arith.addf %34, %38 : vector<8x128xf32>
    %40 = math.tanh %39 : vector<8x128xf32>
    %cst_24 = arith.constant 1.000000e+00 : f32
    %41 = vector.broadcast %cst_24 : f32 to vector<8x128xf32>
    %42 = arith.subf %41, %33 : vector<8x128xf32>
    %43 = arith.mulf %42, %40 : vector<8x128xf32>
    %44 = arith.mulf %33, %15 : vector<8x128xf32>
    %45 = arith.addf %43, %44 : vector<8x128xf32>
    %c0_25 = arith.constant 0 : index
    %c0_26 = arith.constant 0 : index
    %46 = vector.load %arg11[%c0_25, %c0_26] : memref<64x128xf32, #tpu.memory_space<vmem>>, vector<8x128xf32>
    tpu.vector_store %arg11[%c0_25, %c0_26], %45 {strides = array<i32>} : memref<64x128xf32, #tpu.memory_space<vmem>>, vector<8x128xf32>,
    %c8 = arith.constant 8 : index
    %c0_27 = arith.constant 0 : index
    %47 = vector.load %arg13[%c8, %c0_27] : memref<64x384xf32, #tpu.memory_space<vmem>>, vector<8x384xf32>
    %cst_28 = arith.constant dense<0.000000e+00> : vector<8x384xf32>
    %48 = tpu.matmul %45, %11, %cst_28 {dimension_numbers = #tpu.dot_dimension_numbers<[1], [0], [0], [1], [0, 0, 1, 1], [], []>} : vector<8x128xf32>, vector<128x384xf32>, vector<8x384xf32> -> vector<8x384xf32>
    %49 = vector.extract_strided_slice %47 {offsets = [0, 0], sizes = [8, 128], strides = [1, 1]} : vector<8x384xf32> to vector<8x128xf32>
    %50 = vector.extract_strided_slice %48 {offsets = [0, 0], sizes = [8, 128], strides = [1, 1]} : vector<8x384xf32> to vector<8x128xf32>
    %51 = arith.addf %49, %50 : vector<8x128xf32>
    %52 = arith.negf %51 : vector<8x128xf32>
    %53 = math.exp %52 : vector<8x128xf32>
    %cst_29 = arith.constant 1.000000e+00 : f32
    %54 = vector.broadcast %cst_29 : f32 to vector<8x128xf32>
    %55 = arith.addf %54, %53 : vector<8x128xf32>
    %56 = arith.divf %54, %55 : vector<8x128xf32>
    %57 = vector.extract_strided_slice %47 {offsets = [0, 128], sizes = [8, 128], strides = [1, 1]} : vector<8x384xf32> to vector<8x128xf32>
    %58 = vector.extract_strided_slice %48 {offsets = [0, 128], sizes = [8, 128], strides = [1, 1]} : vector<8x384xf32> to vector<8x128xf32>
    %59 = arith.addf %57, %58 : vector<8x128xf32>
    %60 = arith.negf %59 : vector<8x128xf32>
    %61 = math.exp %60 : vector<8x128xf32>
    %cst_30 = arith.constant 1.000000e+00 : f32
    %62 = vector.broadcast %cst_30 : f32 to vector<8x128xf32>
    %63 = arith.addf %62, %61 : vector<8x128xf32>
    %64 = arith.divf %62, %63 : vector<8x128xf32>
    %65 = vector.extract_strided_slice %47 {offsets = [0, 256], sizes = [8, 128], strides = [1, 1]} : vector<8x384xf32> to vector<8x128xf32>
    %66 = vector.extract_strided_slice %48 {offsets = [0, 256], sizes = [8, 128], strides = [1, 1]} : vector<8x384xf32> to vector<8x128xf32>
    %67 = vector.broadcast %13 : vector<1x128xf32> to vector<8x128xf32>
    %68 = arith.addf %66, %67 : vector<8x128xf32>
    %69 = arith.mulf %56, %68 : vector<8x128xf32>
    %70 = arith.addf %65, %69 : vector<8x128xf32>
    %71 = math.tanh %70 : vector<8x128xf32>
    %cst_31 = arith.constant 1.000000e+00 : f32
    %72 = vector.broadcast %cst_31 : f32 to vector<8x128xf32>
    %73 = arith.subf %72, %64 : vector<8x128xf32>
    %74 = arith.mulf %73, %71 : vector<8x128xf32>
    %75 = arith.mulf %64, %45 : vector<8x128xf32>
    %76 = arith.addf %74, %75 : vector<8x128xf32>
    %c8_32 = arith.constant 8 : index
    %c0_33 = arith.constant 0 : index
    %77 = vector.load %arg11[%c8_32, %c0_33] : memref<64x128xf32, #tpu.memory_space<vmem>>, vector<8x128xf32>
    tpu.vector_store %arg11[%c8_32, %c0_33], %76 {strides = array<i32>} : memref<64x128xf32, #tpu.memory_space<vmem>>, vector<8x128xf32>,
    %c16 = arith.constant 16 : index
    %c0_34 = arith.constant 0 : index
    %78 = vector.load %arg13[%c16, %c0_34] : memref<64x384xf32, #tpu.memory_space<vmem>>, vector<8x384xf32>
    %cst_35 = arith.constant dense<0.000000e+00> : vector<8x384xf32>
    %79 = tpu.matmul %76, %11, %cst_35 {dimension_numbers = #tpu.dot_dimension_numbers<[1], [0], [0], [1], [0, 0, 1, 1], [], []>} : vector<8x128xf32>, vector<128x384xf32>, vector<8x384xf32> -> vector<8x384xf32>
    %80 = vector.extract_strided_slice %78 {offsets = [0, 0], sizes = [8, 128], strides = [1, 1]} : vector<8x384xf32> to vector<8x128xf32>
    %81 = vector.extract_strided_slice %79 {offsets = [0, 0], sizes = [8, 128], strides = [1, 1]} : vector<8x384xf32> to vector<8x128xf32>
    %82 = arith.addf %80, %81 : vector<8x128xf32>
    %83 = arith.negf %82 : vector<8x128xf32>
    %84 = math.exp %83 : vector<8x128xf32>
    %cst_36 = arith.constant 1.000000e+00 : f32
    %85 = vector.broadcast %cst_36 : f32 to vector<8x128xf32>
    %86 = arith.addf %85, %84 : vector<8x128xf32>
    %87 = arith.divf %85, %86 : vector<8x128xf32>
    %88 = vector.extract_strided_slice %78 {offsets = [0, 128], sizes = [8, 128], strides = [1, 1]} : vector<8x384xf32> to vector<8x128xf32>
    %89 = vector.extract_strided_slice %79 {offsets = [0, 128], sizes = [8, 128], strides = [1, 1]} : vector<8x384xf32> to vector<8x128xf32>
    %90 = arith.addf %88, %89 : vector<8x128xf32>
    %91 = arith.negf %90 : vector<8x128xf32>
    %92 = math.exp %91 : vector<8x128xf32>
    %cst_37 = arith.constant 1.000000e+00 : f32
    %93 = vector.broadcast %cst_37 : f32 to vector<8x128xf32>
    %94 = arith.addf %93, %92 : vector<8x128xf32>
    %95 = arith.divf %93, %94 : vector<8x128xf32>
    %96 = vector.extract_strided_slice %78 {offsets = [0, 256], sizes = [8, 128], strides = [1, 1]} : vector<8x384xf32> to vector<8x128xf32>
    %97 = vector.extract_strided_slice %79 {offsets = [0, 256], sizes = [8, 128], strides = [1, 1]} : vector<8x384xf32> to vector<8x128xf32>
    %98 = vector.broadcast %13 : vector<1x128xf32> to vector<8x128xf32>
    %99 = arith.addf %97, %98 : vector<8x128xf32>
    %100 = arith.mulf %87, %99 : vector<8x128xf32>
    %101 = arith.addf %96, %100 : vector<8x128xf32>
    %102 = math.tanh %101 : vector<8x128xf32>
    %cst_38 = arith.constant 1.000000e+00 : f32
    %103 = vector.broadcast %cst_38 : f32 to vector<8x128xf32>
    %104 = arith.subf %103, %95 : vector<8x128xf32>
    %105 = arith.mulf %104, %102 : vector<8x128xf32>
    %106 = arith.mulf %95, %76 : vector<8x128xf32>
    %107 = arith.addf %105, %106 : vector<8x128xf32>
    %c16_39 = arith.constant 16 : index
    %c0_40 = arith.constant 0 : index
    %108 = vector.load %arg11[%c16_39, %c0_40] : memref<64x128xf32, #tpu.memory_space<vmem>>, vector<8x128xf32>
    tpu.vector_store %arg11[%c16_39, %c0_40], %107 {strides = array<i32>} : memref<64x128xf32, #tpu.memory_space<vmem>>, vector<8x128xf32>,
    %c24 = arith.constant 24 : index
    %c0_41 = arith.constant 0 : index
    %109 = vector.load %arg13[%c24, %c0_41] : memref<64x384xf32, #tpu.memory_space<vmem>>, vector<8x384xf32>
    %cst_42 = arith.constant dense<0.000000e+00> : vector<8x384xf32>
    %110 = tpu.matmul %107, %11, %cst_42 {dimension_numbers = #tpu.dot_dimension_numbers<[1], [0], [0], [1], [0, 0, 1, 1], [], []>} : vector<8x128xf32>, vector<128x384xf32>, vector<8x384xf32> -> vector<8x384xf32>
    %111 = vector.extract_strided_slice %109 {offsets = [0, 0], sizes = [8, 128], strides = [1, 1]} : vector<8x384xf32> to vector<8x128xf32>
    %112 = vector.extract_strided_slice %110 {offsets = [0, 0], sizes = [8, 128], strides = [1, 1]} : vector<8x384xf32> to vector<8x128xf32>
    %113 = arith.addf %111, %112 : vector<8x128xf32>
    %114 = arith.negf %113 : vector<8x128xf32>
    %115 = math.exp %114 : vector<8x128xf32>
    %cst_43 = arith.constant 1.000000e+00 : f32
    %116 = vector.broadcast %cst_43 : f32 to vector<8x128xf32>
    %117 = arith.addf %116, %115 : vector<8x128xf32>
    %118 = arith.divf %116, %117 : vector<8x128xf32>
    %119 = vector.extract_strided_slice %109 {offsets = [0, 128], sizes = [8, 128], strides = [1, 1]} : vector<8x384xf32> to vector<8x128xf32>
    %120 = vector.extract_strided_slice %110 {offsets = [0, 128], sizes = [8, 128], strides = [1, 1]} : vector<8x384xf32> to vector<8x128xf32>
    %121 = arith.addf %119, %120 : vector<8x128xf32>
    %122 = arith.negf %121 : vector<8x128xf32>
    %123 = math.exp %122 : vector<8x128xf32>
    %cst_44 = arith.constant 1.000000e+00 : f32
    %124 = vector.broadcast %cst_44 : f32 to vector<8x128xf32>
    %125 = arith.addf %124, %123 : vector<8x128xf32>
    %126 = arith.divf %124, %125 : vector<8x128xf32>
    %127 = vector.extract_strided_slice %109 {offsets = [0, 256], sizes = [8, 128], strides = [1, 1]} : vector<8x384xf32> to vector<8x128xf32>
    %128 = vector.extract_strided_slice %110 {offsets = [0, 256], sizes = [8, 128], strides = [1, 1]} : vector<8x384xf32> to vector<8x128xf32>
    %129 = vector.broadcast %13 : vector<1x128xf32> to vector<8x128xf32>
    %130 = arith.addf %128, %129 : vector<8x128xf32>
    %131 = arith.mulf %118, %130 : vector<8x128xf32>
    %132 = arith.addf %127, %131 : vector<8x128xf32>
    %133 = math.tanh %132 : vector<8x128xf32>
    %cst_45 = arith.constant 1.000000e+00 : f32
    %134 = vector.broadcast %cst_45 : f32 to vector<8x128xf32>
    %135 = arith.subf %134, %126 : vector<8x128xf32>
    %136 = arith.mulf %135, %133 : vector<8x128xf32>
    %137 = arith.mulf %126, %107 : vector<8x128xf32>
    %138 = arith.addf %136, %137 : vector<8x128xf32>
    %c24_46 = arith.constant 24 : index
    %c0_47 = arith.constant 0 : index
    %139 = vector.load %arg11[%c24_46, %c0_47] : memref<64x128xf32, #tpu.memory_space<vmem>>, vector<8x128xf32>
    tpu.vector_store %arg11[%c24_46, %c0_47], %138 {strides = array<i32>} : memref<64x128xf32, #tpu.memory_space<vmem>>, vector<8x128xf32>,
    %c32 = arith.constant 32 : index
    %c0_48 = arith.constant 0 : index
    %140 = vector.load %arg13[%c32, %c0_48] : memref<64x384xf32, #tpu.memory_space<vmem>>, vector<8x384xf32>
    %cst_49 = arith.constant dense<0.000000e+00> : vector<8x384xf32>
    %141 = tpu.matmul %138, %11, %cst_49 {dimension_numbers = #tpu.dot_dimension_numbers<[1], [0], [0], [1], [0, 0, 1, 1], [], []>} : vector<8x128xf32>, vector<128x384xf32>, vector<8x384xf32> -> vector<8x384xf32>
    %142 = vector.extract_strided_slice %140 {offsets = [0, 0], sizes = [8, 128], strides = [1, 1]} : vector<8x384xf32> to vector<8x128xf32>
    %143 = vector.extract_strided_slice %141 {offsets = [0, 0], sizes = [8, 128], strides = [1, 1]} : vector<8x384xf32> to vector<8x128xf32>
    %144 = arith.addf %142, %143 : vector<8x128xf32>
    %145 = arith.negf %144 : vector<8x128xf32>
    %146 = math.exp %145 : vector<8x128xf32>
    %cst_50 = arith.constant 1.000000e+00 : f32
    %147 = vector.broadcast %cst_50 : f32 to vector<8x128xf32>
    %148 = arith.addf %147, %146 : vector<8x128xf32>
    %149 = arith.divf %147, %148 : vector<8x128xf32>
    %150 = vector.extract_strided_slice %140 {offsets = [0, 128], sizes = [8, 128], strides = [1, 1]} : vector<8x384xf32> to vector<8x128xf32>
    %151 = vector.extract_strided_slice %141 {offsets = [0, 128], sizes = [8, 128], strides = [1, 1]} : vector<8x384xf32> to vector<8x128xf32>
    %152 = arith.addf %150, %151 : vector<8x128xf32>
    %153 = arith.negf %152 : vector<8x128xf32>
    %154 = math.exp %153 : vector<8x128xf32>
    %cst_51 = arith.constant 1.000000e+00 : f32
    %155 = vector.broadcast %cst_51 : f32 to vector<8x128xf32>
    %156 = arith.addf %155, %154 : vector<8x128xf32>
    %157 = arith.divf %155, %156 : vector<8x128xf32>
    %158 = vector.extract_strided_slice %140 {offsets = [0, 256], sizes = [8, 128], strides = [1, 1]} : vector<8x384xf32> to vector<8x128xf32>
    %159 = vector.extract_strided_slice %141 {offsets = [0, 256], sizes = [8, 128], strides = [1, 1]} : vector<8x384xf32> to vector<8x128xf32>
    %160 = vector.broadcast %13 : vector<1x128xf32> to vector<8x128xf32>
    %161 = arith.addf %159, %160 : vector<8x128xf32>
    %162 = arith.mulf %149, %161 : vector<8x128xf32>
    %163 = arith.addf %158, %162 : vector<8x128xf32>
    %164 = math.tanh %163 : vector<8x128xf32>
    %cst_52 = arith.constant 1.000000e+00 : f32
    %165 = vector.broadcast %cst_52 : f32 to vector<8x128xf32>
    %166 = arith.subf %165, %157 : vector<8x128xf32>
    %167 = arith.mulf %166, %164 : vector<8x128xf32>
    %168 = arith.mulf %157, %138 : vector<8x128xf32>
    %169 = arith.addf %167, %168 : vector<8x128xf32>
    %c32_53 = arith.constant 32 : index
    %c0_54 = arith.constant 0 : index
    %170 = vector.load %arg11[%c32_53, %c0_54] : memref<64x128xf32, #tpu.memory_space<vmem>>, vector<8x128xf32>
    tpu.vector_store %arg11[%c32_53, %c0_54], %169 {strides = array<i32>} : memref<64x128xf32, #tpu.memory_space<vmem>>, vector<8x128xf32>,
    %c40 = arith.constant 40 : index
    %c0_55 = arith.constant 0 : index
    %171 = vector.load %arg13[%c40, %c0_55] : memref<64x384xf32, #tpu.memory_space<vmem>>, vector<8x384xf32>
    %cst_56 = arith.constant dense<0.000000e+00> : vector<8x384xf32>
    %172 = tpu.matmul %169, %11, %cst_56 {dimension_numbers = #tpu.dot_dimension_numbers<[1], [0], [0], [1], [0, 0, 1, 1], [], []>} : vector<8x128xf32>, vector<128x384xf32>, vector<8x384xf32> -> vector<8x384xf32>
    %173 = vector.extract_strided_slice %171 {offsets = [0, 0], sizes = [8, 128], strides = [1, 1]} : vector<8x384xf32> to vector<8x128xf32>
    %174 = vector.extract_strided_slice %172 {offsets = [0, 0], sizes = [8, 128], strides = [1, 1]} : vector<8x384xf32> to vector<8x128xf32>
    %175 = arith.addf %173, %174 : vector<8x128xf32>
    %176 = arith.negf %175 : vector<8x128xf32>
    %177 = math.exp %176 : vector<8x128xf32>
    %cst_57 = arith.constant 1.000000e+00 : f32
    %178 = vector.broadcast %cst_57 : f32 to vector<8x128xf32>
    %179 = arith.addf %178, %177 : vector<8x128xf32>
    %180 = arith.divf %178, %179 : vector<8x128xf32>
    %181 = vector.extract_strided_slice %171 {offsets = [0, 128], sizes = [8, 128], strides = [1, 1]} : vector<8x384xf32> to vector<8x128xf32>
    %182 = vector.extract_strided_slice %172 {offsets = [0, 128], sizes = [8, 128], strides = [1, 1]} : vector<8x384xf32> to vector<8x128xf32>
    %183 = arith.addf %181, %182 : vector<8x128xf32>
    %184 = arith.negf %183 : vector<8x128xf32>
    %185 = math.exp %184 : vector<8x128xf32>
    %cst_58 = arith.constant 1.000000e+00 : f32
    %186 = vector.broadcast %cst_58 : f32 to vector<8x128xf32>
    %187 = arith.addf %186, %185 : vector<8x128xf32>
    %188 = arith.divf %186, %187 : vector<8x128xf32>
    %189 = vector.extract_strided_slice %171 {offsets = [0, 256], sizes = [8, 128], strides = [1, 1]} : vector<8x384xf32> to vector<8x128xf32>
    %190 = vector.extract_strided_slice %172 {offsets = [0, 256], sizes = [8, 128], strides = [1, 1]} : vector<8x384xf32> to vector<8x128xf32>
    %191 = vector.broadcast %13 : vector<1x128xf32> to vector<8x128xf32>
    %192 = arith.addf %190, %191 : vector<8x128xf32>
    %193 = arith.mulf %180, %192 : vector<8x128xf32>
    %194 = arith.addf %189, %193 : vector<8x128xf32>
    %195 = math.tanh %194 : vector<8x128xf32>
    %cst_59 = arith.constant 1.000000e+00 : f32
    %196 = vector.broadcast %cst_59 : f32 to vector<8x128xf32>
    %197 = arith.subf %196, %188 : vector<8x128xf32>
    %198 = arith.mulf %197, %195 : vector<8x128xf32>
    %199 = arith.mulf %188, %169 : vector<8x128xf32>
    %200 = arith.addf %198, %199 : vector<8x128xf32>
    %c40_60 = arith.constant 40 : index
    %c0_61 = arith.constant 0 : index
    %201 = vector.load %arg11[%c40_60, %c0_61] : memref<64x128xf32, #tpu.memory_space<vmem>>, vector<8x128xf32>
    tpu.vector_store %arg11[%c40_60, %c0_61], %200 {strides = array<i32>} : memref<64x128xf32, #tpu.memory_space<vmem>>, vector<8x128xf32>,
    %c48 = arith.constant 48 : index
    %c0_62 = arith.constant 0 : index
    %202 = vector.load %arg13[%c48, %c0_62] : memref<64x384xf32, #tpu.memory_space<vmem>>, vector<8x384xf32>
    %cst_63 = arith.constant dense<0.000000e+00> : vector<8x384xf32>
    %203 = tpu.matmul %200, %11, %cst_63 {dimension_numbers = #tpu.dot_dimension_numbers<[1], [0], [0], [1], [0, 0, 1, 1], [], []>} : vector<8x128xf32>, vector<128x384xf32>, vector<8x384xf32> -> vector<8x384xf32>
    %204 = vector.extract_strided_slice %202 {offsets = [0, 0], sizes = [8, 128], strides = [1, 1]} : vector<8x384xf32> to vector<8x128xf32>
    %205 = vector.extract_strided_slice %203 {offsets = [0, 0], sizes = [8, 128], strides = [1, 1]} : vector<8x384xf32> to vector<8x128xf32>
    %206 = arith.addf %204, %205 : vector<8x128xf32>
    %207 = arith.negf %206 : vector<8x128xf32>
    %208 = math.exp %207 : vector<8x128xf32>
    %cst_64 = arith.constant 1.000000e+00 : f32
    %209 = vector.broadcast %cst_64 : f32 to vector<8x128xf32>
    %210 = arith.addf %209, %208 : vector<8x128xf32>
    %211 = arith.divf %209, %210 : vector<8x128xf32>
    %212 = vector.extract_strided_slice %202 {offsets = [0, 128], sizes = [8, 128], strides = [1, 1]} : vector<8x384xf32> to vector<8x128xf32>
    %213 = vector.extract_strided_slice %203 {offsets = [0, 128], sizes = [8, 128], strides = [1, 1]} : vector<8x384xf32> to vector<8x128xf32>
    %214 = arith.addf %212, %213 : vector<8x128xf32>
    %215 = arith.negf %214 : vector<8x128xf32>
    %216 = math.exp %215 : vector<8x128xf32>
    %cst_65 = arith.constant 1.000000e+00 : f32
    %217 = vector.broadcast %cst_65 : f32 to vector<8x128xf32>
    %218 = arith.addf %217, %216 : vector<8x128xf32>
    %219 = arith.divf %217, %218 : vector<8x128xf32>
    %220 = vector.extract_strided_slice %202 {offsets = [0, 256], sizes = [8, 128], strides = [1, 1]} : vector<8x384xf32> to vector<8x128xf32>
    %221 = vector.extract_strided_slice %203 {offsets = [0, 256], sizes = [8, 128], strides = [1, 1]} : vector<8x384xf32> to vector<8x128xf32>
    %222 = vector.broadcast %13 : vector<1x128xf32> to vector<8x128xf32>
    %223 = arith.addf %221, %222 : vector<8x128xf32>
    %224 = arith.mulf %211, %223 : vector<8x128xf32>
    %225 = arith.addf %220, %224 : vector<8x128xf32>
    %226 = math.tanh %225 : vector<8x128xf32>
    %cst_66 = arith.constant 1.000000e+00 : f32
    %227 = vector.broadcast %cst_66 : f32 to vector<8x128xf32>
    %228 = arith.subf %227, %219 : vector<8x128xf32>
    %229 = arith.mulf %228, %226 : vector<8x128xf32>
    %230 = arith.mulf %219, %200 : vector<8x128xf32>
    %231 = arith.addf %229, %230 : vector<8x128xf32>
    %c48_67 = arith.constant 48 : index
    %c0_68 = arith.constant 0 : index
    %232 = vector.load %arg11[%c48_67, %c0_68] : memref<64x128xf32, #tpu.memory_space<vmem>>, vector<8x128xf32>
    tpu.vector_store %arg11[%c48_67, %c0_68], %231 {strides = array<i32>} : memref<64x128xf32, #tpu.memory_space<vmem>>, vector<8x128xf32>,
    %c56 = arith.constant 56 : index
    %c0_69 = arith.constant 0 : index
    %233 = vector.load %arg13[%c56, %c0_69] : memref<64x384xf32, #tpu.memory_space<vmem>>, vector<8x384xf32>
    %cst_70 = arith.constant dense<0.000000e+00> : vector<8x384xf32>
    %234 = tpu.matmul %231, %11, %cst_70 {dimension_numbers = #tpu.dot_dimension_numbers<[1], [0], [0], [1], [0, 0, 1, 1], [], []>} : vector<8x128xf32>, vector<128x384xf32>, vector<8x384xf32> -> vector<8x384xf32>
    %235 = vector.extract_strided_slice %233 {offsets = [0, 0], sizes = [8, 128], strides = [1, 1]} : vector<8x384xf32> to vector<8x128xf32>
    %236 = vector.extract_strided_slice %234 {offsets = [0, 0], sizes = [8, 128], strides = [1, 1]} : vector<8x384xf32> to vector<8x128xf32>
    %237 = arith.addf %235, %236 : vector<8x128xf32>
    %238 = arith.negf %237 : vector<8x128xf32>
    %239 = math.exp %238 : vector<8x128xf32>
    %cst_71 = arith.constant 1.000000e+00 : f32
    %240 = vector.broadcast %cst_71 : f32 to vector<8x128xf32>
    %241 = arith.addf %240, %239 : vector<8x128xf32>
    %242 = arith.divf %240, %241 : vector<8x128xf32>
    %243 = vector.extract_strided_slice %233 {offsets = [0, 128], sizes = [8, 128], strides = [1, 1]} : vector<8x384xf32> to vector<8x128xf32>
    %244 = vector.extract_strided_slice %234 {offsets = [0, 128], sizes = [8, 128], strides = [1, 1]} : vector<8x384xf32> to vector<8x128xf32>
    %245 = arith.addf %243, %244 : vector<8x128xf32>
    %246 = arith.negf %245 : vector<8x128xf32>
    %247 = math.exp %246 : vector<8x128xf32>
    %cst_72 = arith.constant 1.000000e+00 : f32
    %248 = vector.broadcast %cst_72 : f32 to vector<8x128xf32>
    %249 = arith.addf %248, %247 : vector<8x128xf32>
    %250 = arith.divf %248, %249 : vector<8x128xf32>
    %251 = vector.extract_strided_slice %233 {offsets = [0, 256], sizes = [8, 128], strides = [1, 1]} : vector<8x384xf32> to vector<8x128xf32>
    %252 = vector.extract_strided_slice %234 {offsets = [0, 256], sizes = [8, 128], strides = [1, 1]} : vector<8x384xf32> to vector<8x128xf32>
    %253 = vector.broadcast %13 : vector<1x128xf32> to vector<8x128xf32>
    %254 = arith.addf %252, %253 : vector<8x128xf32>
    %255 = arith.mulf %242, %254 : vector<8x128xf32>
    %256 = arith.addf %251, %255 : vector<8x128xf32>
    %257 = math.tanh %256 : vector<8x128xf32>
    %cst_73 = arith.constant 1.000000e+00 : f32
    %258 = vector.broadcast %cst_73 : f32 to vector<8x128xf32>
    %259 = arith.subf %258, %250 : vector<8x128xf32>
    %260 = arith.mulf %259, %257 : vector<8x128xf32>
    %261 = arith.mulf %250, %231 : vector<8x128xf32>
    %262 = arith.addf %260, %261 : vector<8x128xf32>
    %c56_74 = arith.constant 56 : index
    %c0_75 = arith.constant 0 : index
    %263 = vector.load %arg11[%c56_74, %c0_75] : memref<64x128xf32, #tpu.memory_space<vmem>>, vector<8x128xf32>
    tpu.vector_store %arg11[%c56_74, %c0_75], %262 {strides = array<i32>} : memref<64x128xf32, #tpu.memory_space<vmem>>, vector<8x128xf32>,
    %c0_76 = arith.constant 0 : index
    %c0_77 = arith.constant 0 : index
    %c0_78 = arith.constant 0 : index
    %264 = vector.load %arg10[%c0_76, %c0_77, %c0_78] : memref<2x8x128xf32, #tpu.memory_space<vmem>>, vector<1x8x128xf32>
    %265 = vector.shape_cast %264 : vector<1x8x128xf32> to vector<8x128xf32>
    %266 = vector.shape_cast %262 : vector<8x128xf32> to vector<1x8x128xf32>
    tpu.vector_store %arg10[%c0_76, %c0_77, %c0_78], %266 {strides = array<i32>} : memref<2x8x128xf32, #tpu.memory_space<vmem>>, vector<1x8x128xf32>,
    %c0_79 = arith.constant 0 : index
    %c0_80 = arith.constant 0 : index
    %267 = vector.load %arg11[%c0_79, %c0_80] : memref<64x128xf32, #tpu.memory_space<vmem>>, vector<64x128xf32>
    %c1 = arith.constant 1 : index
    %c0_81 = arith.constant 0 : index
    %c0_82 = arith.constant 0 : index
    %268 = vector.load %arg3[%c1, %c0_81, %c0_82] : memref<2x128x384xf32, #tpu.memory_space<vmem>>, vector<1x128x384xf32>
    %269 = vector.shape_cast %268 : vector<1x128x384xf32> to vector<128x384xf32>
    %cst_83 = arith.constant dense<0.000000e+00> : vector<64x384xf32>
    %270 = tpu.matmul %267, %269, %cst_83 {dimension_numbers = #tpu.dot_dimension_numbers<[1], [0], [0], [1], [0, 0, 1, 1], [], []>} : vector<64x128xf32>, vector<128x384xf32>, vector<64x384xf32> -> vector<64x384xf32>
    %c1_84 = arith.constant 1 : index
    %c0_85 = arith.constant 0 : index
    %c0_86 = arith.constant 0 : index
    %271 = vector.load %arg4[%c1_84, %c0_85, %c0_86] : memref<2x1x384xf32, #tpu.memory_space<vmem>>, vector<1x1x384xf32>
    %272 = vector.shape_cast %271 : vector<1x1x384xf32> to vector<1x384xf32>
    %273 = vector.broadcast %272 : vector<1x384xf32> to vector<64x384xf32>
    %274 = arith.addf %270, %273 : vector<64x384xf32>
    %c0_87 = arith.constant 0 : index
    %c0_88 = arith.constant 0 : index
    %275 = vector.load %arg13[%c0_87, %c0_88] : memref<64x384xf32, #tpu.memory_space<vmem>>, vector<64x384xf32>
    tpu.vector_store %arg13[%c0_87, %c0_88], %274 {strides = array<i32>} : memref<64x384xf32, #tpu.memory_space<vmem>>, vector<64x384xf32>,
    %c1_89 = arith.constant 1 : index
    %c0_90 = arith.constant 0 : index
    %c0_91 = arith.constant 0 : index
    %276 = vector.load %arg5[%c1_89, %c0_90, %c0_91] : memref<2x128x384xf32, #tpu.memory_space<vmem>>, vector<1x128x384xf32>
    %277 = vector.shape_cast %276 : vector<1x128x384xf32> to vector<128x384xf32>
    %c1_92 = arith.constant 1 : index
    %c0_93 = arith.constant 0 : index
    %c0_94 = arith.constant 0 : index
    %278 = vector.load %arg6[%c1_92, %c0_93, %c0_94] : memref<2x1x128xf32, #tpu.memory_space<vmem>>, vector<1x1x128xf32>
    %279 = vector.shape_cast %278 : vector<1x1x128xf32> to vector<1x128xf32>
    %c1_95 = arith.constant 1 : index
    %c0_96 = arith.constant 0 : index
    %c0_97 = arith.constant 0 : index
    %280 = vector.load %arg2[%c1_95, %c0_96, %c0_97] : memref<2x8x128xf32, #tpu.memory_space<vmem>>, vector<1x8x128xf32>
    %281 = vector.shape_cast %280 : vector<1x8x128xf32> to vector<8x128xf32>
    %c0_98 = arith.constant 0 : index
    %c0_99 = arith.constant 0 : index
    %282 = vector.load %arg13[%c0_98, %c0_99] : memref<64x384xf32, #tpu.memory_space<vmem>>, vector<8x384xf32>
    %cst_100 = arith.constant dense<0.000000e+00> : vector<8x384xf32>
    %283 = tpu.matmul %281, %277, %cst_100 {dimension_numbers = #tpu.dot_dimension_numbers<[1], [0], [0], [1], [0, 0, 1, 1], [], []>} : vector<8x128xf32>, vector<128x384xf32>, vector<8x384xf32> -> vector<8x384xf32>
    %284 = vector.extract_strided_slice %282 {offsets = [0, 0], sizes = [8, 128], strides = [1, 1]} : vector<8x384xf32> to vector<8x128xf32>
    %285 = vector.extract_strided_slice %283 {offsets = [0, 0], sizes = [8, 128], strides = [1, 1]} : vector<8x384xf32> to vector<8x128xf32>
    %286 = arith.addf %284, %285 : vector<8x128xf32>
    %287 = arith.negf %286 : vector<8x128xf32>
    %288 = math.exp %287 : vector<8x128xf32>
    %cst_101 = arith.constant 1.000000e+00 : f32
    %289 = vector.broadcast %cst_101 : f32 to vector<8x128xf32>
    %290 = arith.addf %289, %288 : vector<8x128xf32>
    %291 = arith.divf %289, %290 : vector<8x128xf32>
    %292 = vector.extract_strided_slice %282 {offsets = [0, 128], sizes = [8, 128], strides = [1, 1]} : vector<8x384xf32> to vector<8x128xf32>
    %293 = vector.extract_strided_slice %283 {offsets = [0, 128], sizes = [8, 128], strides = [1, 1]} : vector<8x384xf32> to vector<8x128xf32>
    %294 = arith.addf %292, %293 : vector<8x128xf32>
    %295 = arith.negf %294 : vector<8x128xf32>
    %296 = math.exp %295 : vector<8x128xf32>
    %cst_102 = arith.constant 1.000000e+00 : f32
    %297 = vector.broadcast %cst_102 : f32 to vector<8x128xf32>
    %298 = arith.addf %297, %296 : vector<8x128xf32>
    %299 = arith.divf %297, %298 : vector<8x128xf32>
    %300 = vector.extract_strided_slice %282 {offsets = [0, 256], sizes = [8, 128], strides = [1, 1]} : vector<8x384xf32> to vector<8x128xf32>
    %301 = vector.extract_strided_slice %283 {offsets = [0, 256], sizes = [8, 128], strides = [1, 1]} : vector<8x384xf32> to vector<8x128xf32>
    %302 = vector.broadcast %279 : vector<1x128xf32> to vector<8x128xf32>
    %303 = arith.addf %301, %302 : vector<8x128xf32>
    %304 = arith.mulf %291, %303 : vector<8x128xf32>
    %305 = arith.addf %300, %304 : vector<8x128xf32>
    %306 = math.tanh %305 : vector<8x128xf32>
    %cst_103 = arith.constant 1.000000e+00 : f32
    %307 = vector.broadcast %cst_103 : f32 to vector<8x128xf32>
    %308 = arith.subf %307, %299 : vector<8x128xf32>
    %309 = arith.mulf %308, %306 : vector<8x128xf32>
    %310 = arith.mulf %299, %281 : vector<8x128xf32>
    %311 = arith.addf %309, %310 : vector<8x128xf32>
    %c0_104 = arith.constant 0 : index
    %c0_105 = arith.constant 0 : index
    %312 = vector.load %arg12[%c0_104, %c0_105] : memref<64x128xf32, #tpu.memory_space<vmem>>, vector<8x128xf32>
    tpu.vector_store %arg12[%c0_104, %c0_105], %311 {strides = array<i32>} : memref<64x128xf32, #tpu.memory_space<vmem>>, vector<8x128xf32>,
    %c8_106 = arith.constant 8 : index
    %c0_107 = arith.constant 0 : index
    %313 = vector.load %arg13[%c8_106, %c0_107] : memref<64x384xf32, #tpu.memory_space<vmem>>, vector<8x384xf32>
    %cst_108 = arith.constant dense<0.000000e+00> : vector<8x384xf32>
    %314 = tpu.matmul %311, %277, %cst_108 {dimension_numbers = #tpu.dot_dimension_numbers<[1], [0], [0], [1], [0, 0, 1, 1], [], []>} : vector<8x128xf32>, vector<128x384xf32>, vector<8x384xf32> -> vector<8x384xf32>
    %315 = vector.extract_strided_slice %313 {offsets = [0, 0], sizes = [8, 128], strides = [1, 1]} : vector<8x384xf32> to vector<8x128xf32>
    %316 = vector.extract_strided_slice %314 {offsets = [0, 0], sizes = [8, 128], strides = [1, 1]} : vector<8x384xf32> to vector<8x128xf32>
    %317 = arith.addf %315, %316 : vector<8x128xf32>
    %318 = arith.negf %317 : vector<8x128xf32>
    %319 = math.exp %318 : vector<8x128xf32>
    %cst_109 = arith.constant 1.000000e+00 : f32
    %320 = vector.broadcast %cst_109 : f32 to vector<8x128xf32>
    %321 = arith.addf %320, %319 : vector<8x128xf32>
    %322 = arith.divf %320, %321 : vector<8x128xf32>
    %323 = vector.extract_strided_slice %313 {offsets = [0, 128], sizes = [8, 128], strides = [1, 1]} : vector<8x384xf32> to vector<8x128xf32>
    %324 = vector.extract_strided_slice %314 {offsets = [0, 128], sizes = [8, 128], strides = [1, 1]} : vector<8x384xf32> to vector<8x128xf32>
    %325 = arith.addf %323, %324 : vector<8x128xf32>
    %326 = arith.negf %325 : vector<8x128xf32>
    %327 = math.exp %326 : vector<8x128xf32>
    %cst_110 = arith.constant 1.000000e+00 : f32
    %328 = vector.broadcast %cst_110 : f32 to vector<8x128xf32>
    %329 = arith.addf %328, %327 : vector<8x128xf32>
    %330 = arith.divf %328, %329 : vector<8x128xf32>
    %331 = vector.extract_strided_slice %313 {offsets = [0, 256], sizes = [8, 128], strides = [1, 1]} : vector<8x384xf32> to vector<8x128xf32>
    %332 = vector.extract_strided_slice %314 {offsets = [0, 256], sizes = [8, 128], strides = [1, 1]} : vector<8x384xf32> to vector<8x128xf32>
    %333 = vector.broadcast %279 : vector<1x128xf32> to vector<8x128xf32>
    %334 = arith.addf %332, %333 : vector<8x128xf32>
    %335 = arith.mulf %322, %334 : vector<8x128xf32>
    %336 = arith.addf %331, %335 : vector<8x128xf32>
    %337 = math.tanh %336 : vector<8x128xf32>
    %cst_111 = arith.constant 1.000000e+00 : f32
    %338 = vector.broadcast %cst_111 : f32 to vector<8x128xf32>
    %339 = arith.subf %338, %330 : vector<8x128xf32>
    %340 = arith.mulf %339, %337 : vector<8x128xf32>
    %341 = arith.mulf %330, %311 : vector<8x128xf32>
    %342 = arith.addf %340, %341 : vector<8x128xf32>
    %c8_112 = arith.constant 8 : index
    %c0_113 = arith.constant 0 : index
    %343 = vector.load %arg12[%c8_112, %c0_113] : memref<64x128xf32, #tpu.memory_space<vmem>>, vector<8x128xf32>
    tpu.vector_store %arg12[%c8_112, %c0_113], %342 {strides = array<i32>} : memref<64x128xf32, #tpu.memory_space<vmem>>, vector<8x128xf32>,
    %c16_114 = arith.constant 16 : index
    %c0_115 = arith.constant 0 : index
    %344 = vector.load %arg13[%c16_114, %c0_115] : memref<64x384xf32, #tpu.memory_space<vmem>>, vector<8x384xf32>
    %cst_116 = arith.constant dense<0.000000e+00> : vector<8x384xf32>
    %345 = tpu.matmul %342, %277, %cst_116 {dimension_numbers = #tpu.dot_dimension_numbers<[1], [0], [0], [1], [0, 0, 1, 1], [], []>} : vector<8x128xf32>, vector<128x384xf32>, vector<8x384xf32> -> vector<8x384xf32>
    %346 = vector.extract_strided_slice %344 {offsets = [0, 0], sizes = [8, 128], strides = [1, 1]} : vector<8x384xf32> to vector<8x128xf32>
    %347 = vector.extract_strided_slice %345 {offsets = [0, 0], sizes = [8, 128], strides = [1, 1]} : vector<8x384xf32> to vector<8x128xf32>
    %348 = arith.addf %346, %347 : vector<8x128xf32>
    %349 = arith.negf %348 : vector<8x128xf32>
    %350 = math.exp %349 : vector<8x128xf32>
    %cst_117 = arith.constant 1.000000e+00 : f32
    %351 = vector.broadcast %cst_117 : f32 to vector<8x128xf32>
    %352 = arith.addf %351, %350 : vector<8x128xf32>
    %353 = arith.divf %351, %352 : vector<8x128xf32>
    %354 = vector.extract_strided_slice %344 {offsets = [0, 128], sizes = [8, 128], strides = [1, 1]} : vector<8x384xf32> to vector<8x128xf32>
    %355 = vector.extract_strided_slice %345 {offsets = [0, 128], sizes = [8, 128], strides = [1, 1]} : vector<8x384xf32> to vector<8x128xf32>
    %356 = arith.addf %354, %355 : vector<8x128xf32>
    %357 = arith.negf %356 : vector<8x128xf32>
    %358 = math.exp %357 : vector<8x128xf32>
    %cst_118 = arith.constant 1.000000e+00 : f32
    %359 = vector.broadcast %cst_118 : f32 to vector<8x128xf32>
    %360 = arith.addf %359, %358 : vector<8x128xf32>
    %361 = arith.divf %359, %360 : vector<8x128xf32>
    %362 = vector.extract_strided_slice %344 {offsets = [0, 256], sizes = [8, 128], strides = [1, 1]} : vector<8x384xf32> to vector<8x128xf32>
    %363 = vector.extract_strided_slice %345 {offsets = [0, 256], sizes = [8, 128], strides = [1, 1]} : vector<8x384xf32> to vector<8x128xf32>
    %364 = vector.broadcast %279 : vector<1x128xf32> to vector<8x128xf32>
    %365 = arith.addf %363, %364 : vector<8x128xf32>
    %366 = arith.mulf %353, %365 : vector<8x128xf32>
    %367 = arith.addf %362, %366 : vector<8x128xf32>
    %368 = math.tanh %367 : vector<8x128xf32>
    %cst_119 = arith.constant 1.000000e+00 : f32
    %369 = vector.broadcast %cst_119 : f32 to vector<8x128xf32>
    %370 = arith.subf %369, %361 : vector<8x128xf32>
    %371 = arith.mulf %370, %368 : vector<8x128xf32>
    %372 = arith.mulf %361, %342 : vector<8x128xf32>
    %373 = arith.addf %371, %372 : vector<8x128xf32>
    %c16_120 = arith.constant 16 : index
    %c0_121 = arith.constant 0 : index
    %374 = vector.load %arg12[%c16_120, %c0_121] : memref<64x128xf32, #tpu.memory_space<vmem>>, vector<8x128xf32>
    tpu.vector_store %arg12[%c16_120, %c0_121], %373 {strides = array<i32>} : memref<64x128xf32, #tpu.memory_space<vmem>>, vector<8x128xf32>,
    %c24_122 = arith.constant 24 : index
    %c0_123 = arith.constant 0 : index
    %375 = vector.load %arg13[%c24_122, %c0_123] : memref<64x384xf32, #tpu.memory_space<vmem>>, vector<8x384xf32>
    %cst_124 = arith.constant dense<0.000000e+00> : vector<8x384xf32>
    %376 = tpu.matmul %373, %277, %cst_124 {dimension_numbers = #tpu.dot_dimension_numbers<[1], [0], [0], [1], [0, 0, 1, 1], [], []>} : vector<8x128xf32>, vector<128x384xf32>, vector<8x384xf32> -> vector<8x384xf32>
    %377 = vector.extract_strided_slice %375 {offsets = [0, 0], sizes = [8, 128], strides = [1, 1]} : vector<8x384xf32> to vector<8x128xf32>
    %378 = vector.extract_strided_slice %376 {offsets = [0, 0], sizes = [8, 128], strides = [1, 1]} : vector<8x384xf32> to vector<8x128xf32>
    %379 = arith.addf %377, %378 : vector<8x128xf32>
    %380 = arith.negf %379 : vector<8x128xf32>
    %381 = math.exp %380 : vector<8x128xf32>
    %cst_125 = arith.constant 1.000000e+00 : f32
    %382 = vector.broadcast %cst_125 : f32 to vector<8x128xf32>
    %383 = arith.addf %382, %381 : vector<8x128xf32>
    %384 = arith.divf %382, %383 : vector<8x128xf32>
    %385 = vector.extract_strided_slice %375 {offsets = [0, 128], sizes = [8, 128], strides = [1, 1]} : vector<8x384xf32> to vector<8x128xf32>
    %386 = vector.extract_strided_slice %376 {offsets = [0, 128], sizes = [8, 128], strides = [1, 1]} : vector<8x384xf32> to vector<8x128xf32>
    %387 = arith.addf %385, %386 : vector<8x128xf32>
    %388 = arith.negf %387 : vector<8x128xf32>
    %389 = math.exp %388 : vector<8x128xf32>
    %cst_126 = arith.constant 1.000000e+00 : f32
    %390 = vector.broadcast %cst_126 : f32 to vector<8x128xf32>
    %391 = arith.addf %390, %389 : vector<8x128xf32>
    %392 = arith.divf %390, %391 : vector<8x128xf32>
    %393 = vector.extract_strided_slice %375 {offsets = [0, 256], sizes = [8, 128], strides = [1, 1]} : vector<8x384xf32> to vector<8x128xf32>
    %394 = vector.extract_strided_slice %376 {offsets = [0, 256], sizes = [8, 128], strides = [1, 1]} : vector<8x384xf32> to vector<8x128xf32>
    %395 = vector.broadcast %279 : vector<1x128xf32> to vector<8x128xf32>
    %396 = arith.addf %394, %395 : vector<8x128xf32>
    %397 = arith.mulf %384, %396 : vector<8x128xf32>
    %398 = arith.addf %393, %397 : vector<8x128xf32>
    %399 = math.tanh %398 : vector<8x128xf32>
    %cst_127 = arith.constant 1.000000e+00 : f32
    %400 = vector.broadcast %cst_127 : f32 to vector<8x128xf32>
    %401 = arith.subf %400, %392 : vector<8x128xf32>
    %402 = arith.mulf %401, %399 : vector<8x128xf32>
    %403 = arith.mulf %392, %373 : vector<8x128xf32>
    %404 = arith.addf %402, %403 : vector<8x128xf32>
    %c24_128 = arith.constant 24 : index
    %c0_129 = arith.constant 0 : index
    %405 = vector.load %arg12[%c24_128, %c0_129] : memref<64x128xf32, #tpu.memory_space<vmem>>, vector<8x128xf32>
    tpu.vector_store %arg12[%c24_128, %c0_129], %404 {strides = array<i32>} : memref<64x128xf32, #tpu.memory_space<vmem>>, vector<8x128xf32>,
    %c32_130 = arith.constant 32 : index
    %c0_131 = arith.constant 0 : index
    %406 = vector.load %arg13[%c32_130, %c0_131] : memref<64x384xf32, #tpu.memory_space<vmem>>, vector<8x384xf32>
    %cst_132 = arith.constant dense<0.000000e+00> : vector<8x384xf32>
    %407 = tpu.matmul %404, %277, %cst_132 {dimension_numbers = #tpu.dot_dimension_numbers<[1], [0], [0], [1], [0, 0, 1, 1], [], []>} : vector<8x128xf32>, vector<128x384xf32>, vector<8x384xf32> -> vector<8x384xf32>
    %408 = vector.extract_strided_slice %406 {offsets = [0, 0], sizes = [8, 128], strides = [1, 1]} : vector<8x384xf32> to vector<8x128xf32>
    %409 = vector.extract_strided_slice %407 {offsets = [0, 0], sizes = [8, 128], strides = [1, 1]} : vector<8x384xf32> to vector<8x128xf32>
    %410 = arith.addf %408, %409 : vector<8x128xf32>
    %411 = arith.negf %410 : vector<8x128xf32>
    %412 = math.exp %411 : vector<8x128xf32>
    %cst_133 = arith.constant 1.000000e+00 : f32
    %413 = vector.broadcast %cst_133 : f32 to vector<8x128xf32>
    %414 = arith.addf %413, %412 : vector<8x128xf32>
    %415 = arith.divf %413, %414 : vector<8x128xf32>
    %416 = vector.extract_strided_slice %406 {offsets = [0, 128], sizes = [8, 128], strides = [1, 1]} : vector<8x384xf32> to vector<8x128xf32>
    %417 = vector.extract_strided_slice %407 {offsets = [0, 128], sizes = [8, 128], strides = [1, 1]} : vector<8x384xf32> to vector<8x128xf32>
    %418 = arith.addf %416, %417 : vector<8x128xf32>
    %419 = arith.negf %418 : vector<8x128xf32>
    %420 = math.exp %419 : vector<8x128xf32>
    %cst_134 = arith.constant 1.000000e+00 : f32
    %421 = vector.broadcast %cst_134 : f32 to vector<8x128xf32>
    %422 = arith.addf %421, %420 : vector<8x128xf32>
    %423 = arith.divf %421, %422 : vector<8x128xf32>
    %424 = vector.extract_strided_slice %406 {offsets = [0, 256], sizes = [8, 128], strides = [1, 1]} : vector<8x384xf32> to vector<8x128xf32>
    %425 = vector.extract_strided_slice %407 {offsets = [0, 256], sizes = [8, 128], strides = [1, 1]} : vector<8x384xf32> to vector<8x128xf32>
    %426 = vector.broadcast %279 : vector<1x128xf32> to vector<8x128xf32>
    %427 = arith.addf %425, %426 : vector<8x128xf32>
    %428 = arith.mulf %415, %427 : vector<8x128xf32>
    %429 = arith.addf %424, %428 : vector<8x128xf32>
    %430 = math.tanh %429 : vector<8x128xf32>
    %cst_135 = arith.constant 1.000000e+00 : f32
    %431 = vector.broadcast %cst_135 : f32 to vector<8x128xf32>
    %432 = arith.subf %431, %423 : vector<8x128xf32>
    %433 = arith.mulf %432, %430 : vector<8x128xf32>
    %434 = arith.mulf %423, %404 : vector<8x128xf32>
    %435 = arith.addf %433, %434 : vector<8x128xf32>
    %c32_136 = arith.constant 32 : index
    %c0_137 = arith.constant 0 : index
    %436 = vector.load %arg12[%c32_136, %c0_137] : memref<64x128xf32, #tpu.memory_space<vmem>>, vector<8x128xf32>
    tpu.vector_store %arg12[%c32_136, %c0_137], %435 {strides = array<i32>} : memref<64x128xf32, #tpu.memory_space<vmem>>, vector<8x128xf32>,
    %c40_138 = arith.constant 40 : index
    %c0_139 = arith.constant 0 : index
    %437 = vector.load %arg13[%c40_138, %c0_139] : memref<64x384xf32, #tpu.memory_space<vmem>>, vector<8x384xf32>
    %cst_140 = arith.constant dense<0.000000e+00> : vector<8x384xf32>
    %438 = tpu.matmul %435, %277, %cst_140 {dimension_numbers = #tpu.dot_dimension_numbers<[1], [0], [0], [1], [0, 0, 1, 1], [], []>} : vector<8x128xf32>, vector<128x384xf32>, vector<8x384xf32> -> vector<8x384xf32>
    %439 = vector.extract_strided_slice %437 {offsets = [0, 0], sizes = [8, 128], strides = [1, 1]} : vector<8x384xf32> to vector<8x128xf32>
    %440 = vector.extract_strided_slice %438 {offsets = [0, 0], sizes = [8, 128], strides = [1, 1]} : vector<8x384xf32> to vector<8x128xf32>
    %441 = arith.addf %439, %440 : vector<8x128xf32>
    %442 = arith.negf %441 : vector<8x128xf32>
    %443 = math.exp %442 : vector<8x128xf32>
    %cst_141 = arith.constant 1.000000e+00 : f32
    %444 = vector.broadcast %cst_141 : f32 to vector<8x128xf32>
    %445 = arith.addf %444, %443 : vector<8x128xf32>
    %446 = arith.divf %444, %445 : vector<8x128xf32>
    %447 = vector.extract_strided_slice %437 {offsets = [0, 128], sizes = [8, 128], strides = [1, 1]} : vector<8x384xf32> to vector<8x128xf32>
    %448 = vector.extract_strided_slice %438 {offsets = [0, 128], sizes = [8, 128], strides = [1, 1]} : vector<8x384xf32> to vector<8x128xf32>
    %449 = arith.addf %447, %448 : vector<8x128xf32>
    %450 = arith.negf %449 : vector<8x128xf32>
    %451 = math.exp %450 : vector<8x128xf32>
    %cst_142 = arith.constant 1.000000e+00 : f32
    %452 = vector.broadcast %cst_142 : f32 to vector<8x128xf32>
    %453 = arith.addf %452, %451 : vector<8x128xf32>
    %454 = arith.divf %452, %453 : vector<8x128xf32>
    %455 = vector.extract_strided_slice %437 {offsets = [0, 256], sizes = [8, 128], strides = [1, 1]} : vector<8x384xf32> to vector<8x128xf32>
    %456 = vector.extract_strided_slice %438 {offsets = [0, 256], sizes = [8, 128], strides = [1, 1]} : vector<8x384xf32> to vector<8x128xf32>
    %457 = vector.broadcast %279 : vector<1x128xf32> to vector<8x128xf32>
    %458 = arith.addf %456, %457 : vector<8x128xf32>
    %459 = arith.mulf %446, %458 : vector<8x128xf32>
    %460 = arith.addf %455, %459 : vector<8x128xf32>
    %461 = math.tanh %460 : vector<8x128xf32>
    %cst_143 = arith.constant 1.000000e+00 : f32
    %462 = vector.broadcast %cst_143 : f32 to vector<8x128xf32>
    %463 = arith.subf %462, %454 : vector<8x128xf32>
    %464 = arith.mulf %463, %461 : vector<8x128xf32>
    %465 = arith.mulf %454, %435 : vector<8x128xf32>
    %466 = arith.addf %464, %465 : vector<8x128xf32>
    %c40_144 = arith.constant 40 : index
    %c0_145 = arith.constant 0 : index
    %467 = vector.load %arg12[%c40_144, %c0_145] : memref<64x128xf32, #tpu.memory_space<vmem>>, vector<8x128xf32>
    tpu.vector_store %arg12[%c40_144, %c0_145], %466 {strides = array<i32>} : memref<64x128xf32, #tpu.memory_space<vmem>>, vector<8x128xf32>,
    %c48_146 = arith.constant 48 : index
    %c0_147 = arith.constant 0 : index
    %468 = vector.load %arg13[%c48_146, %c0_147] : memref<64x384xf32, #tpu.memory_space<vmem>>, vector<8x384xf32>
    %cst_148 = arith.constant dense<0.000000e+00> : vector<8x384xf32>
    %469 = tpu.matmul %466, %277, %cst_148 {dimension_numbers = #tpu.dot_dimension_numbers<[1], [0], [0], [1], [0, 0, 1, 1], [], []>} : vector<8x128xf32>, vector<128x384xf32>, vector<8x384xf32> -> vector<8x384xf32>
    %470 = vector.extract_strided_slice %468 {offsets = [0, 0], sizes = [8, 128], strides = [1, 1]} : vector<8x384xf32> to vector<8x128xf32>
    %471 = vector.extract_strided_slice %469 {offsets = [0, 0], sizes = [8, 128], strides = [1, 1]} : vector<8x384xf32> to vector<8x128xf32>
    %472 = arith.addf %470, %471 : vector<8x128xf32>
    %473 = arith.negf %472 : vector<8x128xf32>
    %474 = math.exp %473 : vector<8x128xf32>
    %cst_149 = arith.constant 1.000000e+00 : f32
    %475 = vector.broadcast %cst_149 : f32 to vector<8x128xf32>
    %476 = arith.addf %475, %474 : vector<8x128xf32>
    %477 = arith.divf %475, %476 : vector<8x128xf32>
    %478 = vector.extract_strided_slice %468 {offsets = [0, 128], sizes = [8, 128], strides = [1, 1]} : vector<8x384xf32> to vector<8x128xf32>
    %479 = vector.extract_strided_slice %469 {offsets = [0, 128], sizes = [8, 128], strides = [1, 1]} : vector<8x384xf32> to vector<8x128xf32>
    %480 = arith.addf %478, %479 : vector<8x128xf32>
    %481 = arith.negf %480 : vector<8x128xf32>
    %482 = math.exp %481 : vector<8x128xf32>
    %cst_150 = arith.constant 1.000000e+00 : f32
    %483 = vector.broadcast %cst_150 : f32 to vector<8x128xf32>
    %484 = arith.addf %483, %482 : vector<8x128xf32>
    %485 = arith.divf %483, %484 : vector<8x128xf32>
    %486 = vector.extract_strided_slice %468 {offsets = [0, 256], sizes = [8, 128], strides = [1, 1]} : vector<8x384xf32> to vector<8x128xf32>
    %487 = vector.extract_strided_slice %469 {offsets = [0, 256], sizes = [8, 128], strides = [1, 1]} : vector<8x384xf32> to vector<8x128xf32>
    %488 = vector.broadcast %279 : vector<1x128xf32> to vector<8x128xf32>
    %489 = arith.addf %487, %488 : vector<8x128xf32>
    %490 = arith.mulf %477, %489 : vector<8x128xf32>
    %491 = arith.addf %486, %490 : vector<8x128xf32>
    %492 = math.tanh %491 : vector<8x128xf32>
    %cst_151 = arith.constant 1.000000e+00 : f32
    %493 = vector.broadcast %cst_151 : f32 to vector<8x128xf32>
    %494 = arith.subf %493, %485 : vector<8x128xf32>
    %495 = arith.mulf %494, %492 : vector<8x128xf32>
    %496 = arith.mulf %485, %466 : vector<8x128xf32>
    %497 = arith.addf %495, %496 : vector<8x128xf32>
    %c48_152 = arith.constant 48 : index
    %c0_153 = arith.constant 0 : index
    %498 = vector.load %arg12[%c48_152, %c0_153] : memref<64x128xf32, #tpu.memory_space<vmem>>, vector<8x128xf32>
    tpu.vector_store %arg12[%c48_152, %c0_153], %497 {strides = array<i32>} : memref<64x128xf32, #tpu.memory_space<vmem>>, vector<8x128xf32>,
    %c56_154 = arith.constant 56 : index
    %c0_155 = arith.constant 0 : index
    %499 = vector.load %arg13[%c56_154, %c0_155] : memref<64x384xf32, #tpu.memory_space<vmem>>, vector<8x384xf32>
    %cst_156 = arith.constant dense<0.000000e+00> : vector<8x384xf32>
    %500 = tpu.matmul %497, %277, %cst_156 {dimension_numbers = #tpu.dot_dimension_numbers<[1], [0], [0], [1], [0, 0, 1, 1], [], []>} : vector<8x128xf32>, vector<128x384xf32>, vector<8x384xf32> -> vector<8x384xf32>
    %501 = vector.extract_strided_slice %499 {offsets = [0, 0], sizes = [8, 128], strides = [1, 1]} : vector<8x384xf32> to vector<8x128xf32>
    %502 = vector.extract_strided_slice %500 {offsets = [0, 0], sizes = [8, 128], strides = [1, 1]} : vector<8x384xf32> to vector<8x128xf32>
    %503 = arith.addf %501, %502 : vector<8x128xf32>
    %504 = arith.negf %503 : vector<8x128xf32>
    %505 = math.exp %504 : vector<8x128xf32>
    %cst_157 = arith.constant 1.000000e+00 : f32
    %506 = vector.broadcast %cst_157 : f32 to vector<8x128xf32>
    %507 = arith.addf %506, %505 : vector<8x128xf32>
    %508 = arith.divf %506, %507 : vector<8x128xf32>
    %509 = vector.extract_strided_slice %499 {offsets = [0, 128], sizes = [8, 128], strides = [1, 1]} : vector<8x384xf32> to vector<8x128xf32>
    %510 = vector.extract_strided_slice %500 {offsets = [0, 128], sizes = [8, 128], strides = [1, 1]} : vector<8x384xf32> to vector<8x128xf32>
    %511 = arith.addf %509, %510 : vector<8x128xf32>
    %512 = arith.negf %511 : vector<8x128xf32>
    %513 = math.exp %512 : vector<8x128xf32>
    %cst_158 = arith.constant 1.000000e+00 : f32
    %514 = vector.broadcast %cst_158 : f32 to vector<8x128xf32>
    %515 = arith.addf %514, %513 : vector<8x128xf32>
    %516 = arith.divf %514, %515 : vector<8x128xf32>
    %517 = vector.extract_strided_slice %499 {offsets = [0, 256], sizes = [8, 128], strides = [1, 1]} : vector<8x384xf32> to vector<8x128xf32>
    %518 = vector.extract_strided_slice %500 {offsets = [0, 256], sizes = [8, 128], strides = [1, 1]} : vector<8x384xf32> to vector<8x128xf32>
    %519 = vector.broadcast %279 : vector<1x128xf32> to vector<8x128xf32>
    %520 = arith.addf %518, %519 : vector<8x128xf32>
    %521 = arith.mulf %508, %520 : vector<8x128xf32>
    %522 = arith.addf %517, %521 : vector<8x128xf32>
    %523 = math.tanh %522 : vector<8x128xf32>
    %cst_159 = arith.constant 1.000000e+00 : f32
    %524 = vector.broadcast %cst_159 : f32 to vector<8x128xf32>
    %525 = arith.subf %524, %516 : vector<8x128xf32>
    %526 = arith.mulf %525, %523 : vector<8x128xf32>
    %527 = arith.mulf %516, %497 : vector<8x128xf32>
    %528 = arith.addf %526, %527 : vector<8x128xf32>
    %c56_160 = arith.constant 56 : index
    %c0_161 = arith.constant 0 : index
    %529 = vector.load %arg12[%c56_160, %c0_161] : memref<64x128xf32, #tpu.memory_space<vmem>>, vector<8x128xf32>
    tpu.vector_store %arg12[%c56_160, %c0_161], %528 {strides = array<i32>} : memref<64x128xf32, #tpu.memory_space<vmem>>, vector<8x128xf32>,
    %c1_162 = arith.constant 1 : index
    %c0_163 = arith.constant 0 : index
    %c0_164 = arith.constant 0 : index
    %530 = vector.load %arg10[%c1_162, %c0_163, %c0_164] : memref<2x8x128xf32, #tpu.memory_space<vmem>>, vector<1x8x128xf32>
    %531 = vector.shape_cast %530 : vector<1x8x128xf32> to vector<8x128xf32>
    %532 = vector.shape_cast %528 : vector<8x128xf32> to vector<1x8x128xf32>
    tpu.vector_store %arg10[%c1_162, %c0_163, %c0_164], %532 {strides = array<i32>} : memref<2x8x128xf32, #tpu.memory_space<vmem>>, vector<1x8x128xf32>,
    %c0_165 = arith.constant 0 : index
    %c0_166 = arith.constant 0 : index
    %533 = vector.load %arg12[%c0_165, %c0_166] : memref<64x128xf32, #tpu.memory_space<vmem>>, vector<64x128xf32>
    %c0_167 = arith.constant 0 : index
    %c0_168 = arith.constant 0 : index
    %534 = vector.load %arg7[%c0_167, %c0_168] : memref<128x128xf32, #tpu.memory_space<vmem>>, vector<128x128xf32>
    %cst_169 = arith.constant dense<0.000000e+00> : vector<64x128xf32>
    %535 = tpu.matmul %533, %534, %cst_169 {dimension_numbers = #tpu.dot_dimension_numbers<[1], [0], [0], [1], [0, 0, 1, 1], [], []>} : vector<64x128xf32>, vector<128x128xf32>, vector<64x128xf32> -> vector<64x128xf32>
    %c0_170 = arith.constant 0 : index
    %c0_171 = arith.constant 0 : index
    %536 = vector.load %arg8[%c0_170, %c0_171] : memref<1x128xf32, #tpu.memory_space<vmem>>, vector<1x128xf32>
    %537 = vector.broadcast %536 : vector<1x128xf32> to vector<64x128xf32>
    %538 = arith.addf %535, %537 : vector<64x128xf32>
    %539 = vector.shape_cast %538 : vector<64x128xf32> to vector<8x8x128xf32>
    %c0_172 = arith.constant 0 : index
    %c0_173 = arith.constant 0 : index
    %c0_174 = arith.constant 0 : index
    %540 = vector.load %arg9[%c0_172, %c0_173, %c0_174] : memref<8x8x128xf32, #tpu.memory_space<vmem>>, vector<8x8x128xf32>
    tpu.vector_store %arg9[%c0_172, %c0_173, %c0_174], %539 {strides = array<i32>} : memref<8x8x128xf32, #tpu.memory_space<vmem>>, vector<8x8x128xf32>,
    return
  }
  func.func @transform_0(%arg0: i32) -> (i32, i32, i32) {
    %c0_i32 = arith.constant 0 : i32
    %c0_i32_0 = arith.constant 0 : i32
    %c0_i32_1 = arith.constant 0 : i32
    return %c0_i32, %arg0, %c0_i32_0 : i32, i32, i32
  }
  func.func @transform_1(%arg0: i32) -> (i32, i32, i32) {
    %c0_i32 = arith.constant 0 : i32
    %c0_i32_0 = arith.constant 0 : i32
    %c0_i32_1 = arith.constant 0 : i32
    return %c0_i32, %arg0, %c0_i32_0 : i32, i32, i32
  }
  func.func @transform_2(%arg0: i32) -> (i32, i32, i32) {
    %c0_i32 = arith.constant 0 : i32
    %c0_i32_0 = arith.constant 0 : i32
    %c0_i32_1 = arith.constant 0 : i32
    %c0_i32_2 = arith.constant 0 : i32
    return %c0_i32, %c0_i32_0, %c0_i32_1 : i32, i32, i32
  }
  func.func @transform_3(%arg0: i32) -> (i32, i32, i32) {
    %c0_i32 = arith.constant 0 : i32
    %c0_i32_0 = arith.constant 0 : i32
    %c0_i32_1 = arith.constant 0 : i32
    %c0_i32_2 = arith.constant 0 : i32
    return %c0_i32, %c0_i32_0, %c0_i32_1 : i32, i32, i32
  }
  func.func @transform_4(%arg0: i32) -> (i32, i32, i32) {
    %c0_i32 = arith.constant 0 : i32
    %c0_i32_0 = arith.constant 0 : i32
    %c0_i32_1 = arith.constant 0 : i32
    %c0_i32_2 = arith.constant 0 : i32
    return %c0_i32, %c0_i32_0, %c0_i32_1 : i32, i32, i32
  }
  func.func @transform_5(%arg0: i32) -> (i32, i32, i32) {
    %c0_i32 = arith.constant 0 : i32
    %c0_i32_0 = arith.constant 0 : i32
    %c0_i32_1 = arith.constant 0 : i32
    %c0_i32_2 = arith.constant 0 : i32
    return %c0_i32, %c0_i32_0, %c0_i32_1 : i32, i32, i32
  }
  func.func @transform_6(%arg0: i32) -> (i32, i32) {
    %c0_i32 = arith.constant 0 : i32
    %c0_i32_0 = arith.constant 0 : i32
    %c0_i32_1 = arith.constant 0 : i32
    return %c0_i32, %c0_i32_0 : i32, i32
  }
  func.func @transform_7(%arg0: i32) -> (i32, i32) {
    %c0_i32 = arith.constant 0 : i32
    %c0_i32_0 = arith.constant 0 : i32
    %c0_i32_1 = arith.constant 0 : i32
    return %c0_i32, %c0_i32_0 : i32, i32
  }
  func.func @transform_8(%arg0: i32) -> (i32, i32, i32) {
    %c0_i32 = arith.constant 0 : i32
    %c0_i32_0 = arith.constant 0 : i32
    %c0_i32_1 = arith.constant 0 : i32
    return %c0_i32, %arg0, %c0_i32_0 : i32, i32, i32
  }
  func.func @transform_9(%arg0: i32) -> (i32, i32, i32) {
    %c0_i32 = arith.constant 0 : i32
    %c0_i32_0 = arith.constant 0 : i32
    %c0_i32_1 = arith.constant 0 : i32
    return %c0_i32, %arg0, %c0_i32_0 : i32, i32, i32
  }
}

</mosaic_0001>

<bundles_post_ra>
// kernel: tpu_custom_call.1
= control target key start
LH: loop header
LB: loop body
LE: loop exit
PB: predicated region body
PF: predicated region fallthrough
CT: control target
= control target key end

     0   :  { %15 = vsyncpa [#allocation6], 0  ;;  %s7359_s0 = inlined_call_operand.hbm [shape: f32[8,8,128], index: 0, kind: input, shape index: {}]   ;;  %s7360_s1 = inlined_call_operand.hbm [shape: f32[2,8,128], index: 1, kind: input, shape index: {}]   ;;  %s7361_s2 = inlined_call_operand.hbm [shape: f32[2,128,384], index: 2, kind: input, shape index: {}]   ;;  %s7362_s3 = inlined_call_operand.vmem [shape: f32[2,1,384], index: 3, kind: input, shape index: {}]   ;;  %s7363_s4 = inlined_call_operand.hbm [shape: f32[2,128,384], index: 4, kind: input, shape index: {}]   ;;  %s7364_s5 = inlined_call_operand.vmem [shape: f32[2,1,128], index: 5, kind: input, shape index: {}]   ;;  %s7365_s6 = inlined_call_operand.hbm [shape: f32[128,128], index: 6, kind: input, shape index: {}]   ;;  %s7366_s7 = inlined_call_operand.vmem [shape: f32[1,128], index: 7, kind: input, shape index: {}]   ;;  %s7367_s8 = inlined_call_operand.hbm [shape: f32[8,8,128], index: 8, kind: output, shape index: {0}]   ;;  %s7368_s9 = inlined_call_operand.hbm [shape: f32[2,8,128], index: 9, kind: output, shape index: {1}]  }
   0x1   :  { %16 = vsyncpa [#allocation9], 0 }
   0x2   :  { %17 = vsyncpa [#allocation12], 0 }
   0x3   :  { %18 = vsyncpa [#allocation7], 0 }
   0x4   :  { %19 = vsyncpa [#allocation16], 0  ;;  %s6234_s30 = smov [#allocation8]   ;;  %s6070_s13 = scalar_lea.hbm %s7360_s1, 256 }
   0x5   :  { %s37_s10 = sshll.u32 %s6234_s30, 4  ;;  %p6071_p0 = scmp.ne.s32.totalorder %s7360_s1, %s6070_s13  ;;  %s38_s10 = int_to_ptr.vmem [resolvable:$true] %s37_s10 }
   0x6   :  { %p6074_p1 = scmp.lt.u32.totalorder %s6070_s13, %s7360_s1 }
   0x8   :  { %p6076_p2 = pnand %p6074_p1, %p6071_p0 }
   0xa   :  { %6079 = shalt.err (!%p6076_p2)
}
   0xb   :  { %s6080_s18 = scalar_lea.vmem %s38_s10, 256  ;;  %p6085_p4 = scmp.lt.s32.totalorder %s38_s10, %s38_s10 }
   0xc   :  { %p6081_p3 = scmp.ne.s32.totalorder %s38_s10, %s6080_s18  ;;  %p6086_p5 = scmp.lt.s32.totalorder %s6080_s18, %s6080_s18 }
   0xe   :  { %p6087_p6 = por %p6086_p5, %p6085_p4 }
  0x10   :  { %p6088_p7 = pnand %p6087_p6, %p6081_p3 }
  0x12   :  { %6091 = shalt.err (!%p6088_p7)
}
  0x13   :  { %s6235_s19 = smov 128   ;;  %s6236_s20 = smov 8  }
  0x14   :  { %43 = dma.hbm_to_vmem [thread:$0]  %s7360_s1, 256, %s38_s10, [#allocation9], %s6235_s19, %s6235_s19, %s6236_s20  }
  0x15   :  { %s6237_s23 = smov [#allocation11]   ;;  %s6238_s25 = smov [#allocation5]  }
  0x16   :  { %s63_s24 = sshll.u32 %s6237_s23, 4  ;;  %s25_s26 = sshll.u32 %s6238_s25, 4  ;;  %s64_s24 = int_to_ptr.vmem [resolvable:$true] %s63_s24  ;;  %s26_s26 = int_to_ptr.vmem [resolvable:$true] %s25_s26 }
  0x17   :  { %s6092_s29 = scalar_lea.hbm %s7363_s4, 12288 }
  0x18   :  { %p6093_p8 = scmp.ne.s32.totalorder %s7363_s4, %s6092_s29  ;;  %p6096_p9 = scmp.lt.u32.totalorder %s6092_s29, %s7363_s4 }
  0x1a   :  { %p6098_p10 = pnand %p6096_p9, %p6093_p8 }
  0x1c   :  { %6101 = shalt.err (!%p6098_p10)
}
  0x1d   :  { %s6102_s1 = scalar_lea.vmem %s64_s24, 12288  ;;  %p6107_p12 = scmp.lt.s32.totalorder %s64_s24, %s64_s24 }
  0x1e   :  { %p6103_p11 = scmp.ne.s32.totalorder %s64_s24, %s6102_s1  ;;  %p6108_p13 = scmp.lt.s32.totalorder %s6102_s1, %s6102_s1 }
  0x20   :  { %p6109_p0 = por %p6108_p13, %p6107_p12 }
  0x22   :  { %p6110_p1 = pnand %p6109_p0, %p6103_p11 }
  0x24   :  { %6113 = shalt.err (!%p6110_p1)
}
  0x25   :  { %s6239_s10 = smov 384   ;;  %s6240_s14 = smov 24  }
  0x26   :  { %69 = dma.hbm_to_vmem [thread:$0]  %s7363_s4, 12288, %s64_s24, [#allocation12], %s6239_s10, %s6239_s10, %s6240_s14  }
  0x27   :  { %s6114_s21 = scalar_lea.hbm %s7359_s0, 1024 }
  0x28   :  { %p6115_p2 = scmp.ne.s32.totalorder %s7359_s0, %s6114_s21  ;;  %p6118_p3 = scmp.lt.u32.totalorder %s6114_s21, %s7359_s0 }
  0x2a   :  { %p6120_p4 = pnand %p6118_p3, %p6115_p2 }
  0x2c   :  { %6123 = shalt.err (!%p6120_p4)
}
  0x2d   :  { %s6124_s28 = scalar_lea.vmem %s26_s26, 1024  ;;  %p6129_p6 = scmp.lt.s32.totalorder %s26_s26, %s26_s26 }
  0x2e   :  { %p6125_p5 = scmp.ne.s32.totalorder %s26_s26, %s6124_s28  ;;  %p6130_p7 = scmp.lt.s32.totalorder %s6124_s28, %s6124_s28 }
  0x30   :  { %p6131_p8 = por %p6130_p7, %p6129_p6 }
  0x32   :  { %p6132_p9 = pnand %p6131_p8, %p6125_p5 }
  0x34   :  { %6135 = shalt.err (!%p6132_p9)
}
  0x35   :  { %31 = dma.hbm_to_vmem [thread:$0]  %s7359_s0, 1024, %s26_s26, [#allocation6], %s6235_s19, %s6235_s19, %s6236_s20  }
  0x36   :  { %s6241_s29 = smov [#allocation10]   ;;  %s6242_s11 = smov [#allocation13]  }
  0x37   :  { %s49_s30 = sshll.u32 %s6241_s29, 4  ;;  %s77_s12 = sshll.u32 %s6242_s11, 4  ;;  %s50_s30 = int_to_ptr.vmem [resolvable:$true] %s49_s30  ;;  %s78_s12 = int_to_ptr.vmem [resolvable:$true] %s77_s12 }
  0x38   :  { %s6136_s15 = scalar_lea.hbm %s7361_s2, 12288 }
  0x39   :  { %p6137_p10 = scmp.ne.s32.totalorder %s7361_s2, %s6136_s15  ;;  %p6140_p11 = scmp.lt.u32.totalorder %s6136_s15, %s7361_s2 }
  0x3b   :  { %p6142_p12 = pnand %p6140_p11, %p6137_p10 }
  0x3d   :  { %6145 = shalt.err (!%p6142_p12)
}
  0x3e   :  { %s6146_s0 = scalar_lea.vmem %s50_s30, 12288  ;;  %p6151_p0 = scmp.lt.s32.totalorder %s50_s30, %s50_s30 }
  0x3f   :  { %p6147_p13 = scmp.ne.s32.totalorder %s50_s30, %s6146_s0  ;;  %p6152_p1 = scmp.lt.s32.totalorder %s6146_s0, %s6146_s0 }
  0x41   :  { %p6153_p2 = por %p6152_p1, %p6151_p0 }
  0x43   :  { %p6154_p3 = pnand %p6153_p2, %p6147_p13 }
  0x45   :  { %6157 = shalt.err (!%p6154_p3)
}
  0x46   :  { %55 = dma.hbm_to_vmem [thread:$0]  %s7361_s2, 12288, %s50_s30, [#allocation9], %s6239_s10, %s6239_s10, %s6240_s14  }
  0x47   :  { %s6158_s27 = scalar_lea.hbm %s7365_s6, 2048 }
  0x48   :  { %p6159_p4 = scmp.ne.s32.totalorder %s7365_s6, %s6158_s27  ;;  %p6162_p5 = scmp.lt.u32.totalorder %s6158_s27, %s7365_s6 }
  0x4a   :  { %p6164_p6 = pnand %p6162_p5, %p6159_p4 }
  0x4c   :  { %6167 = shalt.err (!%p6164_p6)
}
  0x4d   :  { %s6168_s11 = scalar_lea.vmem %s78_s12, 2048  ;;  %p6173_p8 = scmp.lt.s32.totalorder %s78_s12, %s78_s12 }
  0x4e   :  { %p6169_p7 = scmp.ne.s32.totalorder %s78_s12, %s6168_s11  ;;  %p6174_p9 = scmp.lt.s32.totalorder %s6168_s11, %s6168_s11 }
  0x50   :  { %p6175_p10 = por %p6174_p9, %p6173_p8 }
  0x52   :  { %p6176_p11 = pnand %p6175_p10, %p6169_p7 }
  0x54   :  { %6179 = shalt.err (!%p6176_p11)
}
  0x55   :  { %83 = dma.hbm_to_vmem [thread:$0]  %s7365_s6, 2048, %s78_s12, [#allocation12], %s6235_s19, %s6235_s19, %s6236_s20  }
  0x56   :  { %6224 = dma.done.wait [#allocation6], 1024  }
  0x57   :  { %6225 = vsyncadd [#allocation6], 4294966272 }
  0x58   :  { %6226 = dma.done.wait [#allocation9], 12544  }
  0x59   :  { %6227 = vsyncadd [#allocation9], 4294954752 }
  0x5a   :  { %6228 = dma.done.wait [#allocation12], 14336  }
  0x5b   :  { %6229 = vsyncadd [#allocation12], 4294952960  ;;  %v7372_v0 = vmov 0.0   ;;  %v110_v1 = vld [vmem:[#allocation10 + $0x8] sm:$0xff]  ;;  %v113_v2 = vld [vmem:[#allocation10 + $0x20] sm:$0xff]  ;;  %vm6245_vm0 = vmmov 0  }
  0x5c   :  { %238 = vmatprep.mubr.f32.mxu1 %v7372_v0  ;;  %533 = vmatprep.mubr.f32.mxu0 %v7372_v0  ;;  %v109_v3 = vld [vmem:[#allocation10] sm:$0xff]  ;;  %v4775_v4 = vpack.c.bf16 %v113_v2, %v110_v1  ;;  %v112_v5 = vld [vmem:[#allocation10 + $0x18] sm:$0xff]  ;;  %v417_v6 = vld [vmem:[#allocation11 + $0x8] sm:$0xff] }
  0x5d   :  { %v420_v7 = vld [vmem:[#allocation11 + $0x20] sm:$0xff]  ;;  %v4777_v8 = vpack.c.bf16 %v112_v5, %v109_v3  ;;  %v419_v11 = vld [vmem:[#allocation11 + $0x18] sm:$0xff]  ;;  %v119_v14 = vld [vmem:[#allocation10 + $0x50] sm:$0xff] }
  0x5e   :  { %v6375_v9 = vpack.c.bf16 %v420_v7, %v417_v6  ;;  %v416_v10 = vld [vmem:[#allocation11] sm:$0xff]  ;;  %v116_v12 = vld [vmem:[#allocation10 + $0x38] sm:$0xff]  ;;  %4776 = vmatprep.subr.bf16.mxu1 %v4775_v4  ;;  %v115_v15 = vld [vmem:[#allocation10 + $0x30] sm:$0xff] }
  0x5f   :  { %v6377_v13 = vpack.c.bf16 %v419_v11, %v416_v10  ;;  %v118_v16 = vld [vmem:[#allocation10 + $0x48] sm:$0xff]  ;;  %4778 = vmatpush1.bf16.msra.mxu1 %v4777_v8  ;;  %v4779_v17 = vpack.c.bf16 %v119_v14, %v116_v12  ;;  %v423_v19 = vld [vmem:[#allocation11 + $0x38] sm:$0xff]  ;;  %v426_v20 = vld [vmem:[#allocation11 + $0x50] sm:$0xff] }
  0x60   :  { %4840 = vmatprep.subr.bf16.mxu0 %v6375_v9  ;;  %v4781_v18 = vpack.c.bf16 %v118_v16, %v115_v15  ;;  %v422_v21 = vld [vmem:[#allocation11 + $0x30] sm:$0xff]  ;;  %v6381_v22 = vpack.c.bf16 %v426_v20, %v423_v19  ;;  %v425_v23 = vld [vmem:[#allocation11 + $0x48] sm:$0xff]  ;;  %v125_v25 = vld [vmem:[#allocation10 + $0x80] sm:$0xff] }
  0x61   :  { %4842 = vmatpush1.bf16.msra.mxu0 %v6377_v13  ;;  %v122_v24 = vld [vmem:[#allocation10 + $0x68] sm:$0xff]  ;;  %4780 = vmatprep.subr.bf16.mxu1 %v4779_v17  ;;  %v6383_v26 = vpack.c.bf16 %v425_v23, %v422_v21  ;;  %v121_v28 = vld [vmem:[#allocation10 + $0x60] sm:$0xff]  ;;  %v124_v29 = vld [vmem:[#allocation10 + $0x78] sm:$0xff] }
  0x62   :  { %v4783_v27 = vpack.c.bf16 %v125_v25, %v122_v24  ;;  %v429_v30 = vld [vmem:[#allocation11 + $0x68] sm:$0xff]  ;;  %4844 = vmatprep.subr.bf16.mxu0 %v6381_v22  ;;  %v432_v31 = vld [vmem:[#allocation11 + $0x80] sm:$0xff]  ;;  %v431_v33 = vld [vmem:[#allocation11 + $0x78] sm:$0xff]  ;;  %v4785_v34 = vpack.c.bf16 %v124_v29, %v121_v28 }
  0x63   :  { %v428_v32 = vld [vmem:[#allocation11 + $0x60] sm:$0xff]  ;;  %4782 = vmatpush1.bf16.msra.mxu1 %v4781_v18  ;;  %v6386_v35 = vpack.c.bf16 %v432_v31, %v429_v30  ;;  %v128_v36 = vld [vmem:[#allocation10 + $0x98] sm:$0xff]  ;;  %v131_v37 = vld [vmem:[#allocation10 + $0xb0] sm:$0xff] }
  0x64   :  { %v127_v38 = vld [vmem:[#allocation10 + $0x90] sm:$0xff]  ;;  %4784 = vmatprep.subr.bf16.mxu1 %v4783_v27  ;;  %v6389_v39 = vpack.c.bf16 %v431_v33, %v428_v32  ;;  %v4787_v40 = vpack.c.bf16 %v131_v37, %v128_v36  ;;  %v130_v41 = vld [vmem:[#allocation10 + $0xa8] sm:$0xff]  ;;  %v435_v42 = vld [vmem:[#allocation11 + $0x98] sm:$0xff] }
  0x65   :  { %4846 = vmatpush1.bf16.msra.mxu0 %v6383_v26  ;;  %v438_v43 = vld [vmem:[#allocation11 + $0xb0] sm:$0xff]  ;;  %v437_v46 = vld [vmem:[#allocation11 + $0xa8] sm:$0xff]  ;;  %v137_v48 = vld [vmem:[#allocation10 + $0xe0] sm:$0xff]  ;;  %v4789_v49 = vpack.c.bf16 %v130_v41, %v127_v38 }
  0x66   :  { %4848 = vmatprep.subr.bf16.mxu0 %v6386_v35  ;;  %v6392_v44 = vpack.c.bf16 %v438_v43, %v435_v42  ;;  %v434_v45 = vld [vmem:[#allocation11 + $0x90] sm:$0xff]  ;;  %v134_v47 = vld [vmem:[#allocation10 + $0xc8] sm:$0xff]  ;;  %v444_v51 = vld [vmem:[#allocation11 + $0xe0] sm:$0xff] }
  0x67   :  { %4786 = vmatpush1.bf16.msra.mxu1 %v4785_v34  ;;  %v441_v50 = vld [vmem:[#allocation11 + $0xc8] sm:$0xff]  ;;  %v6395_v52 = vpack.c.bf16 %v437_v46, %v434_v45  ;;  %v4791_v53 = vpack.c.bf16 %v137_v48, %v134_v47  ;;  %v133_v54 = vld [vmem:[#allocation10 + $0xc0] sm:$0xff]  ;;  %v136_v55 = vld [vmem:[#allocation10 + $0xd8] sm:$0xff] }
  0x68   :  { %4788 = vmatprep.subr.bf16.mxu1 %v4787_v40  ;;  %v440_v56 = vld [vmem:[#allocation11 + $0xc0] sm:$0xff]  ;;  %v6398_v57 = vpack.c.bf16 %v444_v51, %v441_v50  ;;  %v443_v58 = vld [vmem:[#allocation11 + $0xd8] sm:$0xff]  ;;  %v143_v60 = vld [vmem:[#allocation10 + $0x110] sm:$0xff]  ;;  %v4793_v63 = vpack.c.bf16 %v136_v55, %v133_v54 }
  0x69   :  { %4850 = vmatpush1.bf16.msra.mxu0 %v6389_v39  ;;  %v140_v59 = vld [vmem:[#allocation10 + $0xf8] sm:$0xff]  ;;  %v450_v62 = vld [vmem:[#allocation11 + $0x110] sm:$0xff]  ;;  %v6401_v1 = vpack.c.bf16 %v443_v58, %v440_v56  ;;  %v142_v4 = vld [vmem:[#allocation10 + $0x108] sm:$0xff] }
  0x6a   :  { %4852 = vmatprep.subr.bf16.mxu0 %v6392_v44  ;;  %v447_v61 = vld [vmem:[#allocation11 + $0xf8] sm:$0xff]  ;;  %v4795_v2 = vpack.c.bf16 %v143_v60, %v140_v59  ;;  %v139_v3 = vld [vmem:[#allocation10 + $0xf0] sm:$0xff]  ;;  %v449_v7 = vld [vmem:[#allocation11 + $0x108] sm:$0xff] }
  0x6b   :  { %4790 = vmatpush1.bf16.msra.mxu1 %v4789_v49  ;;  %v446_v5 = vld [vmem:[#allocation11 + $0xf0] sm:$0xff]  ;;  %v6404_v6 = vpack.c.bf16 %v450_v62, %v447_v61  ;;  %v146_v8 = vld [vmem:[#allocation10 + $0x128] sm:$0xff]  ;;  %v149_v10 = vld [vmem:[#allocation10 + $0x140] sm:$0xff]  ;;  %v4797_v14 = vpack.c.bf16 %v142_v4, %v139_v3 }
  0x6c   :  { %4792 = vmatprep.subr.bf16.mxu1 %v4791_v53  ;;  %v453_v11 = vld [vmem:[#allocation11 + $0x128] sm:$0xff]  ;;  %v456_v12 = vld [vmem:[#allocation11 + $0x140] sm:$0xff]  ;;  %v6407_v15 = vpack.c.bf16 %v449_v7, %v446_v5  ;;  %v4799_v16 = vpack.c.bf16 %v149_v10, %v146_v8  ;;  %v148_v18 = vld [vmem:[#allocation10 + $0x138] sm:$0xff] }
  0x6d   :  { %4854 = vmatpush1.bf16.msra.mxu0 %v6395_v52  ;;  %v145_v17 = vld [vmem:[#allocation10 + $0x120] sm:$0xff]  ;;  %v6410_v20 = vpack.c.bf16 %v456_v12, %v453_v11  ;;  %v455_v21 = vld [vmem:[#allocation11 + $0x138] sm:$0xff]  ;;  %v155_v24 = vld [vmem:[#allocation10 + $0x170] sm:$0xff] }
  0x6e   :  { %4856 = vmatprep.subr.bf16.mxu0 %v6398_v57  ;;  %v452_v19 = vld [vmem:[#allocation11 + $0x120] sm:$0xff]  ;;  %v152_v23 = vld [vmem:[#allocation10 + $0x158] sm:$0xff]  ;;  %v462_v27 = vld [vmem:[#allocation11 + $0x170] sm:$0xff]  ;;  %v4801_v28 = vpack.c.bf16 %v148_v18, %v145_v17 }
  0x6f   :  { %4794 = vmatpush1.bf16.msra.mxu1 %v4793_v63  ;;  %v459_v25 = vld [vmem:[#allocation11 + $0x158] sm:$0xff]  ;;  %v6413_v29 = vpack.c.bf16 %v455_v21, %v452_v19  ;;  %v4803_v30 = vpack.c.bf16 %v155_v24, %v152_v23  ;;  %v151_v31 = vld [vmem:[#allocation10 + $0x150] sm:$0xff]  ;;  %v154_v32 = vld [vmem:[#allocation10 + $0x168] sm:$0xff]  ;;  %v7374_v23 = vmov 0.0|0.0  }
  0x70   :  { %4796 = vmatprep.subr.bf16.mxu1 %v4795_v2  ;;  %v458_v33 = vld [vmem:[#allocation11 + $0x150] sm:$0xff]  ;;  %v6416_v34 = vpack.c.bf16 %v462_v27, %v459_v25  ;;  %v461_v36 = vld [vmem:[#allocation11 + $0x168] sm:$0xff]  ;;  %v4805_v40 = vpack.c.bf16 %v154_v32, %v151_v31  ;;  %v117_v43 = vld [vmem:[#allocation10 + $0x40] sm:$0xff] }
  0x71   :  { %4858 = vmatpush1.bf16.msra.mxu0 %v6401_v1  ;;  %v111_v37 = vld [vmem:[#allocation10 + $0x10] sm:$0xff]  ;;  %v114_v38 = vld [vmem:[#allocation10 + $0x28] sm:$0xff]  ;;  %v6419_v41 = vpack.c.bf16 %v461_v36, %v458_v33  ;;  %v120_v45 = vld [vmem:[#allocation10 + $0x58] sm:$0xff] }
  0x72   :  { %4860 = vmatprep.subr.bf16.mxu0 %v6404_v6  ;;  %v4807_v42 = vpack.c.bf16 %v114_v38, %v111_v37  ;;  %v6422_v46 = vld [vmem:[#allocation5] sm:$0xff]  ;;  %v4811_v48 = vpack.c.bf16 %v120_v45, %v117_v43  ;;  %v126_v50 = vld [vmem:[#allocation10 + $0x88] sm:$0xff]  ;;  %v6430_v51 = vld [vmem:[#allocation5 + $0x8] sm:$0xff] }
  0x73   :  { %4798 = vmatpush1.bf16.msra.mxu1 %v4797_v14  ;;  %v6425_v47 = vld [vmem:[#allocation8] sm:$0xff]  ;;  %v129_v54 = vld [vmem:[#allocation10 + $0xa0] sm:$0xff]  ;;  %v132_v55 = vld [vmem:[#allocation10 + $0xb8] sm:$0xff] }
  0x74   :  { %4800 = vmatprep.subr.bf16.mxu1 %v4799_v16  ;;  %v123_v49 = vld [vmem:[#allocation10 + $0x70] sm:$0xff]  ;;  %v6438_v56 = vld [vmem:[#allocation5 + $0x10] sm:$0xff]  ;;  %v4819_v58 = vpack.c.bf16 %v132_v55, %v129_v54  ;;  %v138_v60 = vld [vmem:[#allocation10 + $0xe8] sm:$0xff]  ;;  %v159_v54 = vlaneseq }
  0x75   :  { %4862 = vmatpush1.bf16.msra.mxu0 %v6407_v15  ;;  %v4815_v53 = vpack.c.bf16 %v126_v50, %v123_v49  ;;  %v135_v59 = vld [vmem:[#allocation10 + $0xd0] sm:$0xff]  ;;  %v104_v61 = vld [vmem:[#allocation5 + $0x18] sm:$0xff]  ;;  %v141_v63 = vld [vmem:[#allocation10 + $0x100] sm:$0xff] }
  0x76   :  { %4864 = vmatprep.subr.bf16.mxu0 %v6410_v20  ;;  %v4823_v62 = vpack.c.bf16 %v138_v60, %v135_v59  ;;  %v144_v2 = vld [vmem:[#allocation10 + $0x118] sm:$0xff]  ;;  %v105_v3 = vld [vmem:[#allocation5 + $0x20] sm:$0xff]  ;;  %v150_v7 = vld [vmem:[#allocation10 + $0x148] sm:$0xff]  ;;  %v6517_v55 = vshrl.u32 %v159_v54, 7 }
  0x77   :  { %4802 = vmatpush1.bf16.msra.mxu1 %v4801_v28  ;;  %v4827_v4 = vpack.c.bf16 %v144_v2, %v141_v63  ;;  %v147_v5 = vld [vmem:[#allocation10 + $0x130] sm:$0xff]  ;;  %v106_v8 = vld [vmem:[#allocation5 + $0x28] sm:$0xff]  ;;  %v153_v11 = vld [vmem:[#allocation10 + $0x160] sm:$0xff] }
  0x78   :  { %4804 = vmatprep.subr.bf16.mxu1 %v4803_v30  ;;  %v4831_v10 = vpack.c.bf16 %v150_v7, %v147_v5  ;;  %v156_v12 = vld [vmem:[#allocation10 + $0x178] sm:$0xff]  ;;  %v107_v14 = vld [vmem:[#allocation5 + $0x30] sm:$0xff]  ;;  %v108_v17 = vld [vmem:[#allocation5 + $0x38] sm:$0xff]  ;;  %7378 = vst [vmem:[#allocation22_spill] sm:$0xff] %v6517_v55  ;;  %v7370_v59 = vsub.s32 1, %v6517_v55 }
  0x79   :  { %4866 = vmatpush1.bf16.msra.mxu0 %v6413_v29  ;;  %v4835_v16 = vpack.c.bf16 %v156_v12, %v153_v11  ;;  %v418_v18 = vld [vmem:[#allocation11 + $0x10] sm:$0xff]  ;;  %v421_v19 = vld [vmem:[#allocation11 + $0x28] sm:$0xff]  ;;  %v424_v24 = vld [vmem:[#allocation11 + $0x40] sm:$0xff] }
  0x7a   :  { %4868 = vmatprep.subr.bf16.mxu0 %v6416_v34  ;;  %v6459_v21 = vpack.c.bf16 %v421_v19, %v418_v18  ;;  %v427_v25 = vld [vmem:[#allocation11 + $0x58] sm:$0xff]  ;;  %v430_v28 = vld [vmem:[#allocation11 + $0x70] sm:$0xff]  ;;  %v433_v30 = vld [vmem:[#allocation11 + $0x88] sm:$0xff] }
  0x7b   :  { %4806 = vmatpush1.bf16.msra.mxu1 %v4805_v40  ;;  %v6466_v27 = vpack.c.bf16 %v427_v25, %v424_v24  ;;  %v6471_v31 = vpack.c.bf16 %v433_v30, %v430_v28  ;;  %v436_v32 = vld [vmem:[#allocation11 + $0xa0] sm:$0xff]  ;;  %v439_v33 = vld [vmem:[#allocation11 + $0xb8] sm:$0xff]  ;;  %v442_v37 = vld [vmem:[#allocation11 + $0xd0] sm:$0xff] }
  0x7c   :  { %4808 = vmatprep.subr.bf16.mxu1 %v4807_v42  ;;  %v6475_v36 = vpack.c.bf16 %v439_v33, %v436_v32  ;;  %v445_v38 = vld [vmem:[#allocation11 + $0xe8] sm:$0xff]  ;;  %v451_v43 = vld [vmem:[#allocation11 + $0x118] sm:$0xff]  ;;  %v460_v50 = vld [vmem:[#allocation11 + $0x160] sm:$0xff] }
  0x7d   :  { %4870 = vmatpush1.bf16.msra.mxu0 %v6419_v41  ;;  %v6479_v40 = vpack.c.bf16 %v445_v38, %v442_v37 }
  0x7e   :  { %4896 = vmatprep.subr.bf16.mxu0 %v6375_v9  ;;  %239 = vmatmul.mubr.f32.vlgmr.msra.gmra.mrb[0].mxu1 %v6422_v46 }
  0x7f   :  { %4810 = vmatpush3.bf16.msra.mxu1 %v4807_v42  ;;  %244 = vmatprep.mubr.f32.mxu1 %v7372_v0  ;;  %v448_v42 = vld [vmem:[#allocation11 + $0x100] sm:$0xff] }
  0x80   :  { %534 = vmatmul.mubr.f32.vlgmr.msra.gmra.mrb[0].mxu0 %v6425_v47  ;;  %4812 = vmatprep.subr.bf16.mxu1 %v4811_v48  ;;  %v6485_v45 = vpack.c.bf16 %v451_v43, %v448_v42 }
  0x81   :  { %4898 = vmatpush1.bf16.msra.mxu0 %v6377_v13  ;;  %706 = vmatprep.mubr.f32.mxu0 %v7372_v0 }
  0x82   :  { %245 = vmatmul.mubr.f32.gmra.mrb[2].mxu1 %v6430_v51  ;;  %4900 = vmatprep.subr.bf16.mxu0 %v6381_v22 }
  0x83   :  { %4814 = vmatpush3.bf16.msra.mxu1 %v4811_v48  ;;  %250 = vmatprep.mubr.f32.mxu1 %v7372_v0  ;;  %v457_v48 = vld [vmem:[#allocation11 + $0x148] sm:$0xff] }
  0x84   :  { %4816 = vmatprep.subr.bf16.mxu1 %v4815_v53 }
  0x85   :  { %4902 = vmatpush1.bf16.msra.mxu0 %v6383_v26 }
  0x86   :  { %251 = vmatmul.mubr.f32.gmra.mrb[4].mxu1 %v6438_v56  ;;  %4904 = vmatprep.subr.bf16.mxu0 %v6386_v35 }
  0x87   :  { %4818 = vmatpush3.bf16.msra.mxu1 %v4815_v53  ;;  %256 = vmatprep.mubr.f32.mxu1 %v7372_v0 }
  0x88   :  { %4820 = vmatprep.subr.bf16.mxu1 %v4819_v58 }
  0x89   :  { %4906 = vmatpush1.bf16.msra.mxu0 %v6389_v39 }
  0x8a   :  { %257 = vmatmul.mubr.f32.gmra.mrb[6].mxu1 %v104_v61  ;;  %4908 = vmatprep.subr.bf16.mxu0 %v6392_v44 }
  0x8b   :  { %4822 = vmatpush3.bf16.msra.mxu1 %v4819_v58  ;;  %262 = vmatprep.mubr.f32.mxu1 %v7372_v0  ;;  %v157_v58 = vld [vmem:[%s7362_s3] sm:$0x7] }
  0x8c   :  { %4824 = vmatprep.subr.bf16.mxu1 %v4823_v62 }
  0x8d   :  { %4910 = vmatpush1.bf16.msra.mxu0 %v6395_v52 }
  0x8e   :  { %263 = vmatmul.mubr.f32.gmra.mrb[8].mxu1 %v105_v3  ;;  %4912 = vmatprep.subr.bf16.mxu0 %v6398_v57 }
  0x8f   :  { %4826 = vmatpush3.bf16.msra.mxu1 %v4823_v62  ;;  %268 = vmatprep.mubr.f32.mxu1 %v7372_v0 }
  0x90   :  { %4828 = vmatprep.subr.bf16.mxu1 %v4827_v4 }
  0x91   :  { %4914 = vmatpush1.bf16.msra.mxu0 %v6401_v1 }
  0x92   :  { %269 = vmatmul.mubr.f32.gmra.mrb[10].mxu1 %v106_v8  ;;  %4916 = vmatprep.subr.bf16.mxu0 %v6404_v6 }
  0x93   :  { %4830 = vmatpush3.bf16.msra.mxu1 %v4827_v4  ;;  %274 = vmatprep.mubr.f32.mxu1 %v7372_v0 }
  0x94   :  { %4832 = vmatprep.subr.bf16.mxu1 %v4831_v10 }
  0x95   :  { %4918 = vmatpush1.bf16.msra.mxu0 %v6407_v15 }
  0x96   :  { %275 = vmatmul.mubr.f32.gmra.mrb[12].mxu1 %v107_v14  ;;  %4920 = vmatprep.subr.bf16.mxu0 %v6410_v20 }
  0x97   :  { %4834 = vmatpush3.bf16.msra.mxu1 %v4831_v10  ;;  %280 = vmatprep.mubr.f32.mxu1 %v7372_v0 }
  0x98   :  { %4836 = vmatprep.subr.bf16.mxu1 %v4835_v16 }
  0x99   :  { %4922 = vmatpush1.bf16.msra.mxu0 %v6413_v29 }
  0x9a   :  { %281 = vmatmul.mubr.f32.gmra.mrb[14].mxu1 %v108_v17  ;;  %4924 = vmatprep.subr.bf16.mxu0 %v6416_v34 }
  0x9b   :  { %4838 = vmatpush3.bf16.msra.mxu1 %v4835_v16  ;;  %4115 = vmatprep.mubr.f32.mxu1 %v6422_v46  ;;  %v454_v46 = vld [vmem:[#allocation11 + $0x130] sm:$0xff] }
  0x9c   :  { %4871 = vmatprep.subr.bf16.mxu1 %v7374_v23  ;;  %v6489_v49 = vpack.c.bf16 %v457_v48, %v454_v46 }
  0x9d   :  { %4926 = vmatpush1.bf16.msra.mxu0 %v6419_v41 }
  0x9e   :  { %4116 = vmatmul.mubr.f32.vlgmr.msra.gmra.mrb[16].mxu1 %v6430_v51  ;;  %4952 = vmatprep.subr.bf16.mxu0 %v6375_v9  ;;  %v463_v51 = vld [vmem:[#allocation11 + $0x178] sm:$0xff] }
  0x9f   :  { %4873 = vmatpush3.bf16.msra.mxu1 %v6459_v21  ;;  %4118 = vmatprep.mubr.f32.mxu1 %v6438_v56  ;;  %v6493_v53 = vpack.c.bf16 %v463_v51, %v460_v50  ;;  %v7371_v56 = vsub.s32 0, %v6517_v55 }
  0xa0   :  { %4874 = vmatprep.subr.bf16.mxu1 %v7374_v23 }
  0xa1   :  { %v162_v60 = vrot.slane %v157_v58, %v7371_v56 }
  0xa2   :  { %4119 = vmatmul.mubr.f32.gmra.mrb[18].mxu1 %v104_v61  ;;  %v166_v61 = vrot.slane %v157_v58, %v7370_v59 }
  0xa3   :  { %4876 = vmatpush3.bf16.msra.mxu1 %v6466_v27  ;;  %4121 = vmatprep.mubr.f32.mxu1 %v105_v3 }
  0xa4   :  { %4877 = vmatprep.subr.bf16.mxu1 %v7374_v23 }
  0xa6   :  { %4122 = vmatmul.mubr.f32.gmra.mrb[20].mxu1 %v106_v8 }
  0xa7   :  { %4879 = vmatpush3.bf16.msra.mxu1 %v6471_v31  ;;  %4124 = vmatprep.mubr.f32.mxu1 %v107_v14 }
  0xa8   :  { %4880 = vmatprep.subr.bf16.mxu1 %v7374_v23 }
  0xaa   :  { %4125 = vmatmul.mubr.f32.gmra.mrb[22].mxu1 %v108_v17 }
  0xab   :  { %4882 = vmatpush3.bf16.msra.mxu1 %v6475_v36  ;;  %4159 = vmatprep.mubr.msk.f32.mxu1 %vm6245_vm0, %v7372_v0 }
  0xac   :  { %4883 = vmatprep.subr.bf16.mxu1 %v7374_v23 }
  0xaf   :  { %4885 = vmatpush3.bf16.msra.mxu1 %v6479_v40 }
  0xb0   :  { %4886 = vmatprep.subr.bf16.mxu1 %v7374_v23 }
  0xb3   :  { %4888 = vmatpush3.bf16.msra.mxu1 %v6485_v45 }
  0xb4   :  { %4889 = vmatprep.subr.bf16.mxu1 %v7374_v23 }
  0xb7   :  { %4891 = vmatpush3.bf16.msra.mxu1 %v6489_v49 }
  0xb8   :  { %4892 = vmatprep.subr.bf16.mxu1 %v7374_v23 }
  0xbb   :  { %4894 = vmatpush3.bf16.msra.mxu1 %v6493_v53 }
  0xbc   :  { %4927 = vmatprep.subr.bf16.mxu1 %v7374_v23 }
  0xbe   :  { %4160 = vmatmul.mubr.f32.vlgmr.msra.gmra.mrb[24].mxu1 %v6425_v47 }
  0xbf   :  { %4929 = vmatpush3.bf16.msra.mxu1 %v6459_v21  ;;  %4194 = vmatprep.mubr.msk.f32.mxu1 %vm6245_vm0, %v7372_v0 }
  0xc0   :  { %4930 = vmatprep.subr.bf16.mxu1 %v7374_v23 }
  0xc3   :  { %4932 = vmatpush3.bf16.msra.mxu1 %v6466_v27 }
  0xc4   :  { %4933 = vmatprep.subr.bf16.mxu1 %v7374_v23 }
  0xc7   :  { %4935 = vmatpush3.bf16.msra.mxu1 %v6471_v31 }
  0xc8   :  { %4936 = vmatprep.subr.bf16.mxu1 %v7374_v23 }
  0xcb   :  { %4938 = vmatpush3.bf16.msra.mxu1 %v6475_v36 }
  0xcc   :  { %4939 = vmatprep.subr.bf16.mxu1 %v7374_v23 }
  0xcf   :  { %4941 = vmatpush3.bf16.msra.mxu1 %v6479_v40 }
  0xd0   :  { %4942 = vmatprep.subr.bf16.mxu1 %v7374_v23 }
  0xd3   :  { %4944 = vmatpush3.bf16.msra.mxu1 %v6485_v45 }
  0xd4   :  { %4945 = vmatprep.subr.bf16.mxu1 %v7374_v23 }
  0xd7   :  { %4947 = vmatpush3.bf16.msra.mxu1 %v6489_v49 }
  0xd8   :  { %4948 = vmatprep.subr.bf16.mxu1 %v7374_v23 }
  0xdb   :  { %4950 = vmatpush3.bf16.msra.mxu1 %v6493_v53 }
  0xdc   :  { %4983 = vmatprep.subr.bf16.mxu1 %v7374_v23 }
 0x151   :  { %v240_v62 = vpop.f32.mrb[0].mxu1 }
 0x152   :  { %v241_v63 = vadd.f32 %v240_v62, %v162_v60  ;;  %v242_v2 = vpop.f32.mrb[1].mxu1  ;;  %v7369_v62 = vsub.s32 2, %v6517_v55 }
 0x153   :  { %v535_v3 = vpop.f32.mrb[0].mxu0  ;;  %v243_v4 = vadd.f32 %v242_v2, %v166_v61 }
 0x154   :  { %v537_v5 = vpop.f32.mrb[1].mxu0  ;;  %v610_v7 = vadd.f32 %v535_v3, %v241_v63 }
 0x155   :  { %v617_v8 = vadd.f32 %v537_v5, %v243_v4  ;;  %v246_v10 = vpop.f32.mrb[2].mxu1  ;;  %v170_v5 = vrot.slane %v157_v58, %v7369_v62 }
 0x156   :  { %v6528_v11 = vadd.f32 %v246_v10, %v162_v60  ;;  %v248_v12 = vpop.f32.mrb[3].mxu1 }
 0x157   :  { %v6530_v14 = vadd.f32 %v248_v12, %v166_v61 }
 0x159   :  { %v252_v16 = vpop.f32.mrb[4].mxu1 }
 0x15a   :  { %v6532_v17 = vadd.f32 %v252_v16, %v162_v60  ;;  %v254_v18 = vpop.f32.mrb[5].mxu1 }
 0x15b   :  { %v6534_v19 = vadd.f32 %v254_v18, %v166_v61 }
 0x15d   :  { %v258_v24 = vpop.f32.mrb[6].mxu1 }
 0x15e   :  { %v6536_v25 = vadd.f32 %v258_v24, %v162_v60  ;;  %v260_v28 = vpop.f32.mrb[7].mxu1  ;;  %v3702_v24 = vmul.f32 -1.442695, %v610_v7 }
 0x15f   :  { %v6538_v30 = vadd.f32 %v260_v28, %v166_v61 }
 0x160   :  { %5909 = vpow2.f32 %v3702_v24  ;;  %v6576_v24 = vld [vmem:[%s7364_s5] ss:$0 sm:$0xff] }
 0x161   :  { %v264_v32 = vpop.f32.mrb[8].mxu1 }
 0x162   :  { %v6540_v33 = vadd.f32 %v264_v32, %v162_v60  ;;  %v266_v37 = vpop.f32.mrb[9].mxu1 }
 0x163   :  { %v6542_v38 = vadd.f32 %v266_v37, %v166_v61 }
 0x165   :  { %v270_v42 = vpop.f32.mrb[10].mxu1 }
 0x166   :  { %v6544_v43 = vadd.f32 %v270_v42, %v162_v60  ;;  %v272_v46 = vpop.f32.mrb[11].mxu1 }
 0x167   :  { %v6546_v48 = vadd.f32 %v272_v46, %v166_v61 }
 0x169   :  { %v276_v50 = vpop.f32.mrb[12].mxu1 }
 0x16a   :  { %v6548_v51 = vadd.f32 %v276_v50, %v162_v60  ;;  %v278_v54 = vpop.f32.mrb[13].mxu1  ;;  %v5910_v7 = vpop.eup %5909 }
 0x16b   :  { %v6551_v63 = vadd.f32 %v278_v54, %v166_v61 }
 0x16d   :  { %v282_v2 = vpop.f32.mrb[14].mxu1 }
 0x16e   :  { %v6553_v3 = vadd.f32 %v282_v2, %v162_v60  ;;  %v284_v4 = vpop.f32.mrb[15].mxu1 }
 0x16f   :  { %v6557_v10 = vadd.f32 %v284_v4, %v166_v61  ;;  %v3703_v4 = vmul.f32 -1.442695, %v617_v8 }
 0x171   :  { %v4117_v12 = vpop.f32.mrb[16].mxu1  ;;  %5911 = vpow2.f32 %v3703_v4 }
 0x172   :  { %v6559_v16 = vadd.f32 %v4117_v12, %v170_v5  ;;  %v353_v18 = vpop.f32.mrb[17].mxu1 }
 0x173   :  { %v354_v8 = vadd.f32 %v353_v18, %v170_v5 }
 0x175   :  { %v4120_v28 = vpop.f32.mrb[18].mxu1 }
 0x176   :  { %v6561_v32 = vadd.f32 %v4120_v28, %v170_v5  ;;  %v363_v37 = vpop.f32.mrb[19].mxu1  ;;  %v614_v28 = vadd.f32 1.0, %v5910_v7 }
 0x177   :  { %v6563_v42 = vadd.f32 %v363_v37, %v170_v5 }
 0x178   :  { %5913 = vrcp.f32 %v614_v28 }
 0x179   :  { %v4123_v60 = vpop.f32.mrb[20].mxu1 }
 0x17a   :  { %v6565_v46 = vadd.f32 %v4123_v60, %v170_v5  ;;  %v373_v50 = vpop.f32.mrb[21].mxu1 }
 0x17b   :  { %v6567_v54 = vadd.f32 %v373_v50, %v170_v5  ;;  %v5912_v37 = vpop.eup %5911 }
 0x17c   :  { %v621_v60 = vadd.f32 1.0, %v5912_v37 }
 0x17d   :  { %v4126_v58 = vpop.f32.mrb[22].mxu1 }
 0x17e   :  { %v6569_v61 = vadd.f32 %v4126_v58, %v170_v5  ;;  %v383_v2 = vpop.f32.mrb[23].mxu1  ;;  %5915 = vrcp.f32 %v621_v60 }
 0x17f   :  { %v6571_v12 = vadd.f32 %v383_v2, %v170_v5 }
 0x182   :  { %v5914_v59 = vpop.eup %5913 }
 0x188   :  { %v5916_v4 = vpop.eup %5915 }
 0x189   :  { %v634_v7 = vsub.f32 1.0, %v5916_v4  ;;  %v636_v23 = vmul.f32 %v5916_v4, %v6425_v47 }
 0x191   :  { %v606_v50 = vpop.f32.mrb[24].mxu1 }
 0x192   :  { %v630_v62 = vadd.f32 %v6576_v24, %v606_v50  ;;  %v4161_v58 = vpop.f32.mrb[25].mxu1 }
 0x194   :  { %v631_v2 = vmul.f32 %v5914_v59, %v630_v62  ;;  %v7379_v59 = vmov 0.0|0.0  }
 0x196   :  { %v632_v56 = vadd.f32 %v631_v2, %v354_v8 }
 0x198   :  { %5917 = vtanh.f32 %v632_v56  ;;  %v7380_v56 = vmov 0.0  }
 0x1a2   :  { %v5918_v28 = vpop.eup %5917 }
 0x1a3   :  { %v635_v0 = vmul.f32 %v5918_v28, %v634_v7 }
 0x1a5   :  { %v6580_v55 = vadd.f32 %v636_v23, %v635_v0 }
 0x1a7   :  { %707 = vmatmul.mubr.f32.vlgmr.msra.gmra.mrb[2].mxu0 %v6580_v55  ;;  %4195 = vmatmul.mubr.f32.vlgmr.msra.gmra.mrb[26].mxu1 %v6580_v55 }
 0x1a8   :  { %4954 = vmatpush1.bf16.msra.mxu0 %v6377_v13  ;;  %4985 = vmatpush3.bf16.msra.mxu1 %v6459_v21 }
 0x1a9   :  { %4956 = vmatprep.subr.bf16.mxu0 %v6381_v22  ;;  %4986 = vmatprep.subr.bf16.mxu1 %v7379_v59 }
 0x1aa   :  { %873 = vmatprep.mubr.f32.mxu0 %v7380_v56  ;;  %4229 = vmatprep.mubr.msk.f32.mxu1 %vm6245_vm0, %v7380_v56 }
 0x1ac   :  { %4958 = vmatpush1.bf16.msra.mxu0 %v6383_v26  ;;  %4988 = vmatpush3.bf16.msra.mxu1 %v6466_v27 }
 0x1ad   :  { %4960 = vmatprep.subr.bf16.mxu0 %v6386_v35  ;;  %4989 = vmatprep.subr.bf16.mxu1 %v7379_v59 }
 0x1b0   :  { %4962 = vmatpush1.bf16.msra.mxu0 %v6389_v39  ;;  %4991 = vmatpush3.bf16.msra.mxu1 %v6471_v31 }
 0x1b1   :  { %4964 = vmatprep.subr.bf16.mxu0 %v6392_v44  ;;  %4992 = vmatprep.subr.bf16.mxu1 %v7379_v59 }
 0x1b4   :  { %4966 = vmatpush1.bf16.msra.mxu0 %v6395_v52  ;;  %4994 = vmatpush3.bf16.msra.mxu1 %v6475_v36 }
 0x1b5   :  { %4968 = vmatprep.subr.bf16.mxu0 %v6398_v57  ;;  %4995 = vmatprep.subr.bf16.mxu1 %v7379_v59 }
 0x1b8   :  { %4970 = vmatpush1.bf16.msra.mxu0 %v6401_v1  ;;  %4997 = vmatpush3.bf16.msra.mxu1 %v6479_v40 }
 0x1b9   :  { %4972 = vmatprep.subr.bf16.mxu0 %v6404_v6  ;;  %4998 = vmatprep.subr.bf16.mxu1 %v7379_v59 }
 0x1bc   :  { %4974 = vmatpush1.bf16.msra.mxu0 %v6407_v15  ;;  %5000 = vmatpush3.bf16.msra.mxu1 %v6485_v45 }
 0x1bd   :  { %4976 = vmatprep.subr.bf16.mxu0 %v6410_v20  ;;  %5001 = vmatprep.subr.bf16.mxu1 %v7379_v59 }
 0x1c0   :  { %4978 = vmatpush1.bf16.msra.mxu0 %v6413_v29  ;;  %5003 = vmatpush3.bf16.msra.mxu1 %v6489_v49 }
 0x1c1   :  { %4980 = vmatprep.subr.bf16.mxu0 %v6416_v34  ;;  %5004 = vmatprep.subr.bf16.mxu1 %v7379_v59 }
 0x1c4   :  { %4982 = vmatpush1.bf16.msra.mxu0 %v6419_v41  ;;  %5006 = vmatpush3.bf16.msra.mxu1 %v6493_v53 }
 0x1c5   :  { %5008 = vmatprep.subr.bf16.mxu0 %v6375_v9  ;;  %5039 = vmatprep.subr.bf16.mxu1 %v7379_v59 }
 0x27a   :  { %v708_v0 = vpop.f32.mrb[2].mxu0  ;;  %v779_v47 = vpop.f32.mrb[26].mxu1 }
 0x27b   :  { %v783_v23 = vadd.f32 %v708_v0, %v6528_v11  ;;  %v710_v62 = vpop.f32.mrb[3].mxu0  ;;  %v4196_v5 = vpop.f32.mrb[27].mxu1  ;;  %v797_v4 = vadd.f32 %v6576_v24, %v779_v47 }
 0x27c   :  { %v790_v18 = vadd.f32 %v710_v62, %v6530_v14 }
 0x27d   :  { %v3705_v37 = vmul.f32 -1.442695, %v783_v23 }
 0x27e   :  { %v3706_v60 = vmul.f32 -1.442695, %v790_v18 }
 0x27f   :  { %5919 = vpow2.f32 %v3705_v37 }
 0x280   :  { %5921 = vpow2.f32 %v3706_v60 }
 0x289   :  { %v5920_v50 = vpop.eup %5919 }
 0x28a   :  { %v787_v58 = vadd.f32 1.0, %v5920_v50  ;;  %v5922_v8 = vpop.eup %5921 }
 0x28b   :  { %v794_v2 = vadd.f32 1.0, %v5922_v8 }
 0x28c   :  { %5923 = vrcp.f32 %v787_v58 }
 0x28d   :  { %5925 = vrcp.f32 %v794_v2 }
 0x296   :  { %v5924_v7 = vpop.eup %5923 }
 0x297   :  { %v798_v28 = vmul.f32 %v5924_v7, %v797_v4  ;;  %v5926_v0 = vpop.eup %5925 }
 0x298   :  { %v801_v5 = vsub.f32 1.0, %v5926_v0  ;;  %v803_v62 = vmul.f32 %v5926_v0, %v6580_v55 }
 0x299   :  { %v799_v11 = vadd.f32 %v798_v28, %v6559_v16 }
 0x29b   :  { %5927 = vtanh.f32 %v799_v11 }
 0x2a5   :  { %v5928_v14 = vpop.eup %5927 }
 0x2a6   :  { %v802_v23 = vmul.f32 %v5928_v14, %v801_v5 }
 0x2a8   :  { %v6624_v18 = vadd.f32 %v803_v62, %v802_v23 }
 0x2aa   :  { %874 = vmatmul.mubr.f32.vlgmr.msra.gmra.mrb[4].mxu0 %v6624_v18  ;;  %4230 = vmatmul.mubr.f32.vlgmr.msra.gmra.mrb[28].mxu1 %v6624_v18 }
 0x2ab   :  { %5010 = vmatpush1.bf16.msra.mxu0 %v6377_v13  ;;  %5041 = vmatpush3.bf16.msra.mxu1 %v6459_v21 }
 0x2ac   :  { %5012 = vmatprep.subr.bf16.mxu0 %v6381_v22  ;;  %5042 = vmatprep.subr.bf16.mxu1 %v7379_v59 }
 0x2ad   :  { %1040 = vmatprep.mubr.f32.mxu0 %v7380_v56  ;;  %4264 = vmatprep.mubr.msk.f32.mxu1 %vm6245_vm0, %v7380_v56 }
 0x2af   :  { %5014 = vmatpush1.bf16.msra.mxu0 %v6383_v26  ;;  %5044 = vmatpush3.bf16.msra.mxu1 %v6466_v27 }
 0x2b0   :  { %5016 = vmatprep.subr.bf16.mxu0 %v6386_v35  ;;  %5045 = vmatprep.subr.bf16.mxu1 %v7379_v59 }
 0x2b3   :  { %5018 = vmatpush1.bf16.msra.mxu0 %v6389_v39  ;;  %5047 = vmatpush3.bf16.msra.mxu1 %v6471_v31 }
 0x2b4   :  { %5020 = vmatprep.subr.bf16.mxu0 %v6392_v44  ;;  %5048 = vmatprep.subr.bf16.mxu1 %v7379_v59 }
 0x2b7   :  { %5022 = vmatpush1.bf16.msra.mxu0 %v6395_v52  ;;  %5050 = vmatpush3.bf16.msra.mxu1 %v6475_v36 }
 0x2b8   :  { %5024 = vmatprep.subr.bf16.mxu0 %v6398_v57  ;;  %5051 = vmatprep.subr.bf16.mxu1 %v7379_v59 }
 0x2bb   :  { %5026 = vmatpush1.bf16.msra.mxu0 %v6401_v1  ;;  %5053 = vmatpush3.bf16.msra.mxu1 %v6479_v40 }
 0x2bc   :  { %5028 = vmatprep.subr.bf16.mxu0 %v6404_v6  ;;  %5054 = vmatprep.subr.bf16.mxu1 %v7379_v59 }
 0x2bf   :  { %5030 = vmatpush1.bf16.msra.mxu0 %v6407_v15  ;;  %5056 = vmatpush3.bf16.msra.mxu1 %v6485_v45 }
 0x2c0   :  { %5032 = vmatprep.subr.bf16.mxu0 %v6410_v20  ;;  %5057 = vmatprep.subr.bf16.mxu1 %v7379_v59 }
 0x2c3   :  { %5034 = vmatpush1.bf16.msra.mxu0 %v6413_v29  ;;  %5059 = vmatpush3.bf16.msra.mxu1 %v6489_v49 }
 0x2c4   :  { %5036 = vmatprep.subr.bf16.mxu0 %v6416_v34  ;;  %5060 = vmatprep.subr.bf16.mxu1 %v7379_v59 }
 0x2c7   :  { %5038 = vmatpush1.bf16.msra.mxu0 %v6419_v41  ;;  %5062 = vmatpush3.bf16.msra.mxu1 %v6493_v53 }
 0x2c8   :  { %5064 = vmatprep.subr.bf16.mxu0 %v6375_v9  ;;  %5095 = vmatprep.subr.bf16.mxu1 %v7379_v59 }
 0x37d   :  { %v875_v16 = vpop.f32.mrb[4].mxu0  ;;  %v946_v47 = vpop.f32.mrb[28].mxu1 }
 0x37e   :  { %v950_v37 = vadd.f32 %v875_v16, %v6532_v17  ;;  %v877_v60 = vpop.f32.mrb[5].mxu0  ;;  %v4231_v50 = vpop.f32.mrb[29].mxu1  ;;  %v964_v0 = vadd.f32 %v6576_v24, %v946_v47 }
 0x37f   :  { %v957_v58 = vadd.f32 %v877_v60, %v6534_v19 }
 0x380   :  { %v3707_v8 = vmul.f32 -1.442695, %v950_v37 }
 0x381   :  { %v3708_v2 = vmul.f32 -1.442695, %v957_v58 }
 0x382   :  { %5929 = vpow2.f32 %v3707_v8 }
 0x383   :  { %5931 = vpow2.f32 %v3708_v2 }
 0x38c   :  { %v5930_v4 = vpop.eup %5929 }
 0x38d   :  { %v954_v7 = vadd.f32 1.0, %v5930_v4  ;;  %v5932_v28 = vpop.eup %5931 }
 0x38e   :  { %v961_v11 = vadd.f32 1.0, %v5932_v28 }
 0x38f   :  { %5933 = vrcp.f32 %v954_v7 }
 0x390   :  { %5935 = vrcp.f32 %v961_v11 }
 0x399   :  { %v5934_v5 = vpop.eup %5933 }
 0x39a   :  { %v965_v14 = vmul.f32 %v5934_v5, %v964_v0  ;;  %v5936_v23 = vpop.eup %5935 }
 0x39b   :  { %v968_v62 = vsub.f32 1.0, %v5936_v23  ;;  %v970_v37 = vmul.f32 %v5936_v23, %v6624_v18 }
 0x39c   :  { %v966_v17 = vadd.f32 %v965_v14, %v6563_v42 }
 0x39e   :  { %5937 = vtanh.f32 %v966_v17 }
 0x3a8   :  { %v5938_v19 = vpop.eup %5937 }
 0x3a9   :  { %v969_v16 = vmul.f32 %v5938_v19, %v968_v62 }
 0x3ab   :  { %v6668_v60 = vadd.f32 %v970_v37, %v969_v16 }
 0x3ad   :  { %1041 = vmatmul.mubr.f32.vlgmr.msra.gmra.mrb[6].mxu0 %v6668_v60  ;;  %4265 = vmatmul.mubr.f32.vlgmr.msra.gmra.mrb[30].mxu1 %v6668_v60 }
 0x3ae   :  { %5066 = vmatpush1.bf16.msra.mxu0 %v6377_v13  ;;  %5097 = vmatpush3.bf16.msra.mxu1 %v6459_v21 }
 0x3af   :  { %5068 = vmatprep.subr.bf16.mxu0 %v6381_v22  ;;  %5098 = vmatprep.subr.bf16.mxu1 %v7379_v59 }
 0x3b0   :  { %1207 = vmatprep.mubr.f32.mxu0 %v7380_v56  ;;  %4299 = vmatprep.mubr.msk.f32.mxu1 %vm6245_vm0, %v7380_v56 }
 0x3b2   :  { %5070 = vmatpush1.bf16.msra.mxu0 %v6383_v26  ;;  %5100 = vmatpush3.bf16.msra.mxu1 %v6466_v27 }
 0x3b3   :  { %5072 = vmatprep.subr.bf16.mxu0 %v6386_v35  ;;  %5101 = vmatprep.subr.bf16.mxu1 %v7379_v59 }
 0x3b6   :  { %5074 = vmatpush1.bf16.msra.mxu0 %v6389_v39  ;;  %5103 = vmatpush3.bf16.msra.mxu1 %v6471_v31 }
 0x3b7   :  { %5076 = vmatprep.subr.bf16.mxu0 %v6392_v44  ;;  %5104 = vmatprep.subr.bf16.mxu1 %v7379_v59 }
 0x3ba   :  { %5078 = vmatpush1.bf16.msra.mxu0 %v6395_v52  ;;  %5106 = vmatpush3.bf16.msra.mxu1 %v6475_v36 }
 0x3bb   :  { %5080 = vmatprep.subr.bf16.mxu0 %v6398_v57  ;;  %5107 = vmatprep.subr.bf16.mxu1 %v7379_v59 }
 0x3be   :  { %5082 = vmatpush1.bf16.msra.mxu0 %v6401_v1  ;;  %5109 = vmatpush3.bf16.msra.mxu1 %v6479_v40 }
 0x3bf   :  { %5084 = vmatprep.subr.bf16.mxu0 %v6404_v6  ;;  %5110 = vmatprep.subr.bf16.mxu1 %v7379_v59 }
 0x3c2   :  { %5086 = vmatpush1.bf16.msra.mxu0 %v6407_v15  ;;  %5112 = vmatpush3.bf16.msra.mxu1 %v6485_v45 }
 0x3c3   :  { %5088 = vmatprep.subr.bf16.mxu0 %v6410_v20  ;;  %5113 = vmatprep.subr.bf16.mxu1 %v7379_v59 }
 0x3c6   :  { %5090 = vmatpush1.bf16.msra.mxu0 %v6413_v29  ;;  %5115 = vmatpush3.bf16.msra.mxu1 %v6489_v49 }
 0x3c7   :  { %5092 = vmatprep.subr.bf16.mxu0 %v6416_v34  ;;  %5116 = vmatprep.subr.bf16.mxu1 %v7379_v59 }
 0x3ca   :  { %5094 = vmatpush1.bf16.msra.mxu0 %v6419_v41  ;;  %5118 = vmatpush3.bf16.msra.mxu1 %v6493_v53 }
 0x3cb   :  { %5120 = vmatprep.subr.bf16.mxu0 %v6375_v9  ;;  %5151 = vmatprep.subr.bf16.mxu1 %v7379_v59 }
 0x480   :  { %v1042_v42 = vpop.f32.mrb[6].mxu0  ;;  %v1113_v47 = vpop.f32.mrb[30].mxu1 }
 0x481   :  { %v1117_v50 = vadd.f32 %v1042_v42, %v6536_v25  ;;  %v1044_v58 = vpop.f32.mrb[7].mxu0  ;;  %v4266_v8 = vpop.f32.mrb[31].mxu1  ;;  %v1131_v14 = vadd.f32 %v6576_v24, %v1113_v47 }
 0x482   :  { %v1124_v2 = vadd.f32 %v1044_v58, %v6538_v30 }
 0x483   :  { %v3709_v4 = vmul.f32 -1.442695, %v1117_v50 }
 0x484   :  { %v3710_v7 = vmul.f32 -1.442695, %v1124_v2 }
 0x485   :  { %5939 = vpow2.f32 %v3709_v4 }
 0x486   :  { %5941 = vpow2.f32 %v3710_v7 }
 0x48f   :  { %v5940_v28 = vpop.eup %5939 }
 0x490   :  { %v1121_v11 = vadd.f32 1.0, %v5940_v28  ;;  %v5942_v0 = vpop.eup %5941 }
 0x491   :  { %v1128_v5 = vadd.f32 1.0, %v5942_v0 }
 0x492   :  { %5943 = vrcp.f32 %v1121_v11 }
 0x493   :  { %5945 = vrcp.f32 %v1128_v5 }
 0x49c   :  { %v5944_v17 = vpop.eup %5943 }
 0x49d   :  { %v1132_v23 = vmul.f32 %v5944_v17, %v1131_v14  ;;  %v5946_v62 = vpop.eup %5945 }
 0x49e   :  { %v1135_v19 = vsub.f32 1.0, %v5946_v62  ;;  %v1137_v37 = vmul.f32 %v5946_v62, %v6668_v60 }
 0x49f   :  { %v1133_v25 = vadd.f32 %v1132_v23, %v6561_v32 }
 0x4a1   :  { %5947 = vtanh.f32 %v1133_v25 }
 0x4ab   :  { %v5948_v30 = vpop.eup %5947 }
 0x4ac   :  { %v1136_v16 = vmul.f32 %v5948_v30, %v1135_v19 }
 0x4ae   :  { %v6712_v42 = vadd.f32 %v1137_v37, %v1136_v16 }
 0x4b0   :  { %1208 = vmatmul.mubr.f32.vlgmr.msra.gmra.mrb[8].mxu0 %v6712_v42  ;;  %4300 = vmatmul.mubr.f32.vlgmr.msra.gmra.mrb[32].mxu1 %v6712_v42 }
 0x4b1   :  { %5122 = vmatpush1.bf16.msra.mxu0 %v6377_v13  ;;  %5153 = vmatpush3.bf16.msra.mxu1 %v6459_v21 }
 0x4b2   :  { %5124 = vmatprep.subr.bf16.mxu0 %v6381_v22  ;;  %5154 = vmatprep.subr.bf16.mxu1 %v7379_v59 }
 0x4b3   :  { %1374 = vmatprep.mubr.f32.mxu0 %v7380_v56  ;;  %4334 = vmatprep.mubr.msk.f32.mxu1 %vm6245_vm0, %v7380_v56 }
 0x4b5   :  { %5126 = vmatpush1.bf16.msra.mxu0 %v6383_v26  ;;  %5156 = vmatpush3.bf16.msra.mxu1 %v6466_v27 }
 0x4b6   :  { %5128 = vmatprep.subr.bf16.mxu0 %v6386_v35  ;;  %5157 = vmatprep.subr.bf16.mxu1 %v7379_v59 }
 0x4b9   :  { %5130 = vmatpush1.bf16.msra.mxu0 %v6389_v39  ;;  %5159 = vmatpush3.bf16.msra.mxu1 %v6471_v31 }
 0x4ba   :  { %5132 = vmatprep.subr.bf16.mxu0 %v6392_v44  ;;  %5160 = vmatprep.subr.bf16.mxu1 %v7379_v59 }
 0x4bd   :  { %5134 = vmatpush1.bf16.msra.mxu0 %v6395_v52  ;;  %5162 = vmatpush3.bf16.msra.mxu1 %v6475_v36 }
 0x4be   :  { %5136 = vmatprep.subr.bf16.mxu0 %v6398_v57  ;;  %5163 = vmatprep.subr.bf16.mxu1 %v7379_v59 }
 0x4c1   :  { %5138 = vmatpush1.bf16.msra.mxu0 %v6401_v1  ;;  %5165 = vmatpush3.bf16.msra.mxu1 %v6479_v40 }
 0x4c2   :  { %5140 = vmatprep.subr.bf16.mxu0 %v6404_v6  ;;  %5166 = vmatprep.subr.bf16.mxu1 %v7379_v59 }
 0x4c5   :  { %5142 = vmatpush1.bf16.msra.mxu0 %v6407_v15  ;;  %5168 = vmatpush3.bf16.msra.mxu1 %v6485_v45 }
 0x4c6   :  { %5144 = vmatprep.subr.bf16.mxu0 %v6410_v20  ;;  %5169 = vmatprep.subr.bf16.mxu1 %v7379_v59 }
 0x4c9   :  { %5146 = vmatpush1.bf16.msra.mxu0 %v6413_v29  ;;  %5171 = vmatpush3.bf16.msra.mxu1 %v6489_v49 }
 0x4ca   :  { %5148 = vmatprep.subr.bf16.mxu0 %v6416_v34  ;;  %5172 = vmatprep.subr.bf16.mxu1 %v7379_v59 }
 0x4cd   :  { %5150 = vmatpush1.bf16.msra.mxu0 %v6419_v41  ;;  %5174 = vmatpush3.bf16.msra.mxu1 %v6493_v53 }
 0x4ce   :  { %5176 = vmatprep.subr.bf16.mxu0 %v6375_v9  ;;  %5207 = vmatprep.subr.bf16.mxu1 %v7379_v59 }
 0x583   :  { %v1209_v32 = vpop.f32.mrb[8].mxu0  ;;  %v1280_v47 = vpop.f32.mrb[32].mxu1 }
 0x584   :  { %v1284_v50 = vadd.f32 %v1209_v32, %v6540_v33  ;;  %v1211_v58 = vpop.f32.mrb[9].mxu0  ;;  %v4301_v8 = vpop.f32.mrb[33].mxu1  ;;  %v1298_v14 = vadd.f32 %v6576_v24, %v1280_v47 }
 0x585   :  { %v1291_v2 = vadd.f32 %v1211_v58, %v6542_v38 }
 0x586   :  { %v3711_v4 = vmul.f32 -1.442695, %v1284_v50 }
 0x587   :  { %v3712_v7 = vmul.f32 -1.442695, %v1291_v2 }
 0x588   :  { %5949 = vpow2.f32 %v3711_v4 }
 0x589   :  { %5951 = vpow2.f32 %v3712_v7 }
 0x592   :  { %v5950_v28 = vpop.eup %5949 }
 0x593   :  { %v1288_v11 = vadd.f32 1.0, %v5950_v28  ;;  %v5952_v0 = vpop.eup %5951 }
 0x594   :  { %v1295_v5 = vadd.f32 1.0, %v5952_v0 }
 0x595   :  { %5953 = vrcp.f32 %v1288_v11 }
 0x596   :  { %5955 = vrcp.f32 %v1295_v5 }
 0x59f   :  { %v5954_v17 = vpop.eup %5953 }
 0x5a0   :  { %v1299_v23 = vmul.f32 %v5954_v17, %v1298_v14  ;;  %v5956_v25 = vpop.eup %5955 }
 0x5a1   :  { %v1302_v62 = vsub.f32 1.0, %v5956_v25  ;;  %v1304_v30 = vmul.f32 %v5956_v25, %v6712_v42 }
 0x5a2   :  { %v1300_v33 = vadd.f32 %v1299_v23, %v6567_v54 }
 0x5a4   :  { %5957 = vtanh.f32 %v1300_v33 }
 0x5ae   :  { %v5958_v38 = vpop.eup %5957 }
 0x5af   :  { %v1303_v19 = vmul.f32 %v5958_v38, %v1302_v62  ;;  %v1825_v38 = vld [vmem:[#allocation10 + $0x1b8] sm:$0xff] }
 0x5b1   :  { %v6756_v16 = vadd.f32 %v1304_v30, %v1303_v19  ;;  %v1828_v19 = vld [vmem:[#allocation10 + $0x1d0] sm:$0xff] }
 0x5b3   :  { %1375 = vmatmul.mubr.f32.vlgmr.msra.gmra.mrb[10].mxu0 %v6756_v16  ;;  %4335 = vmatmul.mubr.f32.vlgmr.msra.gmra.mrb[34].mxu1 %v6756_v16 }
 0x5b4   :  { %5178 = vmatpush1.bf16.msra.mxu0 %v6377_v13  ;;  %5209 = vmatpush3.bf16.msra.mxu1 %v6459_v21 }
 0x5b5   :  { %5180 = vmatprep.subr.bf16.mxu0 %v6381_v22  ;;  %5210 = vmatprep.subr.bf16.mxu1 %v7379_v59 }
 0x5b6   :  { %1541 = vmatprep.mubr.f32.mxu0 %v7380_v56  ;;  %4369 = vmatprep.mubr.msk.f32.mxu1 %vm6245_vm0, %v7380_v56 }
 0x5b8   :  { %5182 = vmatpush1.bf16.msra.mxu0 %v6383_v26  ;;  %5212 = vmatpush3.bf16.msra.mxu1 %v6466_v27 }
 0x5b9   :  { %5184 = vmatprep.subr.bf16.mxu0 %v6386_v35  ;;  %5213 = vmatprep.subr.bf16.mxu1 %v7379_v59 }
 0x5bc   :  { %5186 = vmatpush1.bf16.msra.mxu0 %v6389_v39  ;;  %5215 = vmatpush3.bf16.msra.mxu1 %v6471_v31 }
 0x5bd   :  { %5188 = vmatprep.subr.bf16.mxu0 %v6392_v44  ;;  %5216 = vmatprep.subr.bf16.mxu1 %v7379_v59 }
 0x5c0   :  { %5190 = vmatpush1.bf16.msra.mxu0 %v6395_v52  ;;  %5218 = vmatpush3.bf16.msra.mxu1 %v6475_v36 }
 0x5c1   :  { %5192 = vmatprep.subr.bf16.mxu0 %v6398_v57  ;;  %5219 = vmatprep.subr.bf16.mxu1 %v7379_v59 }
 0x5c4   :  { %5194 = vmatpush1.bf16.msra.mxu0 %v6401_v1  ;;  %5221 = vmatpush3.bf16.msra.mxu1 %v6479_v40 }
 0x5c5   :  { %5196 = vmatprep.subr.bf16.mxu0 %v6404_v6  ;;  %5222 = vmatprep.subr.bf16.mxu1 %v7379_v59 }
 0x5c8   :  { %5198 = vmatpush1.bf16.msra.mxu0 %v6407_v15  ;;  %5224 = vmatpush3.bf16.msra.mxu1 %v6485_v45 }
 0x5c9   :  { %5200 = vmatprep.subr.bf16.mxu0 %v6410_v20  ;;  %5225 = vmatprep.subr.bf16.mxu1 %v7379_v59 }
 0x5cc   :  { %5202 = vmatpush1.bf16.msra.mxu0 %v6413_v29  ;;  %5227 = vmatpush3.bf16.msra.mxu1 %v6489_v49 }
 0x5cd   :  { %5204 = vmatprep.subr.bf16.mxu0 %v6416_v34  ;;  %5228 = vmatprep.subr.bf16.mxu1 %v7379_v59 }
 0x5d0   :  { %5206 = vmatpush1.bf16.msra.mxu0 %v6419_v41  ;;  %5230 = vmatpush3.bf16.msra.mxu1 %v6493_v53 }
 0x5d1   :  { %5232 = vmatprep.subr.bf16.mxu0 %v6375_v9  ;;  %5263 = vmatprep.subr.bf16.mxu1 %v7379_v59 }
 0x686   :  { %v1376_v54 = vpop.f32.mrb[10].mxu0  ;;  %v1447_v37 = vpop.f32.mrb[34].mxu1 }
 0x687   :  { %v1451_v32 = vadd.f32 %v1376_v54, %v6544_v43  ;;  %v1378_v47 = vpop.f32.mrb[11].mxu0  ;;  %v4336_v50 = vpop.f32.mrb[35].mxu1  ;;  %v1465_v9 = vadd.f32 %v6576_v24, %v1447_v37  ;;  %v1826_v37 = vld [vmem:[#allocation10 + $0x1c0] sm:$0xff] }
 0x688   :  { %v1458_v58 = vadd.f32 %v1378_v47, %v6546_v48  ;;  %v5291_v50 = vpack.c.bf16 %v1828_v19, %v1825_v38 }
 0x689   :  { %v3713_v8 = vmul.f32 -1.442695, %v1451_v32  ;;  %v1829_v32 = vld [vmem:[#allocation10 + $0x1d8] sm:$0xff] }
 0x68a   :  { %v3714_v2 = vmul.f32 -1.442695, %v1458_v58  ;;  %v1824_v58 = vld [vmem:[#allocation10 + $0x1b0] sm:$0xff] }
 0x68b   :  { %5959 = vpow2.f32 %v3713_v8  ;;  %v1827_v8 = vld [vmem:[#allocation10 + $0x1c8] sm:$0xff] }
 0x68c   :  { %5961 = vpow2.f32 %v3714_v2  ;;  %v5323_v2 = vpack.c.bf16 %v1829_v32, %v1826_v37  ;;  %v1861_v37 = vld [vmem:[#allocation10 + $0x2d8] sm:$0xff]  ;;  %v1864_v32 = vld [vmem:[#allocation10 + $0x2f0] sm:$0xff] }
 0x695   :  { %v5960_v4 = vpop.eup %5959 }
 0x696   :  { %v1455_v7 = vadd.f32 1.0, %v5960_v4  ;;  %v5962_v28 = vpop.eup %5961  ;;  %v1834_v4 = vld [vmem:[#allocation10 + $0x200] sm:$0xff] }
 0x697   :  { %v1462_v11 = vadd.f32 1.0, %v5962_v28  ;;  %v1835_v28 = vld [vmem:[#allocation10 + $0x208] sm:$0xff] }
 0x698   :  { %5963 = vrcp.f32 %v1455_v7  ;;  %v1832_v7 = vld [vmem:[#allocation10 + $0x1f0] sm:$0xff] }
 0x699   :  { %5965 = vrcp.f32 %v1462_v11  ;;  %v5293_v11 = vpack.c.bf16 %v1827_v8, %v1824_v58  ;;  %v5315_v8 = vpack.c.bf16 %v1864_v32, %v1861_v37  ;;  %v2169_v37 = vld [vmem:[#allocation11 + $0x2d0] sm:$0xff]  ;;  %v2172_v32 = vld [vmem:[#allocation11 + $0x2e8] sm:$0xff] }
 0x6a2   :  { %v5964_v0 = vpop.eup %5963 }
 0x6a3   :  { %v1466_v5 = vmul.f32 %v5964_v0, %v1465_v9  ;;  %v5966_v14 = vpop.eup %5965  ;;  %v5327_v0 = vpack.c.bf16 %v1835_v28, %v1832_v7  ;;  %v2127_v28 = vld [vmem:[#allocation11 + $0x180] sm:$0xff] }
 0x6a4   :  { %v1469_v17 = vsub.f32 1.0, %v5966_v14  ;;  %v1471_v33 = vmul.f32 %v5966_v14, %v6756_v16  ;;  %v1837_v14 = vld [vmem:[#allocation10 + $0x218] sm:$0xff] }
 0x6a5   :  { %v1467_v43 = vadd.f32 %v1466_v5, %v6565_v46  ;;  %v1821_v46 = vld [vmem:[#allocation10 + $0x198] sm:$0xff]  ;;  %v1830_v5 = vld [vmem:[#allocation10 + $0x1e0] sm:$0xff] }
 0x6a7   :  { %5967 = vtanh.f32 %v1467_v43  ;;  %v1833_v43 = vld [vmem:[#allocation10 + $0x1f8] sm:$0xff] }
 0x6b1   :  { %v5968_v48 = vpop.eup %5967 }
 0x6b2   :  { %v1470_v23 = vmul.f32 %v5968_v48, %v1469_v17  ;;  %v1840_v17 = vld [vmem:[#allocation10 + $0x230] sm:$0xff]  ;;  %v1838_v48 = vld [vmem:[#allocation10 + $0x220] sm:$0xff] }
 0x6b4   :  { %v6800_v25 = vadd.f32 %v1471_v33, %v1470_v23  ;;  %v1841_v23 = vld [vmem:[#allocation10 + $0x238] sm:$0xff]  ;;  %v5297_v33 = vpack.c.bf16 %v1833_v43, %v1830_v5  ;;  %v2136_v5 = vld [vmem:[#allocation11 + $0x1c8] sm:$0xff] }
 0x6b6   :  { %1542 = vmatmul.mubr.f32.vlgmr.msra.gmra.mrb[12].mxu0 %v6800_v25  ;;  %4370 = vmatmul.mubr.f32.vlgmr.msra.gmra.mrb[36].mxu1 %v6800_v25 }
 0x6b7   :  { %5234 = vmatpush1.bf16.msra.mxu0 %v6377_v13  ;;  %5265 = vmatpush3.bf16.msra.mxu1 %v6459_v21  ;;  %v1819_v13 = vld [vmem:[#allocation10 + $0x188] sm:$0xff] }
 0x6b8   :  { %5236 = vmatprep.subr.bf16.mxu0 %v6381_v22  ;;  %5266 = vmatprep.subr.bf16.mxu1 %v7379_v59  ;;  %v1822_v22 = vld [vmem:[#allocation10 + $0x1a0] sm:$0xff] }
 0x6b9   :  { %1708 = vmatprep.mubr.f32.mxu0 %v7380_v56  ;;  %4404 = vmatprep.mubr.msk.f32.mxu1 %vm6245_vm0, %v7380_v56 }
 0x6bb   :  { %5238 = vmatpush1.bf16.msra.mxu0 %v6383_v26  ;;  %5268 = vmatpush3.bf16.msra.mxu1 %v6466_v27  ;;  %v1820_v26 = vld [vmem:[#allocation10 + $0x190] sm:$0xff] }
 0x6bc   :  { %5240 = vmatprep.subr.bf16.mxu0 %v6386_v35  ;;  %5269 = vmatprep.subr.bf16.mxu1 %v7379_v59  ;;  %v5287_v35 = vpack.c.bf16 %v1822_v22, %v1819_v13  ;;  %v5299_v13 = vpack.c.bf16 %v1840_v17, %v1837_v14  ;;  %v5331_v22 = vpack.c.bf16 %v1841_v23, %v1838_v48  ;;  %v2140_v14 = vld [vmem:[#allocation11 + $0x1e8] sm:$0xff]  ;;  %v2143_v17 = vld [vmem:[#allocation11 + $0x200] sm:$0xff] }
 0x6bd   :  { %v6881_v48 = vpack.c.bf16 %v2143_v17, %v2140_v14  ;;  %v2139_v23 = vld [vmem:[#allocation11 + $0x1e0] sm:$0xff]  ;;  %v2165_v14 = vld [vmem:[#allocation11 + $0x2b0] sm:$0xff]  ;;  %v2168_v17 = vld [vmem:[#allocation11 + $0x2c8] sm:$0xff] }
 0x6bf   :  { %5242 = vmatpush1.bf16.msra.mxu0 %v6389_v39  ;;  %5271 = vmatpush3.bf16.msra.mxu1 %v6471_v31  ;;  %v1823_v39 = vld [vmem:[#allocation10 + $0x1a8] sm:$0xff] }
 0x6c0   :  { %5244 = vmatprep.subr.bf16.mxu0 %v6392_v44  ;;  %5272 = vmatprep.subr.bf16.mxu1 %v7379_v59  ;;  %v5319_v44 = vpack.c.bf16 %v1823_v39, %v1820_v26  ;;  %v1836_v26 = vld [vmem:[#allocation10 + $0x210] sm:$0xff]  ;;  %v1843_v39 = vld [vmem:[#allocation10 + $0x248] sm:$0xff] }
 0x6c3   :  { %5246 = vmatpush1.bf16.msra.mxu0 %v6395_v52  ;;  %5274 = vmatpush3.bf16.msra.mxu1 %v6475_v36 }
 0x6c4   :  { %5248 = vmatprep.subr.bf16.mxu0 %v6398_v57  ;;  %5275 = vmatprep.subr.bf16.mxu1 %v7379_v59 }
 0x6c7   :  { %5250 = vmatpush1.bf16.msra.mxu0 %v6401_v1  ;;  %5277 = vmatpush3.bf16.msra.mxu1 %v6479_v40 }
 0x6c8   :  { %5252 = vmatprep.subr.bf16.mxu0 %v6404_v6  ;;  %5278 = vmatprep.subr.bf16.mxu1 %v7379_v59 }
 0x6cb   :  { %5254 = vmatpush1.bf16.msra.mxu0 %v6407_v15  ;;  %5280 = vmatpush3.bf16.msra.mxu1 %v6485_v45 }
 0x6cc   :  { %5256 = vmatprep.subr.bf16.mxu0 %v6410_v20  ;;  %5281 = vmatprep.subr.bf16.mxu1 %v7379_v59 }
 0x6cf   :  { %5258 = vmatpush1.bf16.msra.mxu0 %v6413_v29  ;;  %5283 = vmatpush3.bf16.msra.mxu1 %v6489_v49 }
 0x6d0   :  { %5260 = vmatprep.subr.bf16.mxu0 %v6416_v34  ;;  %5284 = vmatprep.subr.bf16.mxu1 %v7379_v59 }
 0x6d3   :  { %5262 = vmatpush1.bf16.msra.mxu0 %v6419_v41  ;;  %5286 = vmatpush3.bf16.msra.mxu1 %v6493_v53 }
 0x6d4   :  { %5288 = vmatprep.subr.bf16.mxu0 %v5287_v35  ;;  %5320 = vmatprep.subr.bf16.mxu1 %v5319_v44  ;;  %v1839_v35 = vld [vmem:[#allocation10 + $0x228] sm:$0xff] }
 0x789   :  { %v1543_v52 = vpop.f32.mrb[12].mxu0  ;;  %v1614_v57 = vpop.f32.mrb[36].mxu1 }
 0x78a   :  { %v1618_v1 = vadd.f32 %v1543_v52, %v6548_v51  ;;  %v1545_v6 = vpop.f32.mrb[13].mxu0  ;;  %v4371_v15 = vpop.f32.mrb[37].mxu1  ;;  %v1632_v36 = vadd.f32 %v6576_v24, %v1614_v57  ;;  %v1844_v52 = vld [vmem:[#allocation10 + $0x250] sm:$0xff]  ;;  %v1847_v57 = vld [vmem:[#allocation10 + $0x268] sm:$0xff] }
 0x78b   :  { %v1625_v20 = vadd.f32 %v1545_v6, %v6551_v63  ;;  %v1818_v63 = vld [vmem:[#allocation10 + $0x180] sm:$0xff]  ;;  %v5335_v15 = vpack.c.bf16 %v1847_v57, %v1844_v52  ;;  %v2152_v57 = vld [vmem:[#allocation11 + $0x248] sm:$0xff] }
 0x78c   :  { %v3715_v29 = vmul.f32 -1.442695, %v1618_v1  ;;  %v5289_v47 = vpack.c.bf16 %v1821_v46, %v1818_v63  ;;  %v5301_v1 = vpack.c.bf16 %v1839_v35, %v1836_v26  ;;  %v1856_v63 = vld [vmem:[#allocation10 + $0x2b0] sm:$0xff]  ;;  %v1859_v46 = vld [vmem:[#allocation10 + $0x2c8] sm:$0xff] }
 0x78d   :  { %v3716_v34 = vmul.f32 -1.442695, %v1625_v20  ;;  %v1842_v20 = vld [vmem:[#allocation10 + $0x240] sm:$0xff]  ;;  %v5343_v19 = vpack.c.bf16 %v1859_v46, %v1856_v63  ;;  %v2149_v26 = vld [vmem:[#allocation11 + $0x230] sm:$0xff]  ;;  %v2132_v46 = vld [vmem:[#allocation11 + $0x1a8] sm:$0xff] }
 0x78e   :  { %5969 = vpow2.f32 %v3715_v29  ;;  %v1845_v29 = vld [vmem:[#allocation10 + $0x258] sm:$0xff]  ;;  %v2129_v63 = vld [vmem:[#allocation11 + $0x190] sm:$0xff] }
 0x78f   :  { %5971 = vpow2.f32 %v3716_v34  ;;  %v1849_v34 = vld [vmem:[#allocation10 + $0x278] sm:$0xff] }
 0x798   :  { %v5970_v41 = vpop.eup %5969 }
 0x799   :  { %v1622_v21 = vadd.f32 1.0, %v5970_v41  ;;  %v5972_v27 = vpop.eup %5971  ;;  %v1852_v41 = vld [vmem:[#allocation10 + $0x290] sm:$0xff] }
 0x79a   :  { %v1629_v31 = vadd.f32 1.0, %v5972_v27  ;;  %v1853_v27 = vld [vmem:[#allocation10 + $0x298] sm:$0xff] }
 0x79b   :  { %5973 = vrcp.f32 %v1622_v21  ;;  %v1850_v21 = vld [vmem:[#allocation10 + $0x280] sm:$0xff] }
 0x79c   :  { %5975 = vrcp.f32 %v1629_v31  ;;  %v5305_v31 = vpack.c.bf16 %v1845_v29, %v1842_v20  ;;  %v2154_v20 = vld [vmem:[#allocation11 + $0x258] sm:$0xff] }
 0x7a5   :  { %v5974_v40 = vpop.eup %5973 }
 0x7a6   :  { %v1633_v45 = vmul.f32 %v5974_v40, %v1632_v36  ;;  %v5976_v53 = vpop.eup %5975  ;;  %v5307_v36 = vpack.c.bf16 %v1852_v41, %v1849_v34  ;;  %v5339_v40 = vpack.c.bf16 %v1853_v27, %v1850_v21  ;;  %v2158_v34 = vld [vmem:[#allocation11 + $0x278] sm:$0xff]  ;;  %v2161_v41 = vld [vmem:[#allocation11 + $0x290] sm:$0xff] }
 0x7a7   :  { %v1636_v51 = vsub.f32 1.0, %v5976_v53  ;;  %v1638_v54 = vmul.f32 %v5976_v53, %v6800_v25  ;;  %v1855_v53 = vld [vmem:[#allocation10 + $0x2a8] sm:$0xff]  ;;  %v6899_v21 = vpack.c.bf16 %v2161_v41, %v2158_v34  ;;  %v2157_v27 = vld [vmem:[#allocation11 + $0x270] sm:$0xff] }
 0x7a8   :  { %v1634_v49 = vadd.f32 %v1633_v45, %v6571_v12  ;;  %v1831_v12 = vld [vmem:[#allocation10 + $0x1e8] sm:$0xff]  ;;  %v1848_v45 = vld [vmem:[#allocation10 + $0x270] sm:$0xff] }
 0x7a9   :  { %v5295_v9 = vpack.c.bf16 %v1834_v4, %v1831_v12  ;;  %v1863_v4 = vld [vmem:[#allocation10 + $0x2e8] sm:$0xff] }
 0x7aa   :  { %5977 = vtanh.f32 %v1634_v49  ;;  %v1851_v49 = vld [vmem:[#allocation10 + $0x288] sm:$0xff] }
 0x7b4   :  { %v5978_v62 = vpop.eup %5977 }
 0x7b5   :  { %v1637_v30 = vmul.f32 %v5978_v62, %v1636_v51  ;;  %v1858_v51 = vld [vmem:[#allocation10 + $0x2c0] sm:$0xff]  ;;  %v5309_v62 = vpack.c.bf16 %v1851_v49, %v1848_v45 }
 0x7b6   :  { %v5311_v38 = vpack.c.bf16 %v1858_v51, %v1855_v53  ;;  %v2167_v45 = vld [vmem:[#allocation11 + $0x2c0] sm:$0xff]  ;;  %v2166_v51 = vld [vmem:[#allocation11 + $0x2b8] sm:$0xff] }
 0x7b7   :  { %v6842_v24 = vadd.f32 %v1638_v54, %v1637_v30  ;;  %v1854_v30 = vld [vmem:[#allocation10 + $0x2a0] sm:$0xff]  ;;  %v1857_v54 = vld [vmem:[#allocation10 + $0x2b8] sm:$0xff] }
 0x7b8   :  { %v5313_v58 = vpack.c.bf16 %v1857_v54, %v1854_v30  ;;  %v2163_v49 = vld [vmem:[#allocation11 + $0x2a0] sm:$0xff]  ;;  %v2173_v30 = vld [vmem:[#allocation11 + $0x2f0] sm:$0xff] }
 0x7b9   :  { %1709 = vmatmul.mubr.f32.vlgmr.msra.gmra.mrb[14].mxu0 %v6842_v24  ;;  %4405 = vmatmul.mubr.f32.vlgmr.msra.gmra.mrb[38].mxu1 %v6842_v24 }
 0x7ba   :  { %5290 = vmatpush1.bf16.msra.mxu0 %v5289_v47  ;;  %5322 = vmatpush3.bf16.msra.mxu1 %v5319_v44  ;;  %v1846_v44 = vld [vmem:[#allocation10 + $0x260] sm:$0xff] }
 0x7bb   :  { %4439 = vmatprep.mubr.f32.mxu1 %v6580_v55  ;;  %5292 = vmatprep.subr.bf16.mxu0 %v5291_v50  ;;  %v5303_v6 = vpack.c.bf16 %v1846_v44, %v1843_v39  ;;  %v1862_v47 = vld [vmem:[#allocation10 + $0x2e0] sm:$0xff]  ;;  %v1865_v50 = vld [vmem:[#allocation10 + $0x2f8] sm:$0xff]  ;;  %v2145_v39 = vld [vmem:[#allocation11 + $0x210] sm:$0xff] }
 0x7bc   :  { %5324 = vmatprep.subr.bf16.mxu1 %v5323_v2  ;;  %1948 = vmatprep.mubr.f32.mxu0 %v7380_v56  ;;  %v5347_v12 = vpack.c.bf16 %v1865_v50, %v1862_v47  ;;  %v2148_v44 = vld [vmem:[#allocation11 + $0x228] sm:$0xff]  ;;  %v6918_v47 = vpack.c.bf16 %v2172_v32, %v2169_v37  ;;  %v2135_v50 = vld [vmem:[#allocation11 + $0x1c0] sm:$0xff] }
 0x7bd   :  { %v6889_v52 = vpack.c.bf16 %v2148_v44, %v2145_v39 }
 0x7be   :  { %5294 = vmatpush1.bf16.msra.mxu0 %v5293_v11  ;;  %5326 = vmatpush3.bf16.msra.mxu1 %v5323_v2  ;;  %v1860_v2 = vld [vmem:[#allocation10 + $0x2d0] sm:$0xff] }
 0x7bf   :  { %5296 = vmatprep.subr.bf16.mxu0 %v5295_v9  ;;  %5328 = vmatprep.subr.bf16.mxu1 %v5327_v0  ;;  %v5317_v7 = vpack.c.bf16 %v1863_v4, %v1860_v2  ;;  %v2144_v2 = vld [vmem:[#allocation11 + $0x208] sm:$0xff]  ;;  %v2147_v4 = vld [vmem:[#allocation11 + $0x220] sm:$0xff] }
 0x7c2   :  { %5298 = vmatpush1.bf16.msra.mxu0 %v5297_v33  ;;  %5330 = vmatpush3.bf16.msra.mxu1 %v5327_v0  ;;  %v2133_v0 = vld [vmem:[#allocation11 + $0x1b0] sm:$0xff]  ;;  %v2142_v33 = vld [vmem:[#allocation11 + $0x1f8] sm:$0xff] }
 0x7c3   :  { %5300 = vmatprep.subr.bf16.mxu0 %v5299_v13  ;;  %5332 = vmatprep.subr.bf16.mxu1 %v5331_v22  ;;  %v6877_v43 = vpack.c.bf16 %v2136_v5, %v2133_v0  ;;  %v6883_v13 = vpack.c.bf16 %v2142_v33, %v2139_v23  ;;  %v2162_v0 = vld [vmem:[#allocation11 + $0x298] sm:$0xff]  ;;  %v6941_v23 = vpack.c.bf16 %v2168_v17, %v2165_v14  ;;  %v2171_v33 = vld [vmem:[#allocation11 + $0x2e0] sm:$0xff] }
 0x7c6   :  { %5302 = vmatpush1.bf16.msra.mxu0 %v5301_v1  ;;  %5334 = vmatpush3.bf16.msra.mxu1 %v5331_v22  ;;  %v2146_v22 = vld [vmem:[#allocation11 + $0x218] sm:$0xff]  ;;  %v2155_v1 = vld [vmem:[#allocation11 + $0x260] sm:$0xff] }
 0x7c7   :  { %5304 = vmatprep.subr.bf16.mxu0 %v5303_v6  ;;  %5336 = vmatprep.subr.bf16.mxu1 %v5335_v15  ;;  %v6887_v35 = vpack.c.bf16 %v2149_v26, %v2146_v22  ;;  %v6893_v6 = vpack.c.bf16 %v2155_v1, %v2152_v57  ;;  %v2174_v22 = vld [vmem:[#allocation11 + $0x2f8] sm:$0xff] }
 0x7c8   :  { %v6945_v26 = vpack.c.bf16 %v2174_v22, %v2171_v33 }
 0x7ca   :  { %5306 = vmatpush1.bf16.msra.mxu0 %v5305_v31  ;;  %5338 = vmatpush3.bf16.msra.mxu1 %v5335_v15  ;;  %v2151_v15 = vld [vmem:[#allocation11 + $0x240] sm:$0xff]  ;;  %v2160_v31 = vld [vmem:[#allocation11 + $0x288] sm:$0xff] }
 0x7cb   :  { %5308 = vmatprep.subr.bf16.mxu0 %v5307_v36  ;;  %5340 = vmatprep.subr.bf16.mxu1 %v5339_v40  ;;  %v6895_v29 = vpack.c.bf16 %v2154_v20, %v2151_v15  ;;  %v6901_v36 = vpack.c.bf16 %v2160_v31, %v2157_v27 }
 0x7ce   :  { %5310 = vmatpush1.bf16.msra.mxu0 %v5309_v62  ;;  %5342 = vmatpush3.bf16.msra.mxu1 %v5339_v40  ;;  %v2164_v40 = vld [vmem:[#allocation11 + $0x2a8] sm:$0xff]  ;;  %v6907_v62 = vpack.c.bf16 %v2166_v51, %v2163_v49  ;;  %v6069_v49 = vld [vmem:[%s7364_s5] ss:$0 sm:$0xff] }
 0x7cf   :  { %5312 = vmatprep.subr.bf16.mxu0 %v5311_v38  ;;  %5344 = vmatprep.subr.bf16.mxu1 %v5343_v19  ;;  %v6905_v53 = vpack.c.bf16 %v2167_v45, %v2164_v40  ;;  %v6909_v38 = vpack.c.bf16 %v2132_v46, %v2129_v63 }
 0x7d2   :  { %5314 = vmatpush1.bf16.msra.mxu0 %v5313_v58  ;;  %5346 = vmatpush3.bf16.msra.mxu1 %v5343_v19  ;;  %v2170_v19 = vld [vmem:[#allocation11 + $0x2d8] sm:$0xff] }
 0x7d3   :  { %5316 = vmatprep.subr.bf16.mxu0 %v5315_v8  ;;  %5348 = vmatprep.subr.bf16.mxu1 %v5347_v12  ;;  %v6912_v54 = vpack.c.bf16 %v2173_v30, %v2170_v19  ;;  %v2138_v58 = vld [vmem:[#allocation11 + $0x1d8] sm:$0xff] }
 0x7d4   :  { %v6920_v8 = vpack.c.bf16 %v2138_v58, %v2135_v50 }
 0x7d6   :  { %5318 = vmatpush1.bf16.msra.mxu0 %v5317_v7  ;;  %5350 = vmatpush3.bf16.msra.mxu1 %v5347_v12  ;;  %v2141_v12 = vld [vmem:[#allocation11 + $0x1f0] sm:$0xff] }
 0x7d7   :  { %5383 = vmatprep.subr.bf16.mxu1 %v7379_v59  ;;  %v6926_v7 = vpack.c.bf16 %v2144_v2, %v2141_v12 }
 0x7d9   :  { %1949 = vmatmul.mubr.f32.vlgmr.msra.gmra.mrb[16].mxu0 %v6580_v55  ;;  %4440 = vmatmul.mubr.f32.vlgmr.msra.gmra.mrb[40].mxu1 %v6624_v18  ;;  %v2128_v55 = vld [vmem:[#allocation11 + $0x188] sm:$0xff] }
 0x7da   :  { %4442 = vmatprep.mubr.f32.mxu1 %v6668_v60  ;;  %1954 = vmatprep.mubr.f32.mxu0 %v7380_v56 }
 0x7db   :  { %5385 = vmatpush3.bf16.msra.mxu1 %v6909_v38 }
 0x7dc   :  { %5386 = vmatprep.subr.bf16.mxu1 %v7379_v59 }
 0x7dd   :  { %1955 = vmatmul.mubr.f32.gmra.mrb[18].mxu0 %v6624_v18  ;;  %4443 = vmatmul.mubr.f32.gmra.mrb[42].mxu1 %v6712_v42  ;;  %v2131_v18 = vld [vmem:[#allocation11 + $0x1a0] sm:$0xff] }
 0x7de   :  { %4445 = vmatprep.mubr.f32.mxu1 %v6756_v16  ;;  %1960 = vmatprep.mubr.f32.mxu0 %v7380_v56 }
 0x7df   :  { %5388 = vmatpush3.bf16.msra.mxu1 %v6920_v8 }
 0x7e0   :  { %5389 = vmatprep.subr.bf16.mxu1 %v7379_v59 }
 0x7e1   :  { %1961 = vmatmul.mubr.f32.gmra.mrb[20].mxu0 %v6668_v60  ;;  %4446 = vmatmul.mubr.f32.gmra.mrb[44].mxu1 %v6800_v25  ;;  %v6869_v60 = vpack.c.bf16 %v2131_v18, %v2128_v55  ;;  %v2150_v55 = vld [vmem:[#allocation11 + $0x238] sm:$0xff] }
 0x7e2   :  { %4448 = vmatprep.mubr.f32.mxu1 %v6842_v24  ;;  %1966 = vmatprep.mubr.f32.mxu0 %v7380_v56  ;;  %v6929_v18 = vpack.c.bf16 %v2150_v55, %v2147_v4 }
 0x7e3   :  { %5352 = vmatprep.subr.bf16.mxu0 %v6869_v60  ;;  %5391 = vmatpush3.bf16.msra.mxu1 %v6926_v7 }
 0x7e4   :  { %5392 = vmatprep.subr.bf16.mxu1 %v7379_v59 }
 0x7e5   :  { %1967 = vmatmul.mubr.f32.gmra.mrb[22].mxu0 %v6712_v42  ;;  %v2130_v42 = vld [vmem:[#allocation11 + $0x198] sm:$0xff] }
 0x7e6   :  { %1972 = vmatprep.mubr.f32.mxu0 %v7380_v56  ;;  %v6871_v11 = vpack.c.bf16 %v2130_v42, %v2127_v28  ;;  %v2153_v28 = vld [vmem:[#allocation11 + $0x250] sm:$0xff]  ;;  %v2156_v42 = vld [vmem:[#allocation11 + $0x268] sm:$0xff] }
 0x7e7   :  { %5394 = vmatpush3.bf16.msra.mxu1 %v6929_v18 }
 0x7e8   :  { %5354 = vmatpush1.bf16.msra.mxu0 %v6871_v11  ;;  %5395 = vmatprep.subr.bf16.mxu1 %v7379_v59 }
 0x7e9   :  { %1973 = vmatmul.mubr.f32.gmra.mrb[24].mxu0 %v6756_v16  ;;  %v2134_v16 = vld [vmem:[#allocation11 + $0x1b8] sm:$0xff] }
 0x7ea   :  { %1978 = vmatprep.mubr.f32.mxu0 %v7380_v56 }
 0x7ed   :  { %1979 = vmatmul.mubr.f32.gmra.mrb[26].mxu0 %v6800_v25  ;;  %v2137_v25 = vld [vmem:[#allocation11 + $0x1d0] sm:$0xff] }
 0x7ee   :  { %1984 = vmatprep.mubr.f32.mxu0 %v7380_v56  ;;  %v6875_v9 = vpack.c.bf16 %v2137_v25, %v2134_v16  ;;  %v6933_v16 = vpack.c.bf16 %v2156_v42, %v2153_v28  ;;  %v2159_v25 = vld [vmem:[#allocation11 + $0x280] sm:$0xff]  ;;  %v6970_v28 = vld [vmem:[#allocation8 + $0x8] sm:$0xff] }
 0x7ef   :  { %v6937_v5 = vpack.c.bf16 %v2162_v0, %v2159_v25  ;;  %v7381_v0 = vld [vmem:[#allocation22_spill] sm:$0xff] }
 0x7f0   :  { %5356 = vmatprep.subr.bf16.mxu0 %v6875_v9  ;;  %5397 = vmatpush3.bf16.msra.mxu1 %v6933_v16  ;;  %v7382_v14 = vsub.s32 0, %v7381_v0  ;;  %v7383_v22 = vsub.s32 1, %v7381_v0 }
 0x7f1   :  { %1985 = vmatmul.mubr.f32.gmra.mrb[28].mxu0 %v6842_v24  ;;  %5398 = vmatprep.subr.bf16.mxu1 %v7379_v59 }
 0x7f2   :  { %1990 = vmatprep.mubr.f32.mxu0 %v7380_v56  ;;  %5358 = vmatpush1.bf16.msra.mxu0 %v6877_v43 }
 0x7f3   :  { %5360 = vmatprep.subr.bf16.mxu0 %v6881_v48 }
 0x7f4   :  { %5400 = vmatpush3.bf16.msra.mxu1 %v6937_v5 }
 0x7f5   :  { %5401 = vmatprep.subr.bf16.mxu1 %v7379_v59 }
 0x7f6   :  { %5362 = vmatpush1.bf16.msra.mxu0 %v6883_v13 }
 0x7f7   :  { %5364 = vmatprep.subr.bf16.mxu0 %v6887_v35 }
 0x7f8   :  { %5403 = vmatpush3.bf16.msra.mxu1 %v6941_v23 }
 0x7f9   :  { %5404 = vmatprep.subr.bf16.mxu1 %v7379_v59 }
 0x7fa   :  { %5366 = vmatpush1.bf16.msra.mxu0 %v6889_v52 }
 0x7fb   :  { %5368 = vmatprep.subr.bf16.mxu0 %v6893_v6 }
 0x7fc   :  { %5406 = vmatpush3.bf16.msra.mxu1 %v6945_v26 }
 0x7fd   :  { %5439 = vmatprep.subr.bf16.mxu1 %v7379_v59 }
 0x7fe   :  { %5370 = vmatpush1.bf16.msra.mxu0 %v6895_v29 }
 0x7ff   :  { %5372 = vmatprep.subr.bf16.mxu0 %v6899_v21 }
 0x802   :  { %5374 = vmatpush1.bf16.msra.mxu0 %v6901_v36 }
 0x803   :  { %5376 = vmatprep.subr.bf16.mxu0 %v6905_v53 }
 0x806   :  { %5378 = vmatpush1.bf16.msra.mxu0 %v6907_v62 }
 0x807   :  { %5380 = vmatprep.subr.bf16.mxu0 %v6912_v54 }
 0x80a   :  { %5382 = vmatpush1.bf16.msra.mxu0 %v6918_v47 }
 0x80b   :  { %5408 = vmatprep.subr.bf16.mxu0 %v6869_v60 }
 0x88c   :  { %v1710_v39 = vpop.f32.mrb[14].mxu0  ;;  %v1781_v44 = vpop.f32.mrb[38].mxu1 }
 0x88d   :  { %v1785_v57 = vadd.f32 %v1710_v39, %v6553_v3  ;;  %v1712_v1 = vpop.f32.mrb[15].mxu0  ;;  %v4406_v15 = vpop.f32.mrb[39].mxu1  ;;  %v1799_v51 = vadd.f32 %v6069_v49, %v1781_v44  ;;  %v7384_v49 = vsub.s32 2, %v7381_v0 }
 0x88e   :  { %v1792_v20 = vadd.f32 %v1712_v1, %v6557_v10 }
 0x88f   :  { %v3717_v34 = vmul.f32 -1.442695, %v1785_v57 }
 0x890   :  { %v3718_v41 = vmul.f32 -1.442695, %v1792_v20 }
 0x891   :  { %5979 = vpow2.f32 %v3717_v34 }
 0x892   :  { %5981 = vpow2.f32 %v3718_v41 }
 0x89b   :  { %v5980_v27 = vpop.eup %5979 }
 0x89c   :  { %v1789_v31 = vadd.f32 1.0, %v5980_v27  ;;  %v5982_v40 = vpop.eup %5981 }
 0x89d   :  { %v1796_v45 = vadd.f32 1.0, %v5982_v40 }
 0x89e   :  { %5983 = vrcp.f32 %v1789_v31 }
 0x89f   :  { %5985 = vrcp.f32 %v1796_v45  ;;  %v7031_v45 = vld [vmem:[%s7364_s5 + $0x1] ss:$0 sm:$0xff] }
 0x8a8   :  { %v5984_v63 = vpop.eup %5983 }
 0x8a9   :  { %v1800_v3 = vmul.f32 %v5984_v63, %v1799_v51  ;;  %v5986_v32 = vpop.eup %5985 }
 0x8aa   :  { %v1803_v12 = vsub.f32 1.0, %v5986_v32  ;;  %v1805_v55 = vmul.f32 %v5986_v32, %v6842_v24  ;;  %v3719_v24 = vld [vmem:[%s7362_s3 + $0x3] sm:$0x7] }
 0x8ab   :  { %v1801_v46 = vadd.f32 %v1800_v3, %v6569_v61  ;;  %v7020_v17 = vrot.slane %v3719_v24, %v7382_v14  ;;  %v7024_v39 = vrot.slane %v3719_v24, %v7383_v22  ;;  %v7035_v51 = vrot.slane %v3719_v24, %v7384_v49 }
 0x8ac   :  { %v6956_v10 = vpop.f32.mrb[40].mxu1 }
 0x8ad   :  { %5987 = vtanh.f32 %v1801_v46  ;;  %v6958_v19 = vpop.f32.mrb[41].mxu1  ;;  %v2069_v49 = vadd.f32 %v6956_v10, %v7035_v51 }
 0x8ae   :  { %v2064_v32 = vadd.f32 %v6958_v19, %v7035_v51 }
 0x8b0   :  { %v6960_v30 = vpop.f32.mrb[42].mxu1 }
 0x8b1   :  { %v6962_v37 = vpop.f32.mrb[43].mxu1 }
 0x8b4   :  { %v6964_v50 = vpop.f32.mrb[44].mxu1 }
 0x8b5   :  { %v6966_v58 = vpop.f32.mrb[45].mxu1 }
 0x8b7   :  { %v5988_v2 = vpop.eup %5987 }
 0x8b8   :  { %v1804_v4 = vmul.f32 %v5988_v2, %v1803_v12 }
 0x8ba   :  { %v1806_v61 = vadd.f32 %v1805_v55, %v1804_v4 }
 0x8bc   :  { %1991 = vmatmul.mubr.f32.gmra.mrb[30].mxu0 %v1806_v61  ;;  %1808 = vst [vmem:[#allocation15] sm:$0xff] %v1806_v61  ;;  %4449 = vmatmul.mubr.f32.gmra.mrb[46].mxu1 %v1806_v61 }
 0x8bd   :  { %2246 = vmatprep.mubr.f32.mxu0 %v7380_v56  ;;  %4483 = vmatprep.mubr.msk.f32.mxu1 %vm6245_vm0, %v7380_v56 }
 0x8c0   :  { %2247 = vmatmul.mubr.f32.vlgmr.msra.gmra.mrb[16].mxu0 %v6970_v28  ;;  %4484 = vmatmul.mubr.f32.vlgmr.msra.gmra.mrb[48].mxu1 %v6970_v28 }
 0x8c1   :  { %5410 = vmatpush1.bf16.msra.mxu0 %v6871_v11  ;;  %5441 = vmatpush3.bf16.msra.mxu1 %v6909_v38 }
 0x8c2   :  { %5412 = vmatprep.subr.bf16.mxu0 %v6875_v9  ;;  %5442 = vmatprep.subr.bf16.mxu1 %v7379_v59 }
 0x8c3   :  { %2419 = vmatprep.mubr.f32.mxu0 %v7380_v56  ;;  %4518 = vmatprep.mubr.msk.f32.mxu1 %vm6245_vm0, %v7380_v56 }
 0x8c5   :  { %5414 = vmatpush1.bf16.msra.mxu0 %v6877_v43  ;;  %5444 = vmatpush3.bf16.msra.mxu1 %v6920_v8 }
 0x8c6   :  { %5416 = vmatprep.subr.bf16.mxu0 %v6881_v48  ;;  %5445 = vmatprep.subr.bf16.mxu1 %v7379_v59 }
 0x8c9   :  { %5418 = vmatpush1.bf16.msra.mxu0 %v6883_v13  ;;  %5447 = vmatpush3.bf16.msra.mxu1 %v6926_v7 }
 0x8ca   :  { %5420 = vmatprep.subr.bf16.mxu0 %v6887_v35  ;;  %5448 = vmatprep.subr.bf16.mxu1 %v7379_v59 }
 0x8cd   :  { %5422 = vmatpush1.bf16.msra.mxu0 %v6889_v52  ;;  %5450 = vmatpush3.bf16.msra.mxu1 %v6929_v18 }
 0x8ce   :  { %5424 = vmatprep.subr.bf16.mxu0 %v6893_v6  ;;  %5451 = vmatprep.subr.bf16.mxu1 %v7379_v59 }
 0x8d1   :  { %5426 = vmatpush1.bf16.msra.mxu0 %v6895_v29  ;;  %5453 = vmatpush3.bf16.msra.mxu1 %v6933_v16 }
 0x8d2   :  { %5428 = vmatprep.subr.bf16.mxu0 %v6899_v21  ;;  %5454 = vmatprep.subr.bf16.mxu1 %v7379_v59 }
 0x8d5   :  { %5430 = vmatpush1.bf16.msra.mxu0 %v6901_v36  ;;  %5456 = vmatpush3.bf16.msra.mxu1 %v6937_v5 }
 0x8d6   :  { %5432 = vmatprep.subr.bf16.mxu0 %v6905_v53  ;;  %5457 = vmatprep.subr.bf16.mxu1 %v7379_v59 }
 0x8d9   :  { %5434 = vmatpush1.bf16.msra.mxu0 %v6907_v62  ;;  %5459 = vmatpush3.bf16.msra.mxu1 %v6941_v23 }
 0x8da   :  { %5436 = vmatprep.subr.bf16.mxu0 %v6912_v54  ;;  %5460 = vmatprep.subr.bf16.mxu1 %v7379_v59 }
 0x8dd   :  { %5438 = vmatpush1.bf16.msra.mxu0 %v6918_v47  ;;  %5462 = vmatpush3.bf16.msra.mxu1 %v6945_v26 }
 0x8de   :  { %5464 = vmatprep.subr.bf16.mxu0 %v6869_v60  ;;  %5495 = vmatprep.subr.bf16.mxu1 %v7379_v59 }
 0x98f   :  { %v7014_v42 = vpop.f32.mrb[46].mxu1 }
 0x990   :  { %v7016_v25 = vpop.f32.mrb[47].mxu1 }
 0x993   :  { %v2248_v33 = vpop.f32.mrb[16].mxu0  ;;  %v2319_v44 = vpop.f32.mrb[48].mxu1 }
 0x994   :  { %v5863_v57 = vadd.f32 %v2248_v33, %v7020_v17  ;;  %v2250_v1 = vpop.f32.mrb[17].mxu0  ;;  %v4485_v15 = vpop.f32.mrb[49].mxu1  ;;  %v2343_v3 = vadd.f32 %v7031_v45, %v2319_v44 }
 0x995   :  { %v5864_v34 = vadd.f32 %v2250_v1, %v7024_v39 }
 0x996   :  { %v3721_v20 = vmul.f32 -1.442695, %v5863_v57 }
 0x997   :  { %v3722_v41 = vmul.f32 -1.442695, %v5864_v34 }
 0x998   :  { %5989 = vpow2.f32 %v3721_v20 }
 0x999   :  { %5991 = vpow2.f32 %v3722_v41 }
 0x9a2   :  { %v5990_v27 = vpop.eup %5989 }
 0x9a3   :  { %v2327_v31 = vadd.f32 1.0, %v5990_v27  ;;  %v5992_v40 = vpop.eup %5991 }
 0x9a4   :  { %v2334_v63 = vadd.f32 1.0, %v5992_v40 }
 0x9a5   :  { %5993 = vrcp.f32 %v2327_v31 }
 0x9a6   :  { %5995 = vrcp.f32 %v2334_v63 }
 0x9af   :  { %v5994_v46 = vpop.eup %5993 }
 0x9b0   :  { %v2344_v12 = vmul.f32 %v5994_v46, %v2343_v3  ;;  %v5996_v4 = vpop.eup %5995 }
 0x9b1   :  { %v2347_v55 = vsub.f32 1.0, %v5996_v4  ;;  %v2349_v33 = vmul.f32 %v5996_v4, %v6970_v28 }
 0x9b2   :  { %v2345_v2 = vadd.f32 %v2344_v12, %v2064_v32 }
 0x9b4   :  { %5997 = vtanh.f32 %v2345_v2 }
 0x9be   :  { %v5998_v61 = vpop.eup %5997 }
 0x9bf   :  { %v2348_v14 = vmul.f32 %v5998_v61, %v2347_v55 }
 0x9c1   :  { %v7041_v0 = vadd.f32 %v2349_v33, %v2348_v14 }
 0x9c3   :  { %2420 = vmatmul.mubr.f32.vlgmr.msra.gmra.mrb[18].mxu0 %v7041_v0  ;;  %4519 = vmatmul.mubr.f32.vlgmr.msra.gmra.mrb[50].mxu1 %v7041_v0 }
 0x9c4   :  { %5466 = vmatpush1.bf16.msra.mxu0 %v6871_v11  ;;  %5497 = vmatpush3.bf16.msra.mxu1 %v6909_v38 }
 0x9c5   :  { %5468 = vmatprep.subr.bf16.mxu0 %v6875_v9  ;;  %5498 = vmatprep.subr.bf16.mxu1 %v7379_v59 }
 0x9c6   :  { %2586 = vmatprep.mubr.f32.mxu0 %v7380_v56  ;;  %4553 = vmatprep.mubr.msk.f32.mxu1 %vm6245_vm0, %v7380_v56 }
 0x9c8   :  { %5470 = vmatpush1.bf16.msra.mxu0 %v6877_v43  ;;  %5500 = vmatpush3.bf16.msra.mxu1 %v6920_v8 }
 0x9c9   :  { %5472 = vmatprep.subr.bf16.mxu0 %v6881_v48  ;;  %5501 = vmatprep.subr.bf16.mxu1 %v7379_v59 }
 0x9cc   :  { %5474 = vmatpush1.bf16.msra.mxu0 %v6883_v13  ;;  %5503 = vmatpush3.bf16.msra.mxu1 %v6926_v7 }
 0x9cd   :  { %5476 = vmatprep.subr.bf16.mxu0 %v6887_v35  ;;  %5504 = vmatprep.subr.bf16.mxu1 %v7379_v59 }
 0x9d0   :  { %5478 = vmatpush1.bf16.msra.mxu0 %v6889_v52  ;;  %5506 = vmatpush3.bf16.msra.mxu1 %v6929_v18 }
 0x9d1   :  { %5480 = vmatprep.subr.bf16.mxu0 %v6893_v6  ;;  %5507 = vmatprep.subr.bf16.mxu1 %v7379_v59 }
 0x9d4   :  { %5482 = vmatpush1.bf16.msra.mxu0 %v6895_v29  ;;  %5509 = vmatpush3.bf16.msra.mxu1 %v6933_v16 }
 0x9d5   :  { %5484 = vmatprep.subr.bf16.mxu0 %v6899_v21  ;;  %5510 = vmatprep.subr.bf16.mxu1 %v7379_v59 }
 0x9d8   :  { %5486 = vmatpush1.bf16.msra.mxu0 %v6901_v36  ;;  %5512 = vmatpush3.bf16.msra.mxu1 %v6937_v5 }
 0x9d9   :  { %5488 = vmatprep.subr.bf16.mxu0 %v6905_v53  ;;  %5513 = vmatprep.subr.bf16.mxu1 %v7379_v59 }
 0x9dc   :  { %5490 = vmatpush1.bf16.msra.mxu0 %v6907_v62  ;;  %5515 = vmatpush3.bf16.msra.mxu1 %v6941_v23 }
 0x9dd   :  { %5492 = vmatprep.subr.bf16.mxu0 %v6912_v54  ;;  %5516 = vmatprep.subr.bf16.mxu1 %v7379_v59 }
 0x9e0   :  { %5494 = vmatpush1.bf16.msra.mxu0 %v6918_v47  ;;  %5518 = vmatpush3.bf16.msra.mxu1 %v6945_v26 }
 0x9e1   :  { %5520 = vmatprep.subr.bf16.mxu0 %v6869_v60  ;;  %5551 = vmatprep.subr.bf16.mxu1 %v7379_v59 }
 0xa96   :  { %v2421_v19 = vpop.f32.mrb[18].mxu0  ;;  %v2492_v28 = vpop.f32.mrb[50].mxu1 }
 0xa97   :  { %v5865_v24 = vadd.f32 %v2421_v19, %v7020_v17  ;;  %v2423_v22 = vpop.f32.mrb[19].mxu0  ;;  %v4520_v44 = vpop.f32.mrb[51].mxu1  ;;  %v2510_v31 = vadd.f32 %v7031_v45, %v2492_v28 }
 0xa98   :  { %v5866_v1 = vadd.f32 %v2423_v22, %v7024_v39 }
 0xa99   :  { %v3724_v57 = vmul.f32 -1.442695, %v5865_v24 }
 0xa9a   :  { %v3725_v15 = vmul.f32 -1.442695, %v5866_v1 }
 0xa9b   :  { %5999 = vpow2.f32 %v3724_v57 }
 0xa9c   :  { %6001 = vpow2.f32 %v3725_v15 }
 0xaa5   :  { %v6000_v20 = vpop.eup %5999 }
 0xaa6   :  { %v2500_v34 = vadd.f32 1.0, %v6000_v20  ;;  %v6002_v41 = vpop.eup %6001 }
 0xaa7   :  { %v2507_v27 = vadd.f32 1.0, %v6002_v41  ;;  %v2074_v41 = vadd.f32 %v6962_v37, %v7035_v51 }
 0xaa8   :  { %6003 = vrcp.f32 %v2500_v34 }
 0xaa9   :  { %6005 = vrcp.f32 %v2507_v27 }
 0xab2   :  { %v6004_v40 = vpop.eup %6003 }
 0xab3   :  { %v2511_v63 = vmul.f32 %v6004_v40, %v2510_v31  ;;  %v6006_v46 = vpop.eup %6005 }
 0xab4   :  { %v2514_v32 = vsub.f32 1.0, %v6006_v46  ;;  %v2516_v4 = vmul.f32 %v6006_v46, %v7041_v0 }
 0xab5   :  { %v2512_v3 = vadd.f32 %v2511_v63, %v2069_v49 }
 0xab7   :  { %6007 = vtanh.f32 %v2512_v3 }
 0xac1   :  { %v6008_v12 = vpop.eup %6007 }
 0xac2   :  { %v2515_v2 = vmul.f32 %v6008_v12, %v2514_v32 }
 0xac4   :  { %v7086_v55 = vadd.f32 %v2516_v4, %v2515_v2 }
 0xac6   :  { %2587 = vmatmul.mubr.f32.vlgmr.msra.gmra.mrb[20].mxu0 %v7086_v55  ;;  %4554 = vmatmul.mubr.f32.vlgmr.msra.gmra.mrb[52].mxu1 %v7086_v55 }
 0xac7   :  { %5522 = vmatpush1.bf16.msra.mxu0 %v6871_v11  ;;  %5553 = vmatpush3.bf16.msra.mxu1 %v6909_v38 }
 0xac8   :  { %5524 = vmatprep.subr.bf16.mxu0 %v6875_v9  ;;  %5554 = vmatprep.subr.bf16.mxu1 %v7379_v59 }
 0xac9   :  { %2753 = vmatprep.mubr.f32.mxu0 %v7380_v56  ;;  %4588 = vmatprep.mubr.msk.f32.mxu1 %vm6245_vm0, %v7380_v56 }
 0xacb   :  { %5526 = vmatpush1.bf16.msra.mxu0 %v6877_v43  ;;  %5556 = vmatpush3.bf16.msra.mxu1 %v6920_v8 }
 0xacc   :  { %5528 = vmatprep.subr.bf16.mxu0 %v6881_v48  ;;  %5557 = vmatprep.subr.bf16.mxu1 %v7379_v59 }
 0xacf   :  { %5530 = vmatpush1.bf16.msra.mxu0 %v6883_v13  ;;  %5559 = vmatpush3.bf16.msra.mxu1 %v6926_v7 }
 0xad0   :  { %5532 = vmatprep.subr.bf16.mxu0 %v6887_v35  ;;  %5560 = vmatprep.subr.bf16.mxu1 %v7379_v59 }
 0xad3   :  { %5534 = vmatpush1.bf16.msra.mxu0 %v6889_v52  ;;  %5562 = vmatpush3.bf16.msra.mxu1 %v6929_v18 }
 0xad4   :  { %5536 = vmatprep.subr.bf16.mxu0 %v6893_v6  ;;  %5563 = vmatprep.subr.bf16.mxu1 %v7379_v59 }
 0xad7   :  { %5538 = vmatpush1.bf16.msra.mxu0 %v6895_v29  ;;  %5565 = vmatpush3.bf16.msra.mxu1 %v6933_v16 }
 0xad8   :  { %5540 = vmatprep.subr.bf16.mxu0 %v6899_v21  ;;  %5566 = vmatprep.subr.bf16.mxu1 %v7379_v59 }
 0xadb   :  { %5542 = vmatpush1.bf16.msra.mxu0 %v6901_v36  ;;  %5568 = vmatpush3.bf16.msra.mxu1 %v6937_v5 }
 0xadc   :  { %5544 = vmatprep.subr.bf16.mxu0 %v6905_v53  ;;  %5569 = vmatprep.subr.bf16.mxu1 %v7379_v59 }
 0xadf   :  { %5546 = vmatpush1.bf16.msra.mxu0 %v6907_v62  ;;  %5571 = vmatpush3.bf16.msra.mxu1 %v6941_v23 }
 0xae0   :  { %5548 = vmatprep.subr.bf16.mxu0 %v6912_v54  ;;  %5572 = vmatprep.subr.bf16.mxu1 %v7379_v59 }
 0xae3   :  { %5550 = vmatpush1.bf16.msra.mxu0 %v6918_v47  ;;  %5574 = vmatpush3.bf16.msra.mxu1 %v6945_v26 }
 0xae4   :  { %5576 = vmatprep.subr.bf16.mxu0 %v6869_v60  ;;  %5607 = vmatprep.subr.bf16.mxu1 %v7379_v59 }
 0xb99   :  { %v2588_v10 = vpop.f32.mrb[20].mxu0  ;;  %v2659_v61 = vpop.f32.mrb[52].mxu1 }
 0xb9a   :  { %v5867_v14 = vadd.f32 %v2588_v10, %v7020_v17  ;;  %v2590_v33 = vpop.f32.mrb[21].mxu0  ;;  %v4555_v19 = vpop.f32.mrb[53].mxu1  ;;  %v2677_v20 = vadd.f32 %v7031_v45, %v2659_v61 }
 0xb9b   :  { %v5868_v24 = vadd.f32 %v2590_v33, %v7024_v39 }
 0xb9c   :  { %v3726_v28 = vmul.f32 -1.442695, %v5867_v14 }
 0xb9d   :  { %v3727_v22 = vmul.f32 -1.442695, %v5868_v24 }
 0xb9e   :  { %6009 = vpow2.f32 %v3726_v28 }
 0xb9f   :  { %6011 = vpow2.f32 %v3727_v22 }
 0xba8   :  { %v6010_v44 = vpop.eup %6009 }
 0xba9   :  { %v2667_v57 = vadd.f32 1.0, %v6010_v44  ;;  %v6012_v1 = vpop.eup %6011 }
 0xbaa   :  { %v2674_v15 = vadd.f32 1.0, %v6012_v1  ;;  %v2079_v1 = vadd.f32 %v6960_v30, %v7035_v51 }
 0xbab   :  { %6013 = vrcp.f32 %v2667_v57 }
 0xbac   :  { %6015 = vrcp.f32 %v2674_v15 }
 0xbb5   :  { %v6014_v34 = vpop.eup %6013 }
 0xbb6   :  { %v2678_v27 = vmul.f32 %v6014_v34, %v2677_v20  ;;  %v6016_v40 = vpop.eup %6015 }
 0xbb7   :  { %v2681_v49 = vsub.f32 1.0, %v6016_v40  ;;  %v2683_v46 = vmul.f32 %v6016_v40, %v7086_v55 }
 0xbb8   :  { %v2679_v31 = vadd.f32 %v2678_v27, %v2074_v41 }
 0xbba   :  { %6017 = vtanh.f32 %v2679_v31 }
 0xbc4   :  { %v6018_v63 = vpop.eup %6017 }
 0xbc5   :  { %v2682_v3 = vmul.f32 %v6018_v63, %v2681_v49 }
 0xbc7   :  { %v7131_v32 = vadd.f32 %v2683_v46, %v2682_v3 }
 0xbc9   :  { %2754 = vmatmul.mubr.f32.vlgmr.msra.gmra.mrb[22].mxu0 %v7131_v32  ;;  %4589 = vmatmul.mubr.f32.vlgmr.msra.gmra.mrb[54].mxu1 %v7131_v32 }
 0xbca   :  { %5578 = vmatpush1.bf16.msra.mxu0 %v6871_v11  ;;  %5609 = vmatpush3.bf16.msra.mxu1 %v6909_v38 }
 0xbcb   :  { %5580 = vmatprep.subr.bf16.mxu0 %v6875_v9  ;;  %5610 = vmatprep.subr.bf16.mxu1 %v7379_v59 }
 0xbcc   :  { %2920 = vmatprep.mubr.f32.mxu0 %v7380_v56  ;;  %4623 = vmatprep.mubr.msk.f32.mxu1 %vm6245_vm0, %v7380_v56 }
 0xbce   :  { %5582 = vmatpush1.bf16.msra.mxu0 %v6877_v43  ;;  %5612 = vmatpush3.bf16.msra.mxu1 %v6920_v8 }
 0xbcf   :  { %5584 = vmatprep.subr.bf16.mxu0 %v6881_v48  ;;  %5613 = vmatprep.subr.bf16.mxu1 %v7379_v59 }
 0xbd2   :  { %5586 = vmatpush1.bf16.msra.mxu0 %v6883_v13  ;;  %5615 = vmatpush3.bf16.msra.mxu1 %v6926_v7 }
 0xbd3   :  { %5588 = vmatprep.subr.bf16.mxu0 %v6887_v35  ;;  %5616 = vmatprep.subr.bf16.mxu1 %v7379_v59 }
 0xbd6   :  { %5590 = vmatpush1.bf16.msra.mxu0 %v6889_v52  ;;  %5618 = vmatpush3.bf16.msra.mxu1 %v6929_v18 }
 0xbd7   :  { %5592 = vmatprep.subr.bf16.mxu0 %v6893_v6  ;;  %5619 = vmatprep.subr.bf16.mxu1 %v7379_v59 }
 0xbda   :  { %5594 = vmatpush1.bf16.msra.mxu0 %v6895_v29  ;;  %5621 = vmatpush3.bf16.msra.mxu1 %v6933_v16 }
 0xbdb   :  { %5596 = vmatprep.subr.bf16.mxu0 %v6899_v21  ;;  %5622 = vmatprep.subr.bf16.mxu1 %v7379_v59 }
 0xbde   :  { %5598 = vmatpush1.bf16.msra.mxu0 %v6901_v36  ;;  %5624 = vmatpush3.bf16.msra.mxu1 %v6937_v5 }
 0xbdf   :  { %5600 = vmatprep.subr.bf16.mxu0 %v6905_v53  ;;  %5625 = vmatprep.subr.bf16.mxu1 %v7379_v59 }
 0xbe2   :  { %5602 = vmatpush1.bf16.msra.mxu0 %v6907_v62  ;;  %5627 = vmatpush3.bf16.msra.mxu1 %v6941_v23 }
 0xbe3   :  { %5604 = vmatprep.subr.bf16.mxu0 %v6912_v54  ;;  %5628 = vmatprep.subr.bf16.mxu1 %v7379_v59 }
 0xbe6   :  { %5606 = vmatpush1.bf16.msra.mxu0 %v6918_v47  ;;  %5630 = vmatpush3.bf16.msra.mxu1 %v6945_v26 }
 0xbe7   :  { %5632 = vmatprep.subr.bf16.mxu0 %v6869_v60  ;;  %5663 = vmatprep.subr.bf16.mxu1 %v7379_v59 }
 0xc9c   :  { %v2755_v37 = vpop.f32.mrb[22].mxu0  ;;  %v2826_v12 = vpop.f32.mrb[54].mxu1 }
 0xc9d   :  { %v5869_v2 = vadd.f32 %v2755_v37, %v7020_v17  ;;  %v2757_v4 = vpop.f32.mrb[23].mxu0  ;;  %v4590_v10 = vpop.f32.mrb[55].mxu1  ;;  %v2844_v44 = vadd.f32 %v7031_v45, %v2826_v12 }
 0xc9e   :  { %v5870_v14 = vadd.f32 %v2757_v4, %v7024_v39 }
 0xc9f   :  { %v3728_v61 = vmul.f32 -1.442695, %v5869_v2 }
 0xca0   :  { %v3729_v33 = vmul.f32 -1.442695, %v5870_v14 }
 0xca1   :  { %6019 = vpow2.f32 %v3728_v61 }
 0xca2   :  { %6021 = vpow2.f32 %v3729_v33 }
 0xcab   :  { %v6020_v19 = vpop.eup %6019 }
 0xcac   :  { %v2834_v28 = vadd.f32 1.0, %v6020_v19  ;;  %v6022_v24 = vpop.eup %6021 }
 0xcad   :  { %v2841_v22 = vadd.f32 1.0, %v6022_v24  ;;  %v2084_v24 = vadd.f32 %v6966_v58, %v7035_v51 }
 0xcae   :  { %6023 = vrcp.f32 %v2834_v28 }
 0xcaf   :  { %6025 = vrcp.f32 %v2841_v22 }
 0xcb8   :  { %v6024_v57 = vpop.eup %6023 }
 0xcb9   :  { %v2845_v15 = vmul.f32 %v6024_v57, %v2844_v44  ;;  %v6026_v34 = vpop.eup %6025 }
 0xcba   :  { %v2848_v41 = vsub.f32 1.0, %v6026_v34  ;;  %v2850_v40 = vmul.f32 %v6026_v34, %v7131_v32 }
 0xcbb   :  { %v2846_v20 = vadd.f32 %v2845_v15, %v2079_v1 }
 0xcbd   :  { %6027 = vtanh.f32 %v2846_v20 }
 0xcc7   :  { %v6028_v27 = vpop.eup %6027 }
 0xcc8   :  { %v2849_v31 = vmul.f32 %v6028_v27, %v2848_v41 }
 0xcca   :  { %v7176_v49 = vadd.f32 %v2850_v40, %v2849_v31 }
 0xccc   :  { %2921 = vmatmul.mubr.f32.vlgmr.msra.gmra.mrb[24].mxu0 %v7176_v49  ;;  %4624 = vmatmul.mubr.f32.vlgmr.msra.gmra.mrb[56].mxu1 %v7176_v49 }
 0xccd   :  { %5634 = vmatpush1.bf16.msra.mxu0 %v6871_v11  ;;  %5665 = vmatpush3.bf16.msra.mxu1 %v6909_v38 }
 0xcce   :  { %5636 = vmatprep.subr.bf16.mxu0 %v6875_v9  ;;  %5666 = vmatprep.subr.bf16.mxu1 %v7379_v59 }
 0xccf   :  { %3087 = vmatprep.mubr.f32.mxu0 %v7380_v56  ;;  %4658 = vmatprep.mubr.msk.f32.mxu1 %vm6245_vm0, %v7380_v56 }
 0xcd1   :  { %5638 = vmatpush1.bf16.msra.mxu0 %v6877_v43  ;;  %5668 = vmatpush3.bf16.msra.mxu1 %v6920_v8 }
 0xcd2   :  { %5640 = vmatprep.subr.bf16.mxu0 %v6881_v48  ;;  %5669 = vmatprep.subr.bf16.mxu1 %v7379_v59 }
 0xcd5   :  { %5642 = vmatpush1.bf16.msra.mxu0 %v6883_v13  ;;  %5671 = vmatpush3.bf16.msra.mxu1 %v6926_v7 }
 0xcd6   :  { %5644 = vmatprep.subr.bf16.mxu0 %v6887_v35  ;;  %5672 = vmatprep.subr.bf16.mxu1 %v7379_v59 }
 0xcd9   :  { %5646 = vmatpush1.bf16.msra.mxu0 %v6889_v52  ;;  %5674 = vmatpush3.bf16.msra.mxu1 %v6929_v18 }
 0xcda   :  { %5648 = vmatprep.subr.bf16.mxu0 %v6893_v6  ;;  %5675 = vmatprep.subr.bf16.mxu1 %v7379_v59 }
 0xcdd   :  { %5650 = vmatpush1.bf16.msra.mxu0 %v6895_v29  ;;  %5677 = vmatpush3.bf16.msra.mxu1 %v6933_v16 }
 0xcde   :  { %5652 = vmatprep.subr.bf16.mxu0 %v6899_v21  ;;  %5678 = vmatprep.subr.bf16.mxu1 %v7379_v59 }
 0xce1   :  { %5654 = vmatpush1.bf16.msra.mxu0 %v6901_v36  ;;  %5680 = vmatpush3.bf16.msra.mxu1 %v6937_v5 }
 0xce2   :  { %5656 = vmatprep.subr.bf16.mxu0 %v6905_v53  ;;  %5681 = vmatprep.subr.bf16.mxu1 %v7379_v59 }
 0xce5   :  { %5658 = vmatpush1.bf16.msra.mxu0 %v6907_v62  ;;  %5683 = vmatpush3.bf16.msra.mxu1 %v6941_v23 }
 0xce6   :  { %5660 = vmatprep.subr.bf16.mxu0 %v6912_v54  ;;  %5684 = vmatprep.subr.bf16.mxu1 %v7379_v59 }
 0xce9   :  { %5662 = vmatpush1.bf16.msra.mxu0 %v6918_v47  ;;  %5686 = vmatpush3.bf16.msra.mxu1 %v6945_v26 }
 0xcea   :  { %5688 = vmatprep.subr.bf16.mxu0 %v6869_v60  ;;  %5719 = vmatprep.subr.bf16.mxu1 %v7379_v59 }
 0xd9f   :  { %v2922_v30 = vpop.f32.mrb[24].mxu0  ;;  %v2993_v63 = vpop.f32.mrb[56].mxu1 }
 0xda0   :  { %v5871_v3 = vadd.f32 %v2922_v30, %v7020_v17  ;;  %v2924_v46 = vpop.f32.mrb[25].mxu0  ;;  %v4625_v37 = vpop.f32.mrb[57].mxu1  ;;  %v3011_v19 = vadd.f32 %v7031_v45, %v2993_v63 }
 0xda1   :  { %v5872_v2 = vadd.f32 %v2924_v46, %v7024_v39 }
 0xda2   :  { %v3730_v12 = vmul.f32 -1.442695, %v5871_v3 }
 0xda3   :  { %v3731_v4 = vmul.f32 -1.442695, %v5872_v2 }
 0xda4   :  { %6029 = vpow2.f32 %v3730_v12 }
 0xda5   :  { %6031 = vpow2.f32 %v3731_v4 }
 0xdae   :  { %v6030_v10 = vpop.eup %6029 }
 0xdaf   :  { %v3001_v61 = vadd.f32 1.0, %v6030_v10  ;;  %v6032_v14 = vpop.eup %6031 }
 0xdb0   :  { %v3008_v33 = vadd.f32 1.0, %v6032_v14 }
 0xdb1   :  { %6033 = vrcp.f32 %v3001_v61  ;;  %v2089_v61 = vadd.f32 %v6964_v50, %v7035_v51 }
 0xdb2   :  { %6035 = vrcp.f32 %v3008_v33 }
 0xdbb   :  { %v6034_v28 = vpop.eup %6033 }
 0xdbc   :  { %v3012_v22 = vmul.f32 %v6034_v28, %v3011_v19  ;;  %v6036_v57 = vpop.eup %6035 }
 0xdbd   :  { %v3015_v1 = vsub.f32 1.0, %v6036_v57  ;;  %v3017_v34 = vmul.f32 %v6036_v57, %v7176_v49 }
 0xdbe   :  { %v3013_v44 = vadd.f32 %v3012_v22, %v2084_v24 }
 0xdc0   :  { %6037 = vtanh.f32 %v3013_v44 }
 0xdca   :  { %v6038_v15 = vpop.eup %6037 }
 0xdcb   :  { %v3016_v20 = vmul.f32 %v6038_v15, %v3015_v1 }
 0xdcd   :  { %v7221_v41 = vadd.f32 %v3017_v34, %v3016_v20  ;;  %v3535_v34 = vld [vmem:[#allocation13 + $0x20] sm:$0xff] }
 0xdcf   :  { %3088 = vmatmul.mubr.f32.vlgmr.msra.gmra.mrb[26].mxu0 %v7221_v41  ;;  %4659 = vmatmul.mubr.f32.vlgmr.msra.gmra.mrb[58].mxu1 %v7221_v41 }
 0xdd0   :  { %5690 = vmatpush1.bf16.msra.mxu0 %v6871_v11  ;;  %5721 = vmatpush3.bf16.msra.mxu1 %v6909_v38 }
 0xdd1   :  { %5692 = vmatprep.subr.bf16.mxu0 %v6875_v9  ;;  %5722 = vmatprep.subr.bf16.mxu1 %v7379_v59 }
 0xdd2   :  { %3254 = vmatprep.mubr.f32.mxu0 %v7380_v56  ;;  %4693 = vmatprep.mubr.msk.f32.mxu1 %vm6245_vm0, %v7380_v56 }
 0xdd4   :  { %5694 = vmatpush1.bf16.msra.mxu0 %v6877_v43  ;;  %5724 = vmatpush3.bf16.msra.mxu1 %v6920_v8 }
 0xdd5   :  { %5696 = vmatprep.subr.bf16.mxu0 %v6881_v48  ;;  %5725 = vmatprep.subr.bf16.mxu1 %v7379_v59 }
 0xdd8   :  { %5698 = vmatpush1.bf16.msra.mxu0 %v6883_v13  ;;  %5727 = vmatpush3.bf16.msra.mxu1 %v6926_v7 }
 0xdd9   :  { %5700 = vmatprep.subr.bf16.mxu0 %v6887_v35  ;;  %5728 = vmatprep.subr.bf16.mxu1 %v7379_v59 }
 0xddc   :  { %5702 = vmatpush1.bf16.msra.mxu0 %v6889_v52  ;;  %5730 = vmatpush3.bf16.msra.mxu1 %v6929_v18 }
 0xddd   :  { %5704 = vmatprep.subr.bf16.mxu0 %v6893_v6  ;;  %5731 = vmatprep.subr.bf16.mxu1 %v7379_v59 }
 0xde0   :  { %5706 = vmatpush1.bf16.msra.mxu0 %v6895_v29  ;;  %5733 = vmatpush3.bf16.msra.mxu1 %v6933_v16 }
 0xde1   :  { %5708 = vmatprep.subr.bf16.mxu0 %v6899_v21  ;;  %5734 = vmatprep.subr.bf16.mxu1 %v7379_v59 }
 0xde4   :  { %5710 = vmatpush1.bf16.msra.mxu0 %v6901_v36  ;;  %5736 = vmatpush3.bf16.msra.mxu1 %v6937_v5 }
 0xde5   :  { %5712 = vmatprep.subr.bf16.mxu0 %v6905_v53  ;;  %5737 = vmatprep.subr.bf16.mxu1 %v7379_v59 }
 0xde8   :  { %5714 = vmatpush1.bf16.msra.mxu0 %v6907_v62  ;;  %5739 = vmatpush3.bf16.msra.mxu1 %v6941_v23 }
 0xde9   :  { %5716 = vmatprep.subr.bf16.mxu0 %v6912_v54  ;;  %5740 = vmatprep.subr.bf16.mxu1 %v7379_v59 }
 0xdec   :  { %5718 = vmatpush1.bf16.msra.mxu0 %v6918_v47  ;;  %5742 = vmatpush3.bf16.msra.mxu1 %v6945_v26 }
 0xded   :  { %5744 = vmatprep.subr.bf16.mxu0 %v6869_v60  ;;  %5775 = vmatprep.subr.bf16.mxu1 %v7379_v59 }
 0xea2   :  { %v3089_v58 = vpop.f32.mrb[26].mxu0  ;;  %v3160_v27 = vpop.f32.mrb[58].mxu1 }
 0xea3   :  { %v5873_v31 = vadd.f32 %v3089_v58, %v7020_v17  ;;  %v3091_v40 = vpop.f32.mrb[27].mxu0  ;;  %v4660_v30 = vpop.f32.mrb[59].mxu1  ;;  %v3178_v60 = vadd.f32 %v7031_v45, %v3160_v27  ;;  %v3536_v58 = vld [vmem:[#allocation13 + $0x28] sm:$0xff]  ;;  %v3537_v27 = vld [vmem:[#allocation13 + $0x30] sm:$0xff] }
 0xea4   :  { %v5874_v3 = vadd.f32 %v3091_v40, %v7024_v39  ;;  %v3539_v30 = vld [vmem:[#allocation13 + $0x40] sm:$0xff] }
 0xea5   :  { %v3732_v63 = vmul.f32 -1.442695, %v5873_v31  ;;  %v3538_v31 = vld [vmem:[#allocation13 + $0x38] sm:$0xff] }
 0xea6   :  { %v3733_v46 = vmul.f32 -1.442695, %v5874_v3  ;;  %v5811_v40 = vpack.c.bf16 %v3538_v31, %v3537_v27 }
 0xea7   :  { %6039 = vpow2.f32 %v3732_v63  ;;  %v3540_v63 = vld [vmem:[#allocation13 + $0x48] sm:$0xff] }
 0xea8   :  { %6041 = vpow2.f32 %v3733_v46  ;;  %v5815_v3 = vpack.c.bf16 %v3540_v63, %v3539_v30  ;;  %v3541_v46 = vld [vmem:[#allocation13 + $0x50] sm:$0xff] }
 0xeb1   :  { %v6040_v37 = vpop.eup %6039 }
 0xeb2   :  { %v3168_v12 = vadd.f32 1.0, %v6040_v37  ;;  %v6042_v2 = vpop.eup %6041  ;;  %v3542_v37 = vld [vmem:[#allocation13 + $0x58] sm:$0xff] }
 0xeb3   :  { %v3175_v4 = vadd.f32 1.0, %v6042_v2  ;;  %v3543_v2 = vld [vmem:[#allocation13 + $0x60] sm:$0xff] }
 0xeb4   :  { %6043 = vrcp.f32 %v3168_v12  ;;  %v5819_v12 = vpack.c.bf16 %v3542_v37, %v3541_v46 }
 0xeb5   :  { %6045 = vrcp.f32 %v3175_v4  ;;  %v3544_v4 = vld [vmem:[#allocation13 + $0x68] sm:$0xff] }
 0xebe   :  { %v6044_v10 = vpop.eup %6043 }
 0xebf   :  { %v3179_v14 = vmul.f32 %v6044_v10, %v3178_v60  ;;  %v6046_v19 = vpop.eup %6045  ;;  %v3545_v60 = vld [vmem:[#allocation13 + $0x70] sm:$0xff]  ;;  %v3546_v10 = vld [vmem:[#allocation13 + $0x78] sm:$0xff] }
 0xec0   :  { %v3182_v28 = vsub.f32 1.0, %v6046_v19  ;;  %v3184_v44 = vmul.f32 %v6046_v19, %v7221_v41 }
 0xec1   :  { %v3180_v33 = vadd.f32 %v3179_v14, %v2089_v61  ;;  %v5827_v61 = vpack.c.bf16 %v3546_v10, %v3545_v60 }
 0xec3   :  { %6047 = vtanh.f32 %v3180_v33 }
 0xecd   :  { %v6048_v24 = vpop.eup %6047 }
 0xece   :  { %v3183_v22 = vmul.f32 %v6048_v24, %v3182_v28 }
 0xed0   :  { %v7266_v57 = vadd.f32 %v3184_v44, %v3183_v22 }
 0xed2   :  { %3255 = vmatmul.mubr.f32.vlgmr.msra.gmra.mrb[28].mxu0 %v7266_v57  ;;  %4694 = vmatmul.mubr.f32.vlgmr.msra.gmra.mrb[60].mxu1 %v7266_v57 }
 0xed3   :  { %5746 = vmatpush1.bf16.msra.mxu0 %v6871_v11  ;;  %5777 = vmatpush3.bf16.msra.mxu1 %v6909_v38  ;;  %v3532_v11 = vld [vmem:[#allocation13 + $0x8] sm:$0xff] }
 0xed4   :  { %5748 = vmatprep.subr.bf16.mxu0 %v6875_v9  ;;  %5778 = vmatprep.subr.bf16.mxu1 %v7379_v59 }
 0xed5   :  { %3421 = vmatprep.mubr.f32.mxu0 %v7380_v56  ;;  %4728 = vmatprep.mubr.msk.f32.mxu1 %vm6245_vm0, %v7380_v56  ;;  %v3531_v56 = vld [vmem:[#allocation13] sm:$0xff] }
 0xed6   :  { %v5799_v9 = vpack.c.bf16 %v3532_v11, %v3531_v56 }
 0xed7   :  { %5750 = vmatpush1.bf16.msra.mxu0 %v6877_v43  ;;  %5780 = vmatpush3.bf16.msra.mxu1 %v6920_v8 }
 0xed8   :  { %5752 = vmatprep.subr.bf16.mxu0 %v6881_v48  ;;  %5781 = vmatprep.subr.bf16.mxu1 %v7379_v59 }
 0xedb   :  { %5754 = vmatpush1.bf16.msra.mxu0 %v6883_v13  ;;  %5783 = vmatpush3.bf16.msra.mxu1 %v6926_v7 }
 0xedc   :  { %5756 = vmatprep.subr.bf16.mxu0 %v6887_v35  ;;  %5784 = vmatprep.subr.bf16.mxu1 %v7379_v59 }
 0xedf   :  { %5758 = vmatpush1.bf16.msra.mxu0 %v6889_v52  ;;  %5786 = vmatpush3.bf16.msra.mxu1 %v6929_v18 }
 0xee0   :  { %5760 = vmatprep.subr.bf16.mxu0 %v6893_v6  ;;  %5787 = vmatprep.subr.bf16.mxu1 %v7379_v59 }
 0xee3   :  { %5762 = vmatpush1.bf16.msra.mxu0 %v6895_v29  ;;  %5789 = vmatpush3.bf16.msra.mxu1 %v6933_v16 }
 0xee4   :  { %5764 = vmatprep.subr.bf16.mxu0 %v6899_v21  ;;  %5790 = vmatprep.subr.bf16.mxu1 %v7379_v59 }
 0xee7   :  { %5766 = vmatpush1.bf16.msra.mxu0 %v6901_v36  ;;  %5792 = vmatpush3.bf16.msra.mxu1 %v6937_v5 }
 0xee8   :  { %5768 = vmatprep.subr.bf16.mxu0 %v6905_v53  ;;  %5793 = vmatprep.subr.bf16.mxu1 %v7379_v59 }
 0xeeb   :  { %5770 = vmatpush1.bf16.msra.mxu0 %v6907_v62  ;;  %5795 = vmatpush3.bf16.msra.mxu1 %v6941_v23  ;;  %v3533_v23 = vld [vmem:[#allocation13 + $0x10] sm:$0xff] }
 0xeec   :  { %5772 = vmatprep.subr.bf16.mxu0 %v6912_v54  ;;  %5796 = vmatprep.subr.bf16.mxu1 %v7379_v59 }
 0xeef   :  { %5774 = vmatpush1.bf16.msra.mxu0 %v6918_v47  ;;  %5798 = vmatpush3.bf16.msra.mxu1 %v6945_v26  ;;  %v2094_v47 = vadd.f32 %v7016_v25, %v7035_v51  ;;  %v3534_v26 = vld [vmem:[#allocation13 + $0x18] sm:$0xff]  ;;  %v5807_v25 = vpack.c.bf16 %v3536_v58, %v3535_v34 }
 0xef0   :  { %5800 = vmatprep.subr.bf16.mxu0 %v5799_v9  ;;  %v5803_v20 = vpack.c.bf16 %v3534_v26, %v3533_v23 }
 0xfa5   :  { %v3256_v43 = vpop.f32.mrb[28].mxu0  ;;  %v3327_v48 = vpop.f32.mrb[60].mxu1 }
 0xfa6   :  { %v5875_v13 = vadd.f32 %v3256_v43, %v7020_v17  ;;  %v3258_v35 = vpop.f32.mrb[29].mxu0  ;;  %v4695_v52 = vpop.f32.mrb[61].mxu1  ;;  %v3345_v38 = vadd.f32 %v7031_v45, %v3327_v48 }
 0xfa7   :  { %v5876_v29 = vadd.f32 %v3258_v35, %v7024_v39 }
 0xfa8   :  { %v3734_v6 = vmul.f32 -1.442695, %v5875_v13 }
 0xfa9   :  { %v3735_v21 = vmul.f32 -1.442695, %v5876_v29 }
 0xfaa   :  { %6049 = vpow2.f32 %v3734_v6 }
 0xfab   :  { %6051 = vpow2.f32 %v3735_v21 }
 0xfb4   :  { %v6050_v59 = vpop.eup %6049 }
 0xfb5   :  { %v3335_v36 = vadd.f32 1.0, %v6050_v59  ;;  %v6052_v53 = vpop.eup %6051 }
 0xfb6   :  { %v3342_v62 = vadd.f32 1.0, %v6052_v53 }
 0xfb7   :  { %6053 = vrcp.f32 %v3335_v36 }
 0xfb8   :  { %6055 = vrcp.f32 %v3342_v62 }
 0xfc1   :  { %v6054_v54 = vpop.eup %6053 }
 0xfc2   :  { %v3346_v8 = vmul.f32 %v6054_v54, %v3345_v38  ;;  %v6056_v18 = vpop.eup %6055 }
 0xfc3   :  { %v3349_v16 = vsub.f32 1.0, %v6056_v18  ;;  %v3351_v1 = vmul.f32 %v6056_v18, %v7266_v57 }
 0xfc4   :  { %v3347_v7 = vadd.f32 %v3346_v8, %v2094_v47 }
 0xfc6   :  { %6057 = vtanh.f32 %v3347_v7 }
 0xfd0   :  { %v6058_v5 = vpop.eup %6057 }
 0xfd1   :  { %v3350_v50 = vmul.f32 %v6058_v5, %v3349_v16 }
 0xfd3   :  { %v7309_v15 = vadd.f32 %v3351_v1, %v3350_v50 }
 0xfd5   :  { %3422 = vmatmul.mubr.f32.vlgmr.msra.gmra.mrb[30].mxu0 %v7309_v15  ;;  %4729 = vmatmul.mubr.f32.vlgmr.msra.gmra.mrb[62].mxu1 %v7309_v15 }
 0xfd6   :  { %5802 = vmatpush3.bf16.msra.mxu0 %v5799_v9  ;;  %4763 = vmatprep.mubr.f32.mxu0 %v7041_v0  ;;  %v5823_v0 = vpack.c.bf16 %v3544_v4, %v3543_v2  ;;  %v2099_v9 = vadd.f32 %v7014_v42, %v7035_v51 }
 0xfd7   :  { %5804 = vmatprep.subr.bf16.mxu0 %v5803_v20 }
 0xfda   :  { %5806 = vmatpush3.bf16.msra.mxu0 %v5803_v20 }
 0xfdb   :  { %5808 = vmatprep.subr.bf16.mxu0 %v5807_v25 }
 0xfde   :  { %5810 = vmatpush3.bf16.msra.mxu0 %v5807_v25 }
 0xfdf   :  { %5812 = vmatprep.subr.bf16.mxu0 %v5811_v40 }
 0xfe2   :  { %5814 = vmatpush3.bf16.msra.mxu0 %v5811_v40 }
 0xfe3   :  { %5816 = vmatprep.subr.bf16.mxu0 %v5815_v3 }
 0xfe6   :  { %5818 = vmatpush3.bf16.msra.mxu0 %v5815_v3 }
 0xfe7   :  { %5820 = vmatprep.subr.bf16.mxu0 %v5819_v12 }
 0xfea   :  { %5822 = vmatpush3.bf16.msra.mxu0 %v5819_v12 }
 0xfeb   :  { %5824 = vmatprep.subr.bf16.mxu0 %v5823_v0 }
 0xfee   :  { %5826 = vmatpush3.bf16.msra.mxu0 %v5823_v0 }
 0xfef   :  { %5828 = vmatprep.subr.bf16.mxu0 %v5827_v61 }
 0xff2   :  { %5830 = vmatpush3.bf16.msra.mxu0 %v5827_v61 }
 0xff5   :  { %4764 = vmatmul.mubr.f32.vlgmr.msra.gmra.mrb[32].mxu0 %v7086_v55 }
 0xff6   :  { %4766 = vmatprep.mubr.f32.mxu0 %v7131_v32 }
 0xff9   :  { %4767 = vmatmul.mubr.f32.gmra.mrb[34].mxu0 %v7176_v49 }
 0xffa   :  { %4769 = vmatprep.mubr.f32.mxu0 %v7221_v41 }
 0xffd   :  { %4770 = vmatmul.mubr.f32.gmra.mrb[36].mxu0 %v7266_v57 }
 0xffe   :  { %4772 = vmatprep.mubr.f32.mxu0 %v7309_v15 }
0x10a8   :  { %v3423_v14 = vpop.f32.mrb[30].mxu0  ;;  %v3494_v33 = vpop.f32.mrb[62].mxu1 }
0x10a9   :  { %v5877_v19 = vadd.f32 %v3423_v14, %v7020_v17  ;;  %v3425_v28 = vpop.f32.mrb[31].mxu0  ;;  %v4730_v24 = vpop.f32.mrb[63].mxu1  ;;  %v3512_v57 = vadd.f32 %v7031_v45, %v3494_v33 }
0x10aa   :  { %v5878_v44 = vadd.f32 %v3425_v28, %v7024_v39  ;;  %v3738_v39 = vld [vmem:[%s7366_s7] ss:$0 sm:$0xff]  ;;  %s6246_s7 = smov [#allocation15]  }
0x10ab   :  { %v3736_v22 = vmul.f32 -1.442695, %v5877_v19  ;;  %s3684_s21 = sshll.u32 %s6246_s7, 4  ;;  %s3685_s21 = int_to_ptr.vmem [resolvable:$true] %s3684_s21 }
0x10ac   :  { %v3737_v55 = vmul.f32 -1.442695, %v5878_v44  ;;  %s6180_s0 = scalar_lea.vmem %s3685_s21, 256  ;;  %p6185_p13 = scmp.lt.s32.totalorder %s3685_s21, %s3685_s21 }
0x10ad   :  { %6059 = vpow2.f32 %v3736_v22  ;;  %p6181_p12 = scmp.ne.s32.totalorder %s3685_s21, %s6180_s0  ;;  %p6186_p0 = scmp.lt.s32.totalorder %s6180_s0, %s6180_s0 }
0x10ae   :  { %6061 = vpow2.f32 %v3737_v55 }
0x10af   :  { %p6187_p1 = por %p6186_p0, %p6185_p13 }
0x10b1   :  { %p6188_p2 = pnand %p6187_p1, %p6181_p12 }
0x10b7   :  { %v6060_v32 = vpop.eup %6059 }
0x10b8   :  { %v3502_v49 = vadd.f32 1.0, %v6060_v32  ;;  %v6062_v41 = vpop.eup %6061 }
0x10b9   :  { %v3509_v56 = vadd.f32 1.0, %v6062_v41 }
0x10ba   :  { %6063 = vrcp.f32 %v3502_v49 }
0x10bb   :  { %6065 = vrcp.f32 %v3509_v56 }
0x10c4   :  { %v6064_v11 = vpop.eup %6063 }
0x10c5   :  { %v3513_v17 = vmul.f32 %v6064_v11, %v3512_v57  ;;  %v6066_v59 = vpop.eup %6065 }
0x10c6   :  { %v3516_v62 = vsub.f32 1.0, %v6066_v59  ;;  %v3518_v47 = vmul.f32 %v6066_v59, %v7309_v15 }
0x10c7   :  { %v3514_v43 = vadd.f32 %v3513_v17, %v2099_v9 }
0x10c8   :  { %v4765_v48 = vpop.f32.mrb[32].mxu0 }
0x10c9   :  { %6067 = vtanh.f32 %v3514_v43  ;;  %v3626_v13 = vadd.f32 %v4765_v48, %v3738_v39  ;;  %v3620_v35 = vpop.f32.mrb[33].mxu0 }
0x10ca   :  { %v3621_v52 = vadd.f32 %v3738_v39, %v3620_v35 }
0x10cb   :  { %3660 = vst [vmem:[#allocation14 + $0x8] sm:$0xff] %v3626_v13 }
0x10cc   :  { %3659 = vst [vmem:[#allocation14] sm:$0xff] %v3621_v52  ;;  %v4768_v6 = vpop.f32.mrb[34].mxu0 }
0x10cd   :  { %v3636_v45 = vadd.f32 %v4768_v6, %v3738_v39  ;;  %v3630_v29 = vpop.f32.mrb[35].mxu0 }
0x10ce   :  { %v3631_v21 = vadd.f32 %v3738_v39, %v3630_v29 }
0x10cf   :  { %3662 = vst [vmem:[#allocation14 + $0x18] sm:$0xff] %v3636_v45 }
0x10d0   :  { %3661 = vst [vmem:[#allocation14 + $0x10] sm:$0xff] %v3631_v21  ;;  %v4771_v42 = vpop.f32.mrb[36].mxu0 }
0x10d1   :  { %v3646_v51 = vadd.f32 %v4771_v42, %v3738_v39  ;;  %v3640_v36 = vpop.f32.mrb[37].mxu0 }
0x10d2   :  { %v3641_v53 = vadd.f32 %v3738_v39, %v3640_v36 }
0x10d3   :  { %v6068_v38 = vpop.eup %6067  ;;  %3664 = vst [vmem:[#allocation14 + $0x28] sm:$0xff] %v3646_v51 }
0x10d4   :  { %3663 = vst [vmem:[#allocation14 + $0x20] sm:$0xff] %v3641_v53  ;;  %v3517_v54 = vmul.f32 %v6068_v38, %v3516_v62 }
0x10d6   :  { %v3519_v8 = vadd.f32 %v3518_v47, %v3517_v54 }
0x10d8   :  { %4773 = vmatmul.mubr.f32.gmra.mrb[38].mxu0 %v3519_v8  ;;  %3522 = vst [vmem:[#allocation15 + $0x8] sm:$0xff] %v3519_v8 }
0x10d9   :  { %6191 = shalt.err (!%p6188_p2)
}
0x10da   :  { %s6192_s23 = scalar_lea.hbm %s7368_s9, 256 }
0x10db   :  { %p6193_p3 = scmp.ne.s32.totalorder %s7368_s9, %s6192_s23  ;;  %p6196_p4 = scmp.lt.u32.totalorder %s6192_s23, %s7368_s9 }
0x10dd   :  { %p6198_p5 = pnand %p6196_p4, %p6193_p3 }
0x10df   :  { %6201 = shalt.err (!%p6198_p5)
}
0x10e0   :  { %3690 = dma.vmem_to_hbm [thread:$0]  %s3685_s21, 256, %s7368_s9, [#allocation16], %s6235_s19, %s6235_s19, %s6236_s20  }
0x10e1   :  { %s6247_s11 = smov [#allocation14]  }
0x10e2   :  { %s3672_s2 = sshll.u32 %s6247_s11, 4  ;;  %s3673_s2 = int_to_ptr.vmem [resolvable:$true] %s3672_s2 }
0x10e3   :  { %s6202_s10 = scalar_lea.vmem %s3673_s2, 1024  ;;  %p6207_p7 = scmp.lt.s32.totalorder %s3673_s2, %s3673_s2 }
0x10e4   :  { %p6203_p6 = scmp.ne.s32.totalorder %s3673_s2, %s6202_s10  ;;  %p6208_p8 = scmp.lt.s32.totalorder %s6202_s10, %s6202_s10 }
0x10e6   :  { %p6209_p9 = por %p6208_p8, %p6207_p7 }
0x10e8   :  { %p6210_p10 = pnand %p6209_p9, %p6203_p6 }
0x11ab   :  { %v4774_v7 = vpop.f32.mrb[38].mxu0 }
0x11ac   :  { %v3656_v18 = vadd.f32 %v4774_v7, %v3738_v39  ;;  %v3650_v16 = vpop.f32.mrb[39].mxu0 }
0x11ad   :  { %v3651_v5 = vadd.f32 %v3738_v39, %v3650_v16 }
0x11ae   :  { %3666 = vst [vmem:[#allocation14 + $0x38] sm:$0xff] %v3656_v18 }
0x11af   :  { %3665 = vst [vmem:[#allocation14 + $0x30] sm:$0xff] %v3651_v5 }
0x11b0   :  { %6213 = shalt.err (!%p6210_p10)
}
0x11b1   :  { %s6214_s9 = scalar_lea.hbm %s7367_s8, 1024 }
0x11b2   :  { %p6215_p11 = scmp.ne.s32.totalorder %s7367_s8, %s6214_s9  ;;  %p6218_p12 = scmp.lt.u32.totalorder %s6214_s9, %s7367_s8 }
0x11b4   :  { %p6220_p13 = pnand %p6218_p12, %p6215_p11 }
0x11b6   :  { %6223 = shalt.err (!%p6220_p13)
}
0x11b7   :  { %3678 = dma.vmem_to_hbm [thread:$0]  %s3673_s2, 1024, %s7367_s8, [#allocation7], %s6235_s19, %s6235_s19, %s6236_s20  }
0x11b8   :  { %6230 = dma.done.wait [#allocation7], 1024  }
0x11b9   :  { %6231 = vsyncadd [#allocation7], 4294966272 }
0x11ba   :  { %6232 = dma.done.wait [#allocation16], 256  }
0x11bb   :  { %6233 = vsyncadd [#allocation16], 4294967040 }
0x11bc   :  { %3697 = vsyncpa [#allocation6], 1 }
0x11bd   :  { %3698 = vsyncpa [#allocation9], 1 }
0x11be   :  { %3699 = vsyncpa [#allocation12], 1 }
0x11bf   :  { %3700 = vsyncpa [#allocation7], 1 }
0x11c0   :  { %3701 = vsyncpa [#allocation16], 1 }

</bundles_post_ra>
